<compile_context>
chip_gen: v7x
topology: tpu7x:2x2x1
jax: 0.10.0
libtpu: 0.0.40
codegen_flags: <defaults>
</compile_context>

<pallas_src>
import functools

import jax
import jax.numpy as jnp
from jax import lax
from jax.experimental import pallas as pl
from jax.experimental.pallas import tpu as pltpu


def _relu(z):
    return jnp.maximum(z, 0.0)


def _cdiv(a, b):
    return -(-a // b)


def _round_up(a, m):
    return _cdiv(a, m) * m


# -----------------------------------------------------------------------------
# Fused implicit-im2col kernel (stride == 1, arbitrary padding / dilation).
# -----------------------------------------------------------------------------
def _fused_conv_kernel(xa_ref, xb_ref, w_ref, b_ref, o_ref, xwin_ref, *,
                       offsets, act):
    """One grid step computes one (tm, Cout_p) block of the 'holey' output.

    xa_ref   : (tm, Cin)   rows [t*tm, (t+1)*tm) of the flattened padded input
    xb_ref   : (tm, Cin)   the next row block (covers all shifted reads)
    w_ref    : (kh*kw, Cin, Cout_p)  one (Cin, Cout_p) weight slab per tap
    b_ref    : (1, Cout_p)
    o_ref    : (tm, Cout_p) f32 output block (accumulated in place)
    xwin_ref : (2*tm, Cin)  VMEM window scratch
    """
    tm = xa_ref.shape[0]
    # Stitch the two pipelined blocks into one contiguous VMEM window so every
    # kernel-tap offset is a cheap static slice.
    xwin_ref[0:tm, :] = xa_ref[...]
    xwin_ref[tm:2 * tm, :] = xb_ref[...]

    # f32 accumulation directly in the (f32) output block; kh*kw is small and
    # static, so the tap loop is unrolled at trace time.
    o_ref[...] = jnp.zeros_like(o_ref)
    for kk, off in enumerate(offsets):
        xs = xwin_ref[off:off + tm, :]                     # shifted (tm, Cin) rows
        o_ref[...] += jnp.dot(xs, w_ref[kk],
                              preferred_element_type=jnp.float32)
    o_ref[...] = act(o_ref[...] + b_ref[...])              # fused bias + activation


def _conv_fused_stride1(x, w, b, *, pad, dilation, act, tm_req):
    n, h, wdt, cin = x.shape
    kh, kw, _, cout = w.shape
    d = dilation
    hp, wp = h + 2 * pad, wdt + 2 * pad
    eff_kh, eff_kw = (kh - 1) * d + 1, (kw - 1) * d + 1
    ho, wo = hp - eff_kh + 1, wp - eff_kw + 1

    # Static per-tap row offsets in the flattened (N*Hp*Wp, Cin) view:
    #   out row q = n*Hp*Wp + ho*Wp + wo  needs input row  q + i*d*Wp + j*d.
    offsets = tuple(i * d * wp + j * d for i in range(kh) for j in range(kw))
    max_off = offsets[-1]

    m_rows = n * hp * wp          # 'holey' output rows we compute (holes discarded)
    # Tile size: large (amortizes per-step overhead), multiple of 8, at least
    # max_off (so the 2-block window covers every tap), and small enough that the
    # grid keeps >= 2 parallel steps (both v7x TensorCores get work).
    tm = _round_up(max(min(tm_req, _cdiv(m_rows, 2)), max_off, 8), 8)
    n_tiles = _cdiv(m_rows, tm)

    cout_p = _round_up(cout, 128)           # lane-dense output / full MXU N tile

    # Flatten the spatially padded input; add tail rows so the "next" block of the
    # last grid step stays in bounds.  Only input-sized copies here -- the
    # kh*kw-inflated im2col matrix is never materialized in HBM.
    xp = jnp.pad(x, ((0, 0), (pad, pad), (pad, pad), (0, 0)))
    x2 = xp.reshape(n * hp * wp, cin)
    x2 = jnp.pad(x2, ((0, (n_tiles + 1) * tm - m_rows), (0, 0)))

    w_p = jnp.pad(w, ((0, 0), (0, 0), (0, 0), (0, cout_p - cout)))
    w_p = w_p.reshape(kh * kw, cin, cout_p)      # tap-major, matches `offsets`
    b_p = jnp.pad(b.reshape(1, cout), ((0, 0), (0, cout_p - cout)))

    kernel = functools.partial(_fused_conv_kernel, offsets=offsets, act=act)
    o2 = pl.pallas_call(
        kernel,
        out_shape=jax.ShapeDtypeStruct((n_tiles * tm, cout_p), jnp.float32),
        grid=(n_tiles,),
        in_specs=[
            pl.BlockSpec((tm, cin), lambda t: (t, 0)),       # current row block
            pl.BlockSpec((tm, cin), lambda t: (t + 1, 0)),   # next row block
            pl.BlockSpec((kh * kw, cin, cout_p), lambda t: (0, 0, 0)),  # weights
            pl.BlockSpec((1, cout_p), lambda t: (0, 0)),     # bias
        ],
        out_specs=pl.BlockSpec((tm, cout_p), lambda t: (t, 0)),
        scratch_shapes=[pltpu.VMEM((2 * tm, cin), x.dtype)],
        compiler_params=pltpu.CompilerParams(
            dimension_semantics=("parallel",)),
    )(x2, x2, w_p, b_p)

    # Drop the padded rows, the 'hole' columns and the padded output channels.
    return o2[:m_rows].reshape(n, hp, wp, cout_p)[:, :ho, :wo, :cout]


# -----------------------------------------------------------------------------
# Fallback for stride > 1: im2col + GEMM (lane-dense Cout, 128-aligned K).
# -----------------------------------------------------------------------------
def _gemm_kernel(p_ref, w_ref, b_ref, o_ref, *, act):
    z = jnp.dot(p_ref[...], w_ref[...], preferred_element_type=jnp.float32)
    o_ref[...] = act(z + b_ref[...]).astype(o_ref.dtype)


def _im2col(x, kh, kw, pad, stride, dilation):
    n, h, w, cin = x.shape
    xp = jnp.pad(x, ((0, 0), (pad, pad), (pad, pad), (0, 0)))
    hp, wp = h + 2 * pad, w + 2 * pad
    eff_kh = (kh - 1) * dilation + 1
    eff_kw = (kw - 1) * dilation + 1
    ho = (hp - eff_kh) // stride + 1
    wo = (wp - eff_kw) // stride + 1
    cols = []
    for i in range(kh):
        for j in range(kw):
            r0, c0 = i * dilation, j * dilation
            cols.append(xp[:, r0:r0 + (ho - 1) * stride + 1:stride,
                              c0:c0 + (wo - 1) * stride + 1:stride, :])
    patches = jnp.stack(cols, axis=3)                    # (N, Ho, Wo, kh*kw, Cin)
    return patches.reshape(n * ho * wo, kh * kw * cin), (n, ho, wo)


def _conv_gemm(x, w, b, *, pad, stride, dilation, act, tm_req):
    kh, kw, cin, cout = w.shape
    patches, (n, ho, wo) = _im2col(x, kh, kw, pad, stride, dilation)
    m, k = patches.shape

    kp = _round_up(k, 128)                   # 128-aligned contraction dim
    cout_p = _round_up(cout, 128)            # lane-dense output
    patches = jnp.pad(patches, ((0, 0), (0, kp - k)))
    w_mat = jnp.pad(w.reshape(k, cout), ((0, kp - k), (0, cout_p - cout)))
    b_row = jnp.pad(b.reshape(1, cout), ((0, 0), (0, cout_p - cout)))

    tm = _round_up(max(min(tm_req, _cdiv(m, 2)), 8), 8)
    n_tiles = _cdiv(m, tm)                   # partial last block handled by Pallas

    out = pl.pallas_call(
        functools.partial(_gemm_kernel, act=act),
        out_shape=jax.ShapeDtypeStruct((m, cout_p), jnp.float32),
        grid=(n_tiles,),
        in_specs=[
            pl.BlockSpec((tm, kp), lambda i: (i, 0)),
            pl.BlockSpec((kp, cout_p), lambda i: (0, 0)),
            pl.BlockSpec((1, cout_p), lambda i: (0, 0)),
        ],
        out_specs=pl.BlockSpec((tm, cout_p), lambda i: (i, 0)),
        compiler_params=pltpu.CompilerParams(
            dimension_semantics=("parallel",)),
    )(patches, w_mat, b_row)

    return out[:, :cout].reshape(n, ho, wo, cout)


# -----------------------------------------------------------------------------
# Public wrapper: TorchConv2DLayer.forward equivalent.
# -----------------------------------------------------------------------------
@functools.partial(jax.jit, static_argnames=("pad", "stride", "dilation",
                                             "act_fn", "out_layout", "tm"))
def conv2d_pallas(x_nhwc, w_hwio, b, *, pad, stride, dilation,
                  act_fn=_relu, out_layout="NCHW", tm=512):
    """Conv2d(padding=pad, stride=stride, dilation=dilation) + bias + act_fn.

    `dilation` is the actual dilation (the torch module passes
    hparams['dilation'] + 1 to nn.Conv2d).
    """
    b = b.reshape(-1)
    if stride == 1:
        y = _conv_fused_stride1(x_nhwc, w_hwio, b, pad=pad, dilation=dilation,
                                act=act_fn, tm_req=tm)
    else:
        y = _conv_gemm(x_nhwc, w_hwio, b, pad=pad, stride=stride,
                       dilation=dilation, act=act_fn, tm_req=tm)
    if out_layout == "NCHW":                 # torch forward() returns NCHW
        return jnp.transpose(y, (0, 3, 1, 2))
    return y


if __name__ == "__main__":
    # Small shapes consistent with the module.
    N, H, W, Cin = 2, 16, 16, 4
    Cout, KH, KW = 8, 3, 3

    key = jax.random.PRNGKey(0)
    kx, kw_, kb = jax.random.split(key, 3)
    x = jax.random.normal(kx, (N, H, W, Cin), dtype=jnp.float32)          # NHWC
    w = jax.random.normal(kw_, (KH, KW, Cin, Cout), dtype=jnp.float32) * 0.1
    b = jax.random.normal(kb, (Cout,), dtype=jnp.float32) * 0.1

    def reference(x, w, b, pad, stride, dil):
        x_nchw = jnp.transpose(x, (0, 3, 1, 2))
        w_oihw = jnp.transpose(w, (3, 2, 0, 1))
        z = lax.conv_general_dilated(
            x_nchw, w_oihw, window_strides=(stride, stride),
            padding=[(pad, pad), (pad, pad)], rhs_dilation=(dil, dil),
            dimension_numbers=("NCHW", "OIHW", "NCHW"))
        return jnp.maximum(z + b.reshape(1, -1, 1, 1), 0.0)

    # (pad, stride, torch 'dilation' hparam) -- actual dilation = hparam + 1.
    cases = [
        (1, 1, 0),   # fused implicit-im2col path
        (2, 1, 1),   # fused path with dilation = 2
        (1, 2, 0),   # strided fallback (im2col GEMM) path
    ]
    for pad, stride, dil_hp in cases:
        dil = dil_hp + 1
        y = conv2d_pallas(x, w, b, pad=pad, stride=stride, dilation=dil)
        y = jax.block_until_ready(y)
        y_ref = reference(x, w, b, pad, stride, dil)
        assert y.shape == y_ref.shape, (y.shape, y_ref.shape)
        err = float(jnp.max(jnp.abs(y - y_ref)))
        assert err < 1e-3, (pad, stride, dil, err)

    print("KERNEL_OK")
</pallas_src>

<mosaic_0001>
module attributes {stable_mosaic.version = 11 : i64} {
  func.func @_fused_conv_kernel(%arg0: i32, %arg1: memref<328x4xf32, #tpu.memory_space<vmem>>, %arg2: memref<328x4xf32, #tpu.memory_space<vmem>>, %arg3: memref<9x4x128xf32, #tpu.memory_space<vmem>>, %arg4: memref<1x128xf32, #tpu.memory_space<vmem>>, %arg5: memref<328x128xf32, #tpu.memory_space<vmem>>, %arg6: memref<656x4xf32, #tpu.memory_space<vmem>>) attributes {dimension_semantics = [#tpu.dimension_semantics<parallel>], iteration_bounds = array<i64: 2>, scalar_prefetch = 0 : i64, scratch_operands = 1 : i64, tpu.core_type = #tpu.core_type<tc>, window_params = [{transform_indices = @transform_0, window_bounds = array<i64: 328, 4>}, {transform_indices = @transform_1, window_bounds = array<i64: 328, 4>}, {pipeline_mode = #tpu.pipeline_mode<synchronous>, transform_indices = @transform_2, window_bounds = array<i64: 9, 4, 128>}, {pipeline_mode = #tpu.pipeline_mode<synchronous>, transform_indices = @transform_3, window_bounds = array<i64: 1, 128>}, {transform_indices = @transform_4, window_bounds = array<i64: 328, 128>}]} {
    %c0 = arith.constant 0 : index
    %c0_0 = arith.constant 0 : index
    %0 = vector.load %arg1[%c0, %c0_0] : memref<328x4xf32, #tpu.memory_space<vmem>>, vector<328x4xf32>
    %c0_1 = arith.constant 0 : index
    %c0_2 = arith.constant 0 : index
    %1 = vector.load %arg6[%c0_1, %c0_2] : memref<656x4xf32, #tpu.memory_space<vmem>>, vector<328x4xf32>
    tpu.vector_store %arg6[%c0_1, %c0_2], %0 {strides = array<i32>} : memref<656x4xf32, #tpu.memory_space<vmem>>, vector<328x4xf32>,
    %c0_3 = arith.constant 0 : index
    %c0_4 = arith.constant 0 : index
    %2 = vector.load %arg2[%c0_3, %c0_4] : memref<328x4xf32, #tpu.memory_space<vmem>>, vector<328x4xf32>
    %c328 = arith.constant 328 : index
    %c0_5 = arith.constant 0 : index
    %3 = vector.load %arg6[%c328, %c0_5] : memref<656x4xf32, #tpu.memory_space<vmem>>, vector<328x4xf32>
    tpu.vector_store %arg6[%c328, %c0_5], %2 {strides = array<i32>} : memref<656x4xf32, #tpu.memory_space<vmem>>, vector<328x4xf32>,
    %cst = arith.constant 0.000000e+00 : f32
    %4 = vector.broadcast %cst : f32 to vector<328x128xf32>
    %c0_6 = arith.constant 0 : index
    %c0_7 = arith.constant 0 : index
    %5 = vector.load %arg5[%c0_6, %c0_7] : memref<328x128xf32, #tpu.memory_space<vmem>>, vector<328x128xf32>
    tpu.vector_store %arg5[%c0_6, %c0_7], %4 {strides = array<i32>} : memref<328x128xf32, #tpu.memory_space<vmem>>, vector<328x128xf32>,
    %c0_8 = arith.constant 0 : index
    %c0_9 = arith.constant 0 : index
    %6 = vector.load %arg6[%c0_8, %c0_9] : memref<656x4xf32, #tpu.memory_space<vmem>>, vector<328x4xf32>
    %c0_10 = arith.constant 0 : index
    %c0_11 = arith.constant 0 : index
    %7 = vector.load %arg5[%c0_10, %c0_11] : memref<328x128xf32, #tpu.memory_space<vmem>>, vector<328x128xf32>
    %c0_12 = arith.constant 0 : index
    %c0_13 = arith.constant 0 : index
    %c0_14 = arith.constant 0 : index
    %8 = vector.load %arg3[%c0_12, %c0_13, %c0_14] : memref<9x4x128xf32, #tpu.memory_space<vmem>>, vector<1x4x128xf32>
    %9 = vector.shape_cast %8 : vector<1x4x128xf32> to vector<4x128xf32>
    %cst_15 = arith.constant dense<0.000000e+00> : vector<328x128xf32>
    %10 = tpu.matmul %6, %9, %cst_15 {dimension_numbers = #tpu.dot_dimension_numbers<[1], [0], [0], [1], [0, 0, 1, 1], [], []>} : vector<328x4xf32>, vector<4x128xf32>, vector<328x128xf32> -> vector<328x128xf32>
    %11 = arith.addf %7, %10 : vector<328x128xf32>
    %c0_16 = arith.constant 0 : index
    %c0_17 = arith.constant 0 : index
    %12 = vector.load %arg5[%c0_16, %c0_17] : memref<328x128xf32, #tpu.memory_space<vmem>>, vector<328x128xf32>
    tpu.vector_store %arg5[%c0_16, %c0_17], %11 {strides = array<i32>} : memref<328x128xf32, #tpu.memory_space<vmem>>, vector<328x128xf32>,
    %c1 = arith.constant 1 : index
    %c0_18 = arith.constant 0 : index
    %13 = vector.load %arg6[%c1, %c0_18] : memref<656x4xf32, #tpu.memory_space<vmem>>, vector<328x4xf32>
    %c0_19 = arith.constant 0 : index
    %c0_20 = arith.constant 0 : index
    %14 = vector.load %arg5[%c0_19, %c0_20] : memref<328x128xf32, #tpu.memory_space<vmem>>, vector<328x128xf32>
    %c1_21 = arith.constant 1 : index
    %c0_22 = arith.constant 0 : index
    %c0_23 = arith.constant 0 : index
    %15 = vector.load %arg3[%c1_21, %c0_22, %c0_23] : memref<9x4x128xf32, #tpu.memory_space<vmem>>, vector<1x4x128xf32>
    %16 = vector.shape_cast %15 : vector<1x4x128xf32> to vector<4x128xf32>
    %cst_24 = arith.constant dense<0.000000e+00> : vector<328x128xf32>
    %17 = tpu.matmul %13, %16, %cst_24 {dimension_numbers = #tpu.dot_dimension_numbers<[1], [0], [0], [1], [0, 0, 1, 1], [], []>} : vector<328x4xf32>, vector<4x128xf32>, vector<328x128xf32> -> vector<328x128xf32>
    %18 = arith.addf %14, %17 : vector<328x128xf32>
    %c0_25 = arith.constant 0 : index
    %c0_26 = arith.constant 0 : index
    %19 = vector.load %arg5[%c0_25, %c0_26] : memref<328x128xf32, #tpu.memory_space<vmem>>, vector<328x128xf32>
    tpu.vector_store %arg5[%c0_25, %c0_26], %18 {strides = array<i32>} : memref<328x128xf32, #tpu.memory_space<vmem>>, vector<328x128xf32>,
    %c2 = arith.constant 2 : index
    %c0_27 = arith.constant 0 : index
    %20 = vector.load %arg6[%c2, %c0_27] : memref<656x4xf32, #tpu.memory_space<vmem>>, vector<328x4xf32>
    %c0_28 = arith.constant 0 : index
    %c0_29 = arith.constant 0 : index
    %21 = vector.load %arg5[%c0_28, %c0_29] : memref<328x128xf32, #tpu.memory_space<vmem>>, vector<328x128xf32>
    %c2_30 = arith.constant 2 : index
    %c0_31 = arith.constant 0 : index
    %c0_32 = arith.constant 0 : index
    %22 = vector.load %arg3[%c2_30, %c0_31, %c0_32] : memref<9x4x128xf32, #tpu.memory_space<vmem>>, vector<1x4x128xf32>
    %23 = vector.shape_cast %22 : vector<1x4x128xf32> to vector<4x128xf32>
    %cst_33 = arith.constant dense<0.000000e+00> : vector<328x128xf32>
    %24 = tpu.matmul %20, %23, %cst_33 {dimension_numbers = #tpu.dot_dimension_numbers<[1], [0], [0], [1], [0, 0, 1, 1], [], []>} : vector<328x4xf32>, vector<4x128xf32>, vector<328x128xf32> -> vector<328x128xf32>
    %25 = arith.addf %21, %24 : vector<328x128xf32>
    %c0_34 = arith.constant 0 : index
    %c0_35 = arith.constant 0 : index
    %26 = vector.load %arg5[%c0_34, %c0_35] : memref<328x128xf32, #tpu.memory_space<vmem>>, vector<328x128xf32>
    tpu.vector_store %arg5[%c0_34, %c0_35], %25 {strides = array<i32>} : memref<328x128xf32, #tpu.memory_space<vmem>>, vector<328x128xf32>,
    %c18 = arith.constant 18 : index
    %c0_36 = arith.constant 0 : index
    %27 = vector.load %arg6[%c18, %c0_36] : memref<656x4xf32, #tpu.memory_space<vmem>>, vector<328x4xf32>
    %c0_37 = arith.constant 0 : index
    %c0_38 = arith.constant 0 : index
    %28 = vector.load %arg5[%c0_37, %c0_38] : memref<328x128xf32, #tpu.memory_space<vmem>>, vector<328x128xf32>
    %c3 = arith.constant 3 : index
    %c0_39 = arith.constant 0 : index
    %c0_40 = arith.constant 0 : index
    %29 = vector.load %arg3[%c3, %c0_39, %c0_40] : memref<9x4x128xf32, #tpu.memory_space<vmem>>, vector<1x4x128xf32>
    %30 = vector.shape_cast %29 : vector<1x4x128xf32> to vector<4x128xf32>
    %cst_41 = arith.constant dense<0.000000e+00> : vector<328x128xf32>
    %31 = tpu.matmul %27, %30, %cst_41 {dimension_numbers = #tpu.dot_dimension_numbers<[1], [0], [0], [1], [0, 0, 1, 1], [], []>} : vector<328x4xf32>, vector<4x128xf32>, vector<328x128xf32> -> vector<328x128xf32>
    %32 = arith.addf %28, %31 : vector<328x128xf32>
    %c0_42 = arith.constant 0 : index
    %c0_43 = arith.constant 0 : index
    %33 = vector.load %arg5[%c0_42, %c0_43] : memref<328x128xf32, #tpu.memory_space<vmem>>, vector<328x128xf32>
    tpu.vector_store %arg5[%c0_42, %c0_43], %32 {strides = array<i32>} : memref<328x128xf32, #tpu.memory_space<vmem>>, vector<328x128xf32>,
    %c19 = arith.constant 19 : index
    %c0_44 = arith.constant 0 : index
    %34 = vector.load %arg6[%c19, %c0_44] : memref<656x4xf32, #tpu.memory_space<vmem>>, vector<328x4xf32>
    %c0_45 = arith.constant 0 : index
    %c0_46 = arith.constant 0 : index
    %35 = vector.load %arg5[%c0_45, %c0_46] : memref<328x128xf32, #tpu.memory_space<vmem>>, vector<328x128xf32>
    %c4 = arith.constant 4 : index
    %c0_47 = arith.constant 0 : index
    %c0_48 = arith.constant 0 : index
    %36 = vector.load %arg3[%c4, %c0_47, %c0_48] : memref<9x4x128xf32, #tpu.memory_space<vmem>>, vector<1x4x128xf32>
    %37 = vector.shape_cast %36 : vector<1x4x128xf32> to vector<4x128xf32>
    %cst_49 = arith.constant dense<0.000000e+00> : vector<328x128xf32>
    %38 = tpu.matmul %34, %37, %cst_49 {dimension_numbers = #tpu.dot_dimension_numbers<[1], [0], [0], [1], [0, 0, 1, 1], [], []>} : vector<328x4xf32>, vector<4x128xf32>, vector<328x128xf32> -> vector<328x128xf32>
    %39 = arith.addf %35, %38 : vector<328x128xf32>
    %c0_50 = arith.constant 0 : index
    %c0_51 = arith.constant 0 : index
    %40 = vector.load %arg5[%c0_50, %c0_51] : memref<328x128xf32, #tpu.memory_space<vmem>>, vector<328x128xf32>
    tpu.vector_store %arg5[%c0_50, %c0_51], %39 {strides = array<i32>} : memref<328x128xf32, #tpu.memory_space<vmem>>, vector<328x128xf32>,
    %c20 = arith.constant 20 : index
    %c0_52 = arith.constant 0 : index
    %41 = vector.load %arg6[%c20, %c0_52] : memref<656x4xf32, #tpu.memory_space<vmem>>, vector<328x4xf32>
    %c0_53 = arith.constant 0 : index
    %c0_54 = arith.constant 0 : index
    %42 = vector.load %arg5[%c0_53, %c0_54] : memref<328x128xf32, #tpu.memory_space<vmem>>, vector<328x128xf32>
    %c5 = arith.constant 5 : index
    %c0_55 = arith.constant 0 : index
    %c0_56 = arith.constant 0 : index
    %43 = vector.load %arg3[%c5, %c0_55, %c0_56] : memref<9x4x128xf32, #tpu.memory_space<vmem>>, vector<1x4x128xf32>
    %44 = vector.shape_cast %43 : vector<1x4x128xf32> to vector<4x128xf32>
    %cst_57 = arith.constant dense<0.000000e+00> : vector<328x128xf32>
    %45 = tpu.matmul %41, %44, %cst_57 {dimension_numbers = #tpu.dot_dimension_numbers<[1], [0], [0], [1], [0, 0, 1, 1], [], []>} : vector<328x4xf32>, vector<4x128xf32>, vector<328x128xf32> -> vector<328x128xf32>
    %46 = arith.addf %42, %45 : vector<328x128xf32>
    %c0_58 = arith.constant 0 : index
    %c0_59 = arith.constant 0 : index
    %47 = vector.load %arg5[%c0_58, %c0_59] : memref<328x128xf32, #tpu.memory_space<vmem>>, vector<328x128xf32>
    tpu.vector_store %arg5[%c0_58, %c0_59], %46 {strides = array<i32>} : memref<328x128xf32, #tpu.memory_space<vmem>>, vector<328x128xf32>,
    %c36 = arith.constant 36 : index
    %c0_60 = arith.constant 0 : index
    %48 = vector.load %arg6[%c36, %c0_60] : memref<656x4xf32, #tpu.memory_space<vmem>>, vector<328x4xf32>
    %c0_61 = arith.constant 0 : index
    %c0_62 = arith.constant 0 : index
    %49 = vector.load %arg5[%c0_61, %c0_62] : memref<328x128xf32, #tpu.memory_space<vmem>>, vector<328x128xf32>
    %c6 = arith.constant 6 : index
    %c0_63 = arith.constant 0 : index
    %c0_64 = arith.constant 0 : index
    %50 = vector.load %arg3[%c6, %c0_63, %c0_64] : memref<9x4x128xf32, #tpu.memory_space<vmem>>, vector<1x4x128xf32>
    %51 = vector.shape_cast %50 : vector<1x4x128xf32> to vector<4x128xf32>
    %cst_65 = arith.constant dense<0.000000e+00> : vector<328x128xf32>
    %52 = tpu.matmul %48, %51, %cst_65 {dimension_numbers = #tpu.dot_dimension_numbers<[1], [0], [0], [1], [0, 0, 1, 1], [], []>} : vector<328x4xf32>, vector<4x128xf32>, vector<328x128xf32> -> vector<328x128xf32>
    %53 = arith.addf %49, %52 : vector<328x128xf32>
    %c0_66 = arith.constant 0 : index
    %c0_67 = arith.constant 0 : index
    %54 = vector.load %arg5[%c0_66, %c0_67] : memref<328x128xf32, #tpu.memory_space<vmem>>, vector<328x128xf32>
    tpu.vector_store %arg5[%c0_66, %c0_67], %53 {strides = array<i32>} : memref<328x128xf32, #tpu.memory_space<vmem>>, vector<328x128xf32>,
    %c37 = arith.constant 37 : index
    %c0_68 = arith.constant 0 : index
    %55 = vector.load %arg6[%c37, %c0_68] : memref<656x4xf32, #tpu.memory_space<vmem>>, vector<328x4xf32>
    %c0_69 = arith.constant 0 : index
    %c0_70 = arith.constant 0 : index
    %56 = vector.load %arg5[%c0_69, %c0_70] : memref<328x128xf32, #tpu.memory_space<vmem>>, vector<328x128xf32>
    %c7 = arith.constant 7 : index
    %c0_71 = arith.constant 0 : index
    %c0_72 = arith.constant 0 : index
    %57 = vector.load %arg3[%c7, %c0_71, %c0_72] : memref<9x4x128xf32, #tpu.memory_space<vmem>>, vector<1x4x128xf32>
    %58 = vector.shape_cast %57 : vector<1x4x128xf32> to vector<4x128xf32>
    %cst_73 = arith.constant dense<0.000000e+00> : vector<328x128xf32>
    %59 = tpu.matmul %55, %58, %cst_73 {dimension_numbers = #tpu.dot_dimension_numbers<[1], [0], [0], [1], [0, 0, 1, 1], [], []>} : vector<328x4xf32>, vector<4x128xf32>, vector<328x128xf32> -> vector<328x128xf32>
    %60 = arith.addf %56, %59 : vector<328x128xf32>
    %c0_74 = arith.constant 0 : index
    %c0_75 = arith.constant 0 : index
    %61 = vector.load %arg5[%c0_74, %c0_75] : memref<328x128xf32, #tpu.memory_space<vmem>>, vector<328x128xf32>
    tpu.vector_store %arg5[%c0_74, %c0_75], %60 {strides = array<i32>} : memref<328x128xf32, #tpu.memory_space<vmem>>, vector<328x128xf32>,
    %c38 = arith.constant 38 : index
    %c0_76 = arith.constant 0 : index
    %62 = vector.load %arg6[%c38, %c0_76] : memref<656x4xf32, #tpu.memory_space<vmem>>, vector<328x4xf32>
    %c0_77 = arith.constant 0 : index
    %c0_78 = arith.constant 0 : index
    %63 = vector.load %arg5[%c0_77, %c0_78] : memref<328x128xf32, #tpu.memory_space<vmem>>, vector<328x128xf32>
    %c8 = arith.constant 8 : index
    %c0_79 = arith.constant 0 : index
    %c0_80 = arith.constant 0 : index
    %64 = vector.load %arg3[%c8, %c0_79, %c0_80] : memref<9x4x128xf32, #tpu.memory_space<vmem>>, vector<1x4x128xf32>
    %65 = vector.shape_cast %64 : vector<1x4x128xf32> to vector<4x128xf32>
    %cst_81 = arith.constant dense<0.000000e+00> : vector<328x128xf32>
    %66 = tpu.matmul %62, %65, %cst_81 {dimension_numbers = #tpu.dot_dimension_numbers<[1], [0], [0], [1], [0, 0, 1, 1], [], []>} : vector<328x4xf32>, vector<4x128xf32>, vector<328x128xf32> -> vector<328x128xf32>
    %67 = arith.addf %63, %66 : vector<328x128xf32>
    %c0_82 = arith.constant 0 : index
    %c0_83 = arith.constant 0 : index
    %68 = vector.load %arg5[%c0_82, %c0_83] : memref<328x128xf32, #tpu.memory_space<vmem>>, vector<328x128xf32>
    tpu.vector_store %arg5[%c0_82, %c0_83], %67 {strides = array<i32>} : memref<328x128xf32, #tpu.memory_space<vmem>>, vector<328x128xf32>,
    %c0_84 = arith.constant 0 : index
    %c0_85 = arith.constant 0 : index
    %69 = vector.load %arg5[%c0_84, %c0_85] : memref<328x128xf32, #tpu.memory_space<vmem>>, vector<328x128xf32>
    %c0_86 = arith.constant 0 : index
    %c0_87 = arith.constant 0 : index
    %70 = vector.load %arg4[%c0_86, %c0_87] : memref<1x128xf32, #tpu.memory_space<vmem>>, vector<1x128xf32>
    %71 = vector.broadcast %70 : vector<1x128xf32> to vector<328x128xf32>
    %72 = arith.addf %69, %71 : vector<328x128xf32>
    %cst_88 = arith.constant 0.000000e+00 : f32
    %73 = vector.broadcast %cst_88 : f32 to vector<328x128xf32>
    %74 = arith.maximumf %72, %73 : vector<328x128xf32>
    %c0_89 = arith.constant 0 : index
    %c0_90 = arith.constant 0 : index
    %75 = vector.load %arg5[%c0_89, %c0_90] : memref<328x128xf32, #tpu.memory_space<vmem>>, vector<328x128xf32>
    tpu.vector_store %arg5[%c0_89, %c0_90], %74 {strides = array<i32>} : memref<328x128xf32, #tpu.memory_space<vmem>>, vector<328x128xf32>,
    return
  }
  func.func @transform_0(%arg0: i32) -> (i32, i32) {
    %c0_i32 = arith.constant 0 : i32
    %c0_i32_0 = arith.constant 0 : i32
    return %arg0, %c0_i32 : i32, i32
  }
  func.func @transform_1(%arg0: i32) -> (i32, i32) {
    %c1_i32 = arith.constant 1 : i32
    %0 = arith.addi %arg0, %c1_i32 : i32
    %c0_i32 = arith.constant 0 : i32
    %c0_i32_0 = arith.constant 0 : i32
    return %0, %c0_i32 : i32, i32
  }
  func.func @transform_2(%arg0: i32) -> (i32, i32, i32) {
    %c0_i32 = arith.constant 0 : i32
    %c0_i32_0 = arith.constant 0 : i32
    %c0_i32_1 = arith.constant 0 : i32
    %c0_i32_2 = arith.constant 0 : i32
    return %c0_i32, %c0_i32_0, %c0_i32_1 : i32, i32, i32
  }
  func.func @transform_3(%arg0: i32) -> (i32, i32) {
    %c0_i32 = arith.constant 0 : i32
    %c0_i32_0 = arith.constant 0 : i32
    %c0_i32_1 = arith.constant 0 : i32
    return %c0_i32, %c0_i32_0 : i32, i32
  }
  func.func @transform_4(%arg0: i32) -> (i32, i32) {
    %c0_i32 = arith.constant 0 : i32
    %c0_i32_0 = arith.constant 0 : i32
    return %arg0, %c0_i32 : i32, i32
  }
}

</mosaic_0001>

<bundles_post_ra>
// kernel: conv2d_pallas.1
= control target key start
LH: loop header
LB: loop body
LE: loop exit
PB: predicated region body
PF: predicated region fallthrough
CT: control target
= control target key end

     0   :  { %s7680_s15 = smov 0   ;;  %s9470_s0 = inlined_call_operand.vmem [shape: f32[984,4], index: 0, kind: input, shape index: {}, may-alias: {0,1}]   ;;  %s9471_s1 = inlined_call_operand.vmem [shape: f32[984,4], index: 1, kind: input, shape index: {}, may-alias: {0,1}]   ;;  %s9472_s2 = inlined_call_operand.vmem [shape: f32[9,4,128], index: 2, kind: input, shape index: {}]   ;;  %s9473_s3 = inlined_call_operand.vmem [shape: f32[1,128], index: 3, kind: input, shape index: {}]   ;;  %s9474_s4 = inlined_call_operand.vmem [shape: f32[656,128], index: 4, kind: output, shape index: {}]  }
   0x1 LB: > { %s5733_s16 = sadd.s32 4294967295, %s7651_s15   ;;  %p5737_p0 = scmp.ge.s32.totalorder %s7651_s15, 1  ;;  %s7651_s15 = sphi %s7680_s15, %s14_s15  }
   0x2   : > { %p178_p1 = scmp.lt.s32.totalorder %s7651_s15, 3 }
   0x4   : > { %p179_p2 = pnand %p5737_p0, %p178_p1 }
   0x5   : > { %v518_v0 = vld [vmem:[%s9472_s2] sm:$0xf] (!%p179_p2)  ;;  %vm642_vm0 = vcmask (!%p179_p2), 1043456   ;;  %s7693_s19 = smul.u32 (!%p179_p2), 41, %s5733_s16  ;;  %v7653_v1 = vmov (!%p179_p2), 0.0   ;;  %vm7654_vm1 = vmmov (!%p179_p2), 0  }
   0x6   : > { %182 = sbr.rel (%p179_p2) target bundleno = 984 (0x3d8), region = 36  ;;  %7633 = vmatprep.subr.mxu1 (!%p179_p2), %v7653_v1  ;;  %6573 = vmatprep.mubr.msk.f32.mxu1 (!%p179_p2), %vm7654_vm1, %v7653_v1  ;;  %vm271_vm2 = vcmask (!%p179_p2), 31744   ;;  %v5783_v17 = vld [vmem:[%s9472_s2 + $0x4] sm:$0xf] (!%p179_p2)  ;;  %v5826_v29 = vld [vmem:[%s9472_s2 + $0x8] sm:$0xf] (!%p179_p2) }
   0x7   : > { %7634 = vmatpush3.msk.msra.mxu1 (!%p179_p2), %vm642_vm0, %v518_v0  ;;  %p211_p3 = scmp.lt.s32.totalorder (!%p179_p2), %s7693_s19, 122  ;;  %6508 = vmatprep.subr.mxu0 (!%p179_p2), %v7653_v1  ;;  %s216_s7 = sadd.s32 (!%p179_p2), 1, %s5733_s16 }
   0x8   : > { %6633 = vmatprep.subr.mxu1 (!%p179_p2), %v7653_v1  ;;  %6509 = vmatpush3.msk.msra.mxu0 (!%p179_p2), %vm642_vm0, %v518_v0  ;;  %s217_s8 = smul.u32 (!%p179_p2), 41, %s216_s7  ;;  %p225_p5 = scmp.lt.s32.totalorder (!%p179_p2), %s7693_s19, 81 }
   0x9   : > { %6510 = vmatprep.mubr.msk.f32.mxu0 (!%p179_p2), %vm7654_vm1, %v7653_v1  ;;  %6758 = vmatprep.subr.mxu0 (!%p179_p2), %v7653_v1 }
   0xa   : > { %p218_p4 = scmp.lt.s32.totalorder (!%p179_p2), %s217_s8, 122 }
   0xd   : > { %s212_s20 = scalar_select %p211_p3, %s7693_s19, 122 }
   0xe   : > { %s9476_s8 = smov (!%p218_p4, %s217_s8), 122  ;;  %s9478_s19 = smov (!%p225_p5, %s7693_s19), 81 }
   0xf   : > { %s5738_s21 = sshll.u32 %s212_s20, 3  ;;  %s5739_s9 = sshll.u32 %s9476_s8, 3 }
  0x10   : > { %s7710_s24 = scalar_lea.vmem %s9470_s0, %s5738_s21  ;;  %s7986_s12 = scalar_lea.vmem %s9471_s1, %s5739_s9 }
  0x11   : > { %v251_v2 = vld [vmem:[%s7710_s24 + $0xa8] sm:$0xff]  ;;  %v252_v3 = vld [vmem:[%s7710_s24 + $0xb0] sm:$0xff]  ;;  %v230_v4 = vld [vmem:[%s7710_s24] sm:$0xff]  ;;  %s5740_s13 = sshll.u32 %s9478_s19, 3 }
  0x12   : > { %293 = vst.msk [vmem:[#allocation2 + $0xa8] sm:$0xff] %vm271_vm2, %v251_v2  ;;  %294 = vst.msk [vmem:[#allocation2 + $0xb0] sm:$0xff] %vm271_vm2, %v252_v3  ;;  %v253_v5 = vld [vmem:[%s7710_s24 + $0xb8] sm:$0xff]  ;;  %v231_v6 = vld [vmem:[%s7710_s24 + $0x8] sm:$0xff]  ;;  %s8185_s17 = scalar_lea.vmem %s9474_s4, %s5740_s13 }
  0x13   : > { %272 = vst.msk [vmem:[#allocation2] sm:$0xff] %vm271_vm2, %v230_v4  ;;  %v254_v7 = vld [vmem:[%s7710_s24 + $0xc0] sm:$0xff]  ;;  %295 = vst.msk [vmem:[#allocation2 + $0xb8] sm:$0xff] %vm271_vm2, %v253_v5  ;;  %v232_v8 = vld [vmem:[%s7710_s24 + $0x10] sm:$0xff] }
  0x14   : > { %273 = vst.msk [vmem:[#allocation2 + $0x8] sm:$0xff] %vm271_vm2, %v231_v6  ;;  %296 = vst.msk [vmem:[#allocation2 + $0xc0] sm:$0xff] %vm271_vm2, %v254_v7  ;;  %v255_v9 = vld [vmem:[%s7710_s24 + $0xc8] sm:$0xff]  ;;  %v233_v10 = vld [vmem:[%s7710_s24 + $0x18] sm:$0xff] }
  0x15   : > { %274 = vst.msk [vmem:[#allocation2 + $0x10] sm:$0xff] %vm271_vm2, %v232_v8  ;;  %297 = vst.msk [vmem:[#allocation2 + $0xc8] sm:$0xff] %vm271_vm2, %v255_v9  ;;  %v256_v11 = vld [vmem:[%s7710_s24 + $0xd0] sm:$0xff]  ;;  %v234_v12 = vld [vmem:[%s7710_s24 + $0x20] sm:$0xff] }
  0x16   : > { %275 = vst.msk [vmem:[#allocation2 + $0x18] sm:$0xff] %vm271_vm2, %v233_v10  ;;  %v257_v13 = vld [vmem:[%s7710_s24 + $0xd8] sm:$0xff]  ;;  %298 = vst.msk [vmem:[#allocation2 + $0xd0] sm:$0xff] %vm271_vm2, %v256_v11  ;;  %v235_v14 = vld [vmem:[%s7710_s24 + $0x28] sm:$0xff] }
  0x17   : > { %276 = vst.msk [vmem:[#allocation2 + $0x20] sm:$0xff] %vm271_vm2, %v234_v12  ;;  %299 = vst.msk [vmem:[#allocation2 + $0xd8] sm:$0xff] %vm271_vm2, %v257_v13  ;;  %v258_v15 = vld [vmem:[%s7710_s24 + $0xe0] sm:$0xff]  ;;  %v236_v16 = vld [vmem:[%s7710_s24 + $0x30] sm:$0xff] }
  0x18   : > { %277 = vst.msk [vmem:[#allocation2 + $0x28] sm:$0xff] %vm271_vm2, %v235_v14  ;;  %300 = vst.msk [vmem:[#allocation2 + $0xe0] sm:$0xff] %vm271_vm2, %v258_v15  ;;  %v259_v18 = vld [vmem:[%s7710_s24 + $0xe8] sm:$0xff]  ;;  %v237_v19 = vld [vmem:[%s7710_s24 + $0x38] sm:$0xff] }
  0x19   : > { %278 = vst.msk [vmem:[#allocation2 + $0x30] sm:$0xff] %vm271_vm2, %v236_v16  ;;  %v260_v20 = vld [vmem:[%s7710_s24 + $0xf0] sm:$0xff]  ;;  %301 = vst.msk [vmem:[#allocation2 + $0xe8] sm:$0xff] %vm271_vm2, %v259_v18  ;;  %v238_v21 = vld [vmem:[%s7710_s24 + $0x40] sm:$0xff] }
  0x1a   : > { %279 = vst.msk [vmem:[#allocation2 + $0x38] sm:$0xff] %vm271_vm2, %v237_v19  ;;  %302 = vst.msk [vmem:[#allocation2 + $0xf0] sm:$0xff] %vm271_vm2, %v260_v20  ;;  %v261_v22 = vld [vmem:[%s7710_s24 + $0xf8] sm:$0xff]  ;;  %v239_v23 = vld [vmem:[%s7710_s24 + $0x48] sm:$0xff] }
  0x1b   : > { %280 = vst.msk [vmem:[#allocation2 + $0x40] sm:$0xff] %vm271_vm2, %v238_v21  ;;  %303 = vst.msk [vmem:[#allocation2 + $0xf8] sm:$0xff] %vm271_vm2, %v261_v22  ;;  %v262_v24 = vld [vmem:[%s7710_s24 + $0x100] sm:$0xff]  ;;  %v240_v25 = vld [vmem:[%s7710_s24 + $0x50] sm:$0xff] }
  0x1c   : > { %281 = vst.msk [vmem:[#allocation2 + $0x48] sm:$0xff] %vm271_vm2, %v239_v23  ;;  %v263_v26 = vld [vmem:[%s7710_s24 + $0x108] sm:$0xff]  ;;  %v436_v28 = vld [vmem:[#allocation2] sm:$0xff]  ;;  %304 = vst.msk [vmem:[#allocation2 + $0x100] sm:$0xff] %vm271_vm2, %v262_v24 }
  0x1d   : > { %v457_v27 = vld [vmem:[#allocation2 + $0xa8] sm:$0xff]  ;;  %282 = vst.msk [vmem:[#allocation2 + $0x50] sm:$0xff] %vm271_vm2, %v240_v25  ;;  %305 = vst.msk [vmem:[#allocation2 + $0x108] sm:$0xff] %vm271_vm2, %v263_v26  ;;  %6511 = vmatmul.mubr.msk.f32.vlgmr.msra.gmra.mrb[0].mxu0 %vm271_vm2, %v436_v28  ;;  %v458_v30 = vld [vmem:[#allocation2 + $0xb0] sm:$0xff] }
  0x1e   : > { %6574 = vmatmul.mubr.msk.f32.vlgmr.msra.gmra.mrb[0].mxu1 %vm271_vm2, %v457_v27  ;;  %v437_v31 = vld [vmem:[#allocation2 + $0x8] sm:$0xff]  ;;  %6759 = vmatpush3.msk.msra.mxu0 %vm642_vm0, %v5826_v29  ;;  %v459_v32 = vld [vmem:[#allocation2 + $0xb8] sm:$0xff]  ;;  %v438_v33 = vld [vmem:[#allocation2 + $0x10] sm:$0xff] }
  0x1f   : > { %6634 = vmatpush3.msk.msra.mxu1 %vm642_vm0, %v5783_v17  ;;  %6576 = vmatprep.mubr.msk.f32.mxu1 %vm7654_vm1, %v7653_v1  ;;  %v460_v34 = vld [vmem:[#allocation2 + $0xc0] sm:$0xff]  ;;  %v439_v35 = vld [vmem:[#allocation2 + $0x18] sm:$0xff]  ;;  %v264_v37 = vld [vmem:[%s7710_s24 + $0x110] sm:$0xff] }
  0x20   : > { %6513 = vmatprep.mubr.msk.f32.mxu0 %vm7654_vm1, %v7653_v1  ;;  %6883 = vmatprep.subr.mxu1 %v7653_v1  ;;  %v241_v36 = vld [vmem:[%s7710_s24 + $0x58] sm:$0xff]  ;;  %v242_v38 = vld [vmem:[%s7710_s24 + $0x60] sm:$0xff]  ;;  %306 = vst.msk [vmem:[#allocation2 + $0x110] sm:$0xff] %vm271_vm2, %v264_v37  ;;  %v243_v40 = vld [vmem:[%s7710_s24 + $0x68] sm:$0xff] }
  0x21   : > { %7008 = vmatprep.subr.mxu0 %v7653_v1  ;;  %6514 = vmatmul.mubr.msk.f32.gmra.mrb[2].mxu0 %vm271_vm2, %v437_v31  ;;  %283 = vst.msk [vmem:[#allocation2 + $0x58] sm:$0xff] %vm271_vm2, %v241_v36  ;;  %284 = vst.msk [vmem:[#allocation2 + $0x60] sm:$0xff] %vm271_vm2, %v242_v38  ;;  %v265_v39 = vld [vmem:[%s7710_s24 + $0x118] sm:$0xff]  ;;  %v266_v41 = vld [vmem:[%s7710_s24 + $0x120] sm:$0xff] }
  0x22   : > { %6577 = vmatmul.mubr.msk.f32.gmra.mrb[2].mxu1 %vm271_vm2, %v458_v30  ;;  %6516 = vmatprep.mubr.msk.f32.mxu0 %vm7654_vm1, %v7653_v1  ;;  %307 = vst.msk [vmem:[#allocation2 + $0x118] sm:$0xff] %vm271_vm2, %v265_v39  ;;  %285 = vst.msk [vmem:[#allocation2 + $0x68] sm:$0xff] %vm271_vm2, %v243_v40  ;;  %v244_v42 = vld [vmem:[%s7710_s24 + $0x70] sm:$0xff]  ;;  %v267_v43 = vld [vmem:[%s7710_s24 + $0x128] sm:$0xff] }
  0x23   : > { %6579 = vmatprep.mubr.msk.f32.mxu1 %vm7654_vm1, %v7653_v1  ;;  %308 = vst.msk [vmem:[#allocation2 + $0x120] sm:$0xff] %vm271_vm2, %v266_v41  ;;  %v245_v44 = vld [vmem:[%s7710_s24 + $0x78] sm:$0xff]  ;;  %286 = vst.msk [vmem:[#allocation2 + $0x70] sm:$0xff] %vm271_vm2, %v244_v42  ;;  %v268_v45 = vld [vmem:[%s7710_s24 + $0x130] sm:$0xff] }
  0x24   : > { %309 = vst.msk [vmem:[#allocation2 + $0x128] sm:$0xff] %vm271_vm2, %v267_v43  ;;  %287 = vst.msk [vmem:[#allocation2 + $0x78] sm:$0xff] %vm271_vm2, %v245_v44  ;;  %v246_v46 = vld [vmem:[%s7710_s24 + $0x80] sm:$0xff]  ;;  %v269_v47 = vld [vmem:[%s7710_s24 + $0x138] sm:$0xff] }
  0x25   : > { %6517 = vmatmul.mubr.msk.f32.gmra.mrb[4].mxu0 %vm271_vm2, %v438_v33  ;;  %310 = vst.msk [vmem:[#allocation2 + $0x130] sm:$0xff] %vm271_vm2, %v268_v45  ;;  %288 = vst.msk [vmem:[#allocation2 + $0x80] sm:$0xff] %vm271_vm2, %v246_v46  ;;  %v247_v48 = vld [vmem:[%s7710_s24 + $0x88] sm:$0xff]  ;;  %v270_v49 = vld [vmem:[%s7710_s24 + $0x140] sm:$0xff] }
  0x26   : > { %6580 = vmatmul.mubr.msk.f32.gmra.mrb[4].mxu1 %vm271_vm2, %v459_v32  ;;  %6519 = vmatprep.mubr.msk.f32.mxu0 %vm7654_vm1, %v7653_v1  ;;  %311 = vst.msk [vmem:[#allocation2 + $0x138] sm:$0xff] %vm271_vm2, %v269_v47  ;;  %v248_v50 = vld [vmem:[%s7710_s24 + $0x90] sm:$0xff]  ;;  %289 = vst.msk [vmem:[#allocation2 + $0x88] sm:$0xff] %vm271_vm2, %v247_v48  ;;  %v249_v51 = vld [vmem:[%s7710_s24 + $0x98] sm:$0xff] }
  0x27   : > { %6582 = vmatprep.mubr.msk.f32.mxu1 %vm7654_vm1, %v7653_v1  ;;  %312 = vst.msk [vmem:[#allocation2 + $0x140] sm:$0xff] %vm271_vm2, %v270_v49  ;;  %290 = vst.msk [vmem:[#allocation2 + $0x90] sm:$0xff] %vm271_vm2, %v248_v50  ;;  %v461_v52 = vld [vmem:[#allocation2 + $0xc8] sm:$0xff]  ;;  %v440_v53 = vld [vmem:[#allocation2 + $0x20] sm:$0xff] }
  0x28   : > { %291 = vst.msk [vmem:[#allocation2 + $0x98] sm:$0xff] %vm271_vm2, %v249_v51  ;;  %v250_v54 = vld [vmem:[%s7710_s24 + $0xa0] sm:$0xff]  ;;  %v462_v55 = vld [vmem:[#allocation2 + $0xd0] sm:$0xff]  ;;  %v441_v56 = vld [vmem:[#allocation2 + $0x28] sm:$0xff] }
  0x29   : > { %6520 = vmatmul.mubr.msk.f32.gmra.mrb[6].mxu0 %vm271_vm2, %v439_v35  ;;  %292 = vst.msk [vmem:[#allocation2 + $0xa0] sm:$0xff] %vm271_vm2, %v250_v54  ;;  %v463_v57 = vld [vmem:[#allocation2 + $0xd8] sm:$0xff]  ;;  %v442_v58 = vld [vmem:[#allocation2 + $0x30] sm:$0xff]  ;;  %v464_v59 = vld [vmem:[#allocation2 + $0xe0] sm:$0xff] }
  0x2a   : > { %6583 = vmatmul.mubr.msk.f32.gmra.mrb[6].mxu1 %vm271_vm2, %v460_v34  ;;  %6522 = vmatprep.mubr.msk.f32.mxu0 %vm7654_vm1, %v7653_v1  ;;  %v443_v60 = vld [vmem:[#allocation2 + $0x38] sm:$0xff]  ;;  %v465_v61 = vld [vmem:[#allocation2 + $0xe8] sm:$0xff]  ;;  %v444_v62 = vld [vmem:[#allocation2 + $0x40] sm:$0xff] }
  0x2b   : > { %6585 = vmatprep.mubr.msk.f32.mxu1 %vm7654_vm1, %v7653_v1  ;;  %v466_v63 = vld [vmem:[#allocation2 + $0xf0] sm:$0xff]  ;;  %v445_v0 = vld [vmem:[#allocation2 + $0x48] sm:$0xff]  ;;  %v467_v2 = vld [vmem:[#allocation2 + $0xf8] sm:$0xff] }
  0x2c   : > { %v446_v3 = vld [vmem:[#allocation2 + $0x50] sm:$0xff]  ;;  %v468_v4 = vld [vmem:[#allocation2 + $0x100] sm:$0xff]  ;;  %v447_v5 = vld [vmem:[#allocation2 + $0x58] sm:$0xff] }
  0x2d   : > { %6523 = vmatmul.mubr.msk.f32.gmra.mrb[8].mxu0 %vm271_vm2, %v440_v53  ;;  %v469_v6 = vld [vmem:[#allocation2 + $0x108] sm:$0xff]  ;;  %v448_v7 = vld [vmem:[#allocation2 + $0x60] sm:$0xff]  ;;  %v470_v8 = vld [vmem:[#allocation2 + $0x110] sm:$0xff] }
  0x2e   : > { %6586 = vmatmul.mubr.msk.f32.gmra.mrb[8].mxu1 %vm271_vm2, %v461_v52  ;;  %6525 = vmatprep.mubr.msk.f32.mxu0 %vm7654_vm1, %v7653_v1  ;;  %v449_v9 = vld [vmem:[#allocation2 + $0x68] sm:$0xff]  ;;  %v471_v10 = vld [vmem:[#allocation2 + $0x118] sm:$0xff]  ;;  %v450_v11 = vld [vmem:[#allocation2 + $0x70] sm:$0xff] }
  0x2f   : > { %6588 = vmatprep.mubr.msk.f32.mxu1 %vm7654_vm1, %v7653_v1  ;;  %v472_v12 = vld [vmem:[#allocation2 + $0x120] sm:$0xff]  ;;  %v451_v13 = vld [vmem:[#allocation2 + $0x78] sm:$0xff]  ;;  %v473_v14 = vld [vmem:[#allocation2 + $0x128] sm:$0xff] }
  0x30   : > { %v452_v15 = vld [vmem:[#allocation2 + $0x80] sm:$0xff]  ;;  %v474_v16 = vld [vmem:[#allocation2 + $0x130] sm:$0xff]  ;;  %v453_v17 = vld [vmem:[#allocation2 + $0x88] sm:$0xff] }
  0x31   : > { %6526 = vmatmul.mubr.msk.f32.gmra.mrb[10].mxu0 %vm271_vm2, %v441_v56  ;;  %v475_v18 = vld [vmem:[#allocation2 + $0x138] sm:$0xff]  ;;  %v454_v19 = vld [vmem:[#allocation2 + $0x90] sm:$0xff]  ;;  %v476_v20 = vld [vmem:[#allocation2 + $0x140] sm:$0xff] }
  0x32   : > { %6589 = vmatmul.mubr.msk.f32.gmra.mrb[10].mxu1 %vm271_vm2, %v462_v55  ;;  %6528 = vmatprep.mubr.msk.f32.mxu0 %vm7654_vm1, %v7653_v1  ;;  %v455_v21 = vld [vmem:[#allocation2 + $0x98] sm:$0xff]  ;;  %v998_v22 = vld [vmem:[#allocation2 + $0x1] sm:$0xff]  ;;  %v5869_v24 = vld [vmem:[%s9472_s2 + $0xc] sm:$0xf] }
  0x33   : > { %6591 = vmatprep.mubr.msk.f32.mxu1 %vm7654_vm1, %v7653_v1  ;;  %v456_v23 = vld [vmem:[#allocation2 + $0xa0] sm:$0xff]  ;;  %v999_v25 = vld [vmem:[#allocation2 + $0x9] sm:$0xff]  ;;  %v1000_v28 = vld [vmem:[#allocation2 + $0x11] sm:$0xff] }
  0x34   : > { %v1560_v26 = vld [vmem:[#allocation2 + $0x2] sm:$0xff]  ;;  %v5912_v27 = vld [vmem:[%s9472_s2 + $0x10] sm:$0xf]  ;;  %v1001_v30 = vld [vmem:[#allocation2 + $0x19] sm:$0xff] }
  0x35   : > { %6529 = vmatmul.mubr.msk.f32.gmra.mrb[12].mxu0 %vm271_vm2, %v442_v58  ;;  %v1561_v29 = vld [vmem:[#allocation2 + $0xa] sm:$0xff]  ;;  %v7952_v31 = vld [vmem:[#allocation2 + $0x12] sm:$0xff]  ;;  %v1002_v32 = vld [vmem:[#allocation2 + $0x21] sm:$0xff] }
  0x36   : > { %6592 = vmatmul.mubr.msk.f32.gmra.mrb[12].mxu1 %vm271_vm2, %v463_v57  ;;  %6531 = vmatprep.mubr.msk.f32.mxu0 %vm7654_vm1, %v7653_v1  ;;  %v7961_v33 = vld [vmem:[#allocation2 + $0x1a] sm:$0xff]  ;;  %v1003_v34 = vld [vmem:[#allocation2 + $0x29] sm:$0xff]  ;;  %v1004_v36 = vld [vmem:[#allocation2 + $0x31] sm:$0xff] }
  0x37   : > { %6594 = vmatprep.mubr.msk.f32.mxu1 %vm7654_vm1, %v7653_v1  ;;  %v7972_v35 = vld [vmem:[#allocation2 + $0x22] sm:$0xff]  ;;  %v7981_v37 = vld [vmem:[#allocation2 + $0x2a] sm:$0xff]  ;;  %v1005_v39 = vld [vmem:[#allocation2 + $0x39] sm:$0xff] }
  0x38   : > { %v313_v38 = vld [vmem:[%s7986_s12] sm:$0xff]  ;;  %v7997_v40 = vld [vmem:[#allocation2 + $0x32] sm:$0xff]  ;;  %v1007_v43 = vld [vmem:[#allocation2 + $0x49] sm:$0xff] }
  0x39   : > { %6532 = vmatmul.mubr.msk.f32.gmra.mrb[14].mxu0 %vm271_vm2, %v443_v60  ;;  %354 = vst.msk [vmem:[#allocation2 + $0x148] sm:$0xff] %vm271_vm2, %v313_v38  ;;  %v1006_v41 = vld [vmem:[#allocation2 + $0x41] sm:$0xff]  ;;  %v1008_v45 = vld [vmem:[#allocation2 + $0x51] sm:$0xff]  ;;  %v1009_v47 = vld [vmem:[#allocation2 + $0x59] sm:$0xff] }
  0x3a   : > { %6595 = vmatmul.mubr.msk.f32.gmra.mrb[14].mxu1 %vm271_vm2, %v464_v59  ;;  %6534 = vmatprep.mubr.msk.f32.mxu0 %vm7654_vm1, %v7653_v1  ;;  %v8006_v42 = vld [vmem:[#allocation2 + $0x3a] sm:$0xff]  ;;  %v8015_v44 = vld [vmem:[#allocation2 + $0x42] sm:$0xff]  ;;  %v8017_v46 = vld [vmem:[#allocation2 + $0x4a] sm:$0xff] }
  0x3b   : > { %6597 = vmatprep.mubr.msk.f32.mxu1 %vm7654_vm1, %v7653_v1  ;;  %v8026_v48 = vld [vmem:[#allocation2 + $0x52] sm:$0xff]  ;;  %v1010_v49 = vld [vmem:[#allocation2 + $0x61] sm:$0xff]  ;;  %v1011_v51 = vld [vmem:[#allocation2 + $0x69] sm:$0xff] }
  0x3c   : > { %v8035_v50 = vld [vmem:[#allocation2 + $0x5a] sm:$0xff]  ;;  %v8051_v52 = vld [vmem:[#allocation2 + $0x62] sm:$0xff]  ;;  %v1012_v53 = vld [vmem:[#allocation2 + $0x71] sm:$0xff] }
  0x3d   : > { %6535 = vmatmul.mubr.msk.f32.gmra.mrb[16].mxu0 %vm271_vm2, %v444_v62  ;;  %v8060_v54 = vld [vmem:[#allocation2 + $0x6a] sm:$0xff]  ;;  %v1013_v55 = vld [vmem:[#allocation2 + $0x79] sm:$0xff]  ;;  %v1014_v57 = vld [vmem:[#allocation2 + $0x81] sm:$0xff] }
  0x3e   : > { %6598 = vmatmul.mubr.msk.f32.gmra.mrb[16].mxu1 %vm271_vm2, %v465_v61  ;;  %6537 = vmatprep.mubr.msk.f32.mxu0 %vm7654_vm1, %v7653_v1  ;;  %v8069_v56 = vld [vmem:[#allocation2 + $0x72] sm:$0xff]  ;;  %v1575_v58 = vld [vmem:[#allocation2 + $0x7a] sm:$0xff]  ;;  %v1015_v59 = vld [vmem:[#allocation2 + $0x89] sm:$0xff] }
  0x3f   : > { %6600 = vmatprep.mubr.msk.f32.mxu1 %vm7654_vm1, %v7653_v1  ;;  %v1576_v60 = vld [vmem:[#allocation2 + $0x82] sm:$0xff]  ;;  %v1016_v61 = vld [vmem:[#allocation2 + $0x91] sm:$0xff] }
  0x40   : > { %v1577_v62 = vld [vmem:[#allocation2 + $0x8a] sm:$0xff] }
  0x41   : > { %6538 = vmatmul.mubr.msk.f32.gmra.mrb[18].mxu0 %vm271_vm2, %v445_v0  ;;  %v1578_v0 = vld [vmem:[#allocation2 + $0x92] sm:$0xff] }
  0x42   : > { %6601 = vmatmul.mubr.msk.f32.gmra.mrb[18].mxu1 %vm271_vm2, %v466_v63  ;;  %6540 = vmatprep.mubr.msk.f32.mxu0 %vm7654_vm1, %v7653_v1  ;;  %v1017_v63 = vld [vmem:[#allocation2 + $0x99] sm:$0xff]  ;;  %v1032_v38 = vld [vmem:[#allocation2 + $0x111] sm:$0xff] }
  0x43   : > { %6603 = vmatprep.mubr.msk.f32.mxu1 %vm7654_vm1, %v7653_v1 }
  0x45   : > { %6541 = vmatmul.mubr.msk.f32.gmra.mrb[20].mxu0 %vm271_vm2, %v446_v3  ;;  %v1579_v3 = vld [vmem:[#allocation2 + $0x9a] sm:$0xff] }
  0x46   : > { %6604 = vmatmul.mubr.msk.f32.gmra.mrb[20].mxu1 %vm271_vm2, %v467_v2  ;;  %6543 = vmatprep.mubr.msk.f32.mxu0 %vm7654_vm1, %v7653_v1  ;;  %v1018_v2 = vld [vmem:[#allocation2 + $0xa1] sm:$0xff] }
  0x47   : > { %6606 = vmatprep.mubr.msk.f32.mxu1 %vm7654_vm1, %v7653_v1 }
  0x49   : > { %6544 = vmatmul.mubr.msk.f32.gmra.mrb[22].mxu0 %vm271_vm2, %v447_v5  ;;  %v1580_v5 = vld [vmem:[#allocation2 + $0xa2] sm:$0xff] }
  0x4a   : > { %6607 = vmatmul.mubr.msk.f32.gmra.mrb[22].mxu1 %vm271_vm2, %v468_v4  ;;  %6546 = vmatprep.mubr.msk.f32.mxu0 %vm7654_vm1, %v7653_v1  ;;  %v1019_v4 = vld [vmem:[#allocation2 + $0xa9] sm:$0xff] }
  0x4b   : > { %6609 = vmatprep.mubr.msk.f32.mxu1 %vm7654_vm1, %v7653_v1 }
  0x4d   : > { %6547 = vmatmul.mubr.msk.f32.gmra.mrb[24].mxu0 %vm271_vm2, %v448_v7  ;;  %v1581_v7 = vld [vmem:[#allocation2 + $0xaa] sm:$0xff] }
  0x4e   : > { %6610 = vmatmul.mubr.msk.f32.gmra.mrb[24].mxu1 %vm271_vm2, %v469_v6  ;;  %6549 = vmatprep.mubr.msk.f32.mxu0 %vm7654_vm1, %v7653_v1  ;;  %v1020_v6 = vld [vmem:[#allocation2 + $0xb1] sm:$0xff] }
  0x4f   : > { %6612 = vmatprep.mubr.msk.f32.mxu1 %vm7654_vm1, %v7653_v1 }
  0x51   : > { %6550 = vmatmul.mubr.msk.f32.gmra.mrb[26].mxu0 %vm271_vm2, %v449_v9  ;;  %v1582_v9 = vld [vmem:[#allocation2 + $0xb2] sm:$0xff] }
  0x52   : > { %6613 = vmatmul.mubr.msk.f32.gmra.mrb[26].mxu1 %vm271_vm2, %v470_v8  ;;  %6552 = vmatprep.mubr.msk.f32.mxu0 %vm7654_vm1, %v7653_v1  ;;  %v1021_v8 = vld [vmem:[#allocation2 + $0xb9] sm:$0xff] }
  0x53   : > { %6615 = vmatprep.mubr.msk.f32.mxu1 %vm7654_vm1, %v7653_v1 }
  0x55   : > { %6553 = vmatmul.mubr.msk.f32.gmra.mrb[28].mxu0 %vm271_vm2, %v450_v11  ;;  %v1583_v11 = vld [vmem:[#allocation2 + $0xba] sm:$0xff] }
  0x56   : > { %6616 = vmatmul.mubr.msk.f32.gmra.mrb[28].mxu1 %vm271_vm2, %v471_v10  ;;  %6555 = vmatprep.mubr.msk.f32.mxu0 %vm7654_vm1, %v7653_v1  ;;  %v1022_v10 = vld [vmem:[#allocation2 + $0xc1] sm:$0xff] }
  0x57   : > { %6618 = vmatprep.mubr.msk.f32.mxu1 %vm7654_vm1, %v7653_v1 }
  0x59   : > { %6556 = vmatmul.mubr.msk.f32.gmra.mrb[30].mxu0 %vm271_vm2, %v451_v13  ;;  %v1584_v13 = vld [vmem:[#allocation2 + $0xc2] sm:$0xff] }
  0x5a   : > { %6619 = vmatmul.mubr.msk.f32.gmra.mrb[30].mxu1 %vm271_vm2, %v472_v12  ;;  %6558 = vmatprep.mubr.msk.f32.mxu0 %vm7654_vm1, %v7653_v1  ;;  %v1023_v12 = vld [vmem:[#allocation2 + $0xc9] sm:$0xff] }
  0x5b   : > { %6621 = vmatprep.mubr.msk.f32.mxu1 %vm7654_vm1, %v7653_v1 }
  0x5d   : > { %6559 = vmatmul.mubr.msk.f32.gmra.mrb[32].mxu0 %vm271_vm2, %v452_v15  ;;  %v1585_v15 = vld [vmem:[#allocation2 + $0xca] sm:$0xff] }
  0x5e   : > { %6622 = vmatmul.mubr.msk.f32.gmra.mrb[32].mxu1 %vm271_vm2, %v473_v14  ;;  %6561 = vmatprep.mubr.msk.f32.mxu0 %vm7654_vm1, %v7653_v1  ;;  %v1024_v14 = vld [vmem:[#allocation2 + $0xd1] sm:$0xff] }
  0x5f   : > { %6624 = vmatprep.mubr.msk.f32.mxu1 %vm7654_vm1, %v7653_v1 }
  0x61   : > { %6562 = vmatmul.mubr.msk.f32.gmra.mrb[34].mxu0 %vm271_vm2, %v453_v17  ;;  %v1586_v17 = vld [vmem:[#allocation2 + $0xd2] sm:$0xff] }
  0x62   : > { %6625 = vmatmul.mubr.msk.f32.gmra.mrb[34].mxu1 %vm271_vm2, %v474_v16  ;;  %6564 = vmatprep.mubr.msk.f32.mxu0 %vm7654_vm1, %v7653_v1  ;;  %v1025_v16 = vld [vmem:[#allocation2 + $0xd9] sm:$0xff] }
  0x63   : > { %6627 = vmatprep.mubr.msk.f32.mxu1 %vm7654_vm1, %v7653_v1 }
  0x65   : > { %6565 = vmatmul.mubr.msk.f32.gmra.mrb[36].mxu0 %vm271_vm2, %v454_v19  ;;  %v1587_v19 = vld [vmem:[#allocation2 + $0xda] sm:$0xff] }
  0x66   : > { %6628 = vmatmul.mubr.msk.f32.gmra.mrb[36].mxu1 %vm271_vm2, %v475_v18  ;;  %6567 = vmatprep.mubr.msk.f32.mxu0 %vm7654_vm1, %v7653_v1  ;;  %v1026_v18 = vld [vmem:[#allocation2 + $0xe1] sm:$0xff] }
  0x67   : > { %6630 = vmatprep.mubr.msk.f32.mxu1 %vm7654_vm1, %v7653_v1 }
  0x69   : > { %6568 = vmatmul.mubr.msk.f32.gmra.mrb[38].mxu0 %vm271_vm2, %v455_v21  ;;  %v1588_v21 = vld [vmem:[#allocation2 + $0xe2] sm:$0xff] }
  0x6a   : > { %6631 = vmatmul.mubr.msk.f32.gmra.mrb[38].mxu1 %vm271_vm2, %v476_v20  ;;  %6570 = vmatprep.mubr.msk.f32.mxu0 %vm7654_vm1, %v7653_v1  ;;  %v1027_v20 = vld [vmem:[#allocation2 + $0xe9] sm:$0xff] }
  0x6b   : > { %6635 = vmatprep.mubr.msk.f32.mxu1 %vm7654_vm1, %v7653_v1 }
  0x6d   : > { %6571 = vmatmul.mubr.msk.f32.gmra.mrb[40].mxu0 %vm271_vm2, %v456_v23  ;;  %v1589_v23 = vld [vmem:[#allocation2 + $0xea] sm:$0xff] }
  0x6e   : > { %6636 = vmatmul.mubr.msk.f32.vlgmr.msra.gmra.mrb[40].mxu1 %vm271_vm2, %v998_v22  ;;  %6760 = vmatprep.mubr.msk.f32.mxu0 %vm7654_vm1, %v7653_v1  ;;  %v1028_v22 = vld [vmem:[#allocation2 + $0xf1] sm:$0xff] }
  0x6f   : > { %6884 = vmatpush3.msk.msra.mxu1 %vm642_vm0, %v5869_v24  ;;  %6638 = vmatprep.mubr.msk.f32.mxu1 %vm7654_vm1, %v7653_v1  ;;  %v1029_v24 = vld [vmem:[#allocation2 + $0xf9] sm:$0xff] }
  0x70   : > { %7133 = vmatprep.subr.mxu1 %v7653_v1 }
  0x71   : > { %6761 = vmatmul.mubr.msk.f32.vlgmr.msra.gmra.mrb[42].mxu0 %vm271_vm2, %v1560_v26  ;;  %v1030_v26 = vld [vmem:[#allocation2 + $0x101] sm:$0xff] }
  0x72   : > { %6639 = vmatmul.mubr.msk.f32.gmra.mrb[42].mxu1 %vm271_vm2, %v999_v25  ;;  %7009 = vmatpush3.msk.msra.mxu0 %vm642_vm0, %v5912_v27  ;;  %v1590_v25 = vld [vmem:[#allocation2 + $0xf2] sm:$0xff]  ;;  %v1591_v27 = vld [vmem:[#allocation2 + $0xfa] sm:$0xff] }
  0x73   : > { %6641 = vmatprep.mubr.msk.f32.mxu1 %vm7654_vm1, %v7653_v1  ;;  %6763 = vmatprep.mubr.msk.f32.mxu0 %vm7654_vm1, %v7653_v1 }
  0x74   : > { %7258 = vmatprep.subr.mxu0 %v7653_v1 }
  0x75   : > { %6764 = vmatmul.mubr.msk.f32.gmra.mrb[44].mxu0 %vm271_vm2, %v1561_v29  ;;  %v1592_v29 = vld [vmem:[#allocation2 + $0x102] sm:$0xff] }
  0x76   : > { %6642 = vmatmul.mubr.msk.f32.gmra.mrb[44].mxu1 %vm271_vm2, %v1000_v28  ;;  %6766 = vmatprep.mubr.msk.f32.mxu0 %vm7654_vm1, %v7653_v1  ;;  %v1031_v28 = vld [vmem:[#allocation2 + $0x109] sm:$0xff] }
  0x77   : > { %6644 = vmatprep.mubr.msk.f32.mxu1 %vm7654_vm1, %v7653_v1 }
  0x79   : > { %6767 = vmatmul.mubr.msk.f32.gmra.mrb[46].mxu0 %vm271_vm2, %v7952_v31 }
  0x7a   : > { %6645 = vmatmul.mubr.msk.f32.gmra.mrb[46].mxu1 %vm271_vm2, %v1001_v30  ;;  %6769 = vmatprep.mubr.msk.f32.mxu0 %vm7654_vm1, %v7653_v1 }
  0x7b   : > { %6647 = vmatprep.mubr.msk.f32.mxu1 %vm7654_vm1, %v7653_v1 }
  0x7d   : > { %6770 = vmatmul.mubr.msk.f32.gmra.mrb[48].mxu0 %vm271_vm2, %v7961_v33 }
  0x7e   : > { %6648 = vmatmul.mubr.msk.f32.gmra.mrb[48].mxu1 %vm271_vm2, %v1002_v32  ;;  %6772 = vmatprep.mubr.msk.f32.mxu0 %vm7654_vm1, %v7653_v1 }
  0x7f   : > { %6650 = vmatprep.mubr.msk.f32.mxu1 %vm7654_vm1, %v7653_v1 }
  0x81   : > { %6773 = vmatmul.mubr.msk.f32.gmra.mrb[50].mxu0 %vm271_vm2, %v7972_v35 }
  0x82   : > { %6651 = vmatmul.mubr.msk.f32.gmra.mrb[50].mxu1 %vm271_vm2, %v1003_v34  ;;  %6775 = vmatprep.mubr.msk.f32.mxu0 %vm7654_vm1, %v7653_v1 }
  0x83   : > { %6653 = vmatprep.mubr.msk.f32.mxu1 %vm7654_vm1, %v7653_v1 }
  0x85   : > { %6776 = vmatmul.mubr.msk.f32.gmra.mrb[52].mxu0 %vm271_vm2, %v7981_v37 }
  0x86   : > { %6654 = vmatmul.mubr.msk.f32.gmra.mrb[52].mxu1 %vm271_vm2, %v1004_v36  ;;  %6778 = vmatprep.mubr.msk.f32.mxu0 %vm7654_vm1, %v7653_v1 }
  0x87   : > { %6656 = vmatprep.mubr.msk.f32.mxu1 %vm7654_vm1, %v7653_v1 }
  0x89   : > { %6779 = vmatmul.mubr.msk.f32.gmra.mrb[54].mxu0 %vm271_vm2, %v7997_v40 }
  0x8a   : > { %6657 = vmatmul.mubr.msk.f32.gmra.mrb[54].mxu1 %vm271_vm2, %v1005_v39  ;;  %6781 = vmatprep.mubr.msk.f32.mxu0 %vm7654_vm1, %v7653_v1  ;;  %v1593_v39 = vld [vmem:[#allocation2 + $0x10a] sm:$0xff] }
  0x8b   : > { %6659 = vmatprep.mubr.msk.f32.mxu1 %vm7654_vm1, %v7653_v1 }
  0x8d   : > { %6782 = vmatmul.mubr.msk.f32.gmra.mrb[56].mxu0 %vm271_vm2, %v8006_v42 }
  0x8e   : > { %6660 = vmatmul.mubr.msk.f32.gmra.mrb[56].mxu1 %vm271_vm2, %v1006_v41  ;;  %6784 = vmatprep.mubr.msk.f32.mxu0 %vm7654_vm1, %v7653_v1 }
  0x8f   : > { %6662 = vmatprep.mubr.msk.f32.mxu1 %vm7654_vm1, %v7653_v1 }
  0x91   : > { %6785 = vmatmul.mubr.msk.f32.gmra.mrb[58].mxu0 %vm271_vm2, %v8015_v44 }
  0x92   : > { %6663 = vmatmul.mubr.msk.f32.gmra.mrb[58].mxu1 %vm271_vm2, %v1007_v43  ;;  %6787 = vmatprep.mubr.msk.f32.mxu0 %vm7654_vm1, %v7653_v1 }
  0x93   : > { %6665 = vmatprep.mubr.msk.f32.mxu1 %vm7654_vm1, %v7653_v1 }
  0x95   : > { %6788 = vmatmul.mubr.msk.f32.gmra.mrb[60].mxu0 %vm271_vm2, %v8017_v46 }
  0x96   : > { %6666 = vmatmul.mubr.msk.f32.gmra.mrb[60].mxu1 %vm271_vm2, %v1008_v45  ;;  %6790 = vmatprep.mubr.msk.f32.mxu0 %vm7654_vm1, %v7653_v1 }
  0x97   : > { %6668 = vmatprep.mubr.msk.f32.mxu1 %vm7654_vm1, %v7653_v1 }
  0x99   : > { %6791 = vmatmul.mubr.msk.f32.gmra.mrb[62].mxu0 %vm271_vm2, %v8026_v48 }
  0x9a   : > { %6669 = vmatmul.mubr.msk.f32.gmra.mrb[62].mxu1 %vm271_vm2, %v1009_v47  ;;  %6793 = vmatprep.mubr.msk.f32.mxu0 %vm7654_vm1, %v7653_v1 }
  0x9b   : > { %6671 = vmatprep.mubr.msk.f32.mxu1 %vm7654_vm1, %v7653_v1 }
  0x9d   : > { %6794 = vmatmul.mubr.msk.f32.gmra.mrb[64].mxu0 %vm271_vm2, %v8035_v50 }
  0x9e   : > { %6672 = vmatmul.mubr.msk.f32.gmra.mrb[64].mxu1 %vm271_vm2, %v1010_v49  ;;  %6796 = vmatprep.mubr.msk.f32.mxu0 %vm7654_vm1, %v7653_v1  ;;  %v1033_v49 = vld [vmem:[#allocation2 + $0x119] sm:$0xff] }
  0x9f   : > { %6674 = vmatprep.mubr.msk.f32.mxu1 %vm7654_vm1, %v7653_v1 }
  0xa1   : > { %6797 = vmatmul.mubr.msk.f32.gmra.mrb[66].mxu0 %vm271_vm2, %v8051_v52 }
  0xa2   : > { %6675 = vmatmul.mubr.msk.f32.gmra.mrb[66].mxu1 %vm271_vm2, %v1011_v51  ;;  %6799 = vmatprep.mubr.msk.f32.mxu0 %vm7654_vm1, %v7653_v1  ;;  %v1594_v51 = vld [vmem:[#allocation2 + $0x112] sm:$0xff] }
  0xa3   : > { %6677 = vmatprep.mubr.msk.f32.mxu1 %vm7654_vm1, %v7653_v1 }
  0xa5   : > { %6800 = vmatmul.mubr.msk.f32.gmra.mrb[68].mxu0 %vm271_vm2, %v8060_v54 }
  0xa6   : > { %6678 = vmatmul.mubr.msk.f32.gmra.mrb[68].mxu1 %vm271_vm2, %v1012_v53  ;;  %6802 = vmatprep.mubr.msk.f32.mxu0 %vm7654_vm1, %v7653_v1 }
  0xa7   : > { %6680 = vmatprep.mubr.msk.f32.mxu1 %vm7654_vm1, %v7653_v1 }
  0xa9   : > { %6803 = vmatmul.mubr.msk.f32.gmra.mrb[70].mxu0 %vm271_vm2, %v8069_v56 }
  0xaa   : > { %6681 = vmatmul.mubr.msk.f32.gmra.mrb[70].mxu1 %vm271_vm2, %v1013_v55  ;;  %6805 = vmatprep.mubr.msk.f32.mxu0 %vm7654_vm1, %v7653_v1 }
  0xab   : > { %6683 = vmatprep.mubr.msk.f32.mxu1 %vm7654_vm1, %v7653_v1 }
  0xad   : > { %6806 = vmatmul.mubr.msk.f32.gmra.mrb[72].mxu0 %vm271_vm2, %v1575_v58 }
  0xae   : > { %6684 = vmatmul.mubr.msk.f32.gmra.mrb[72].mxu1 %vm271_vm2, %v1014_v57  ;;  %6808 = vmatprep.mubr.msk.f32.mxu0 %vm7654_vm1, %v7653_v1 }
  0xaf   : > { %6686 = vmatprep.mubr.msk.f32.mxu1 %vm7654_vm1, %v7653_v1 }
  0xb1   : > { %6809 = vmatmul.mubr.msk.f32.gmra.mrb[74].mxu0 %vm271_vm2, %v1576_v60  ;;  %v1595_v60 = vld [vmem:[#allocation2 + $0x11a] sm:$0xff] }
  0xb2   : > { %6687 = vmatmul.mubr.msk.f32.gmra.mrb[74].mxu1 %vm271_vm2, %v1015_v59  ;;  %6811 = vmatprep.mubr.msk.f32.mxu0 %vm7654_vm1, %v7653_v1  ;;  %v1034_v59 = vld [vmem:[#allocation2 + $0x121] sm:$0xff] }
  0xb3   : > { %6689 = vmatprep.mubr.msk.f32.mxu1 %vm7654_vm1, %v7653_v1 }
  0xb5   : > { %6812 = vmatmul.mubr.msk.f32.gmra.mrb[76].mxu0 %vm271_vm2, %v1577_v62 }
  0xb6   : > { %6690 = vmatmul.mubr.msk.f32.gmra.mrb[76].mxu1 %vm271_vm2, %v1016_v61  ;;  %6814 = vmatprep.mubr.msk.f32.mxu0 %vm7654_vm1, %v7653_v1 }
  0xb7   : > { %6692 = vmatprep.mubr.msk.f32.mxu1 %vm7654_vm1, %v7653_v1 }
  0xb9   : > { %6815 = vmatmul.mubr.msk.f32.gmra.mrb[78].mxu0 %vm271_vm2, %v1578_v0 }
  0xba   : > { %6693 = vmatmul.mubr.msk.f32.gmra.mrb[78].mxu1 %vm271_vm2, %v1017_v63  ;;  %6817 = vmatprep.mubr.msk.f32.mxu0 %vm7654_vm1, %v7653_v1 }
  0xbb   : > { %6695 = vmatprep.mubr.msk.f32.mxu1 %vm7654_vm1, %v7653_v1 }
  0xbd   : > { %6818 = vmatmul.mubr.msk.f32.gmra.mrb[80].mxu0 %vm271_vm2, %v1579_v3  ;;  %v1596_v3 = vld [vmem:[#allocation2 + $0x122] sm:$0xff] }
  0xbe   : > { %6696 = vmatmul.mubr.msk.f32.gmra.mrb[80].mxu1 %vm271_vm2, %v1018_v2  ;;  %6820 = vmatprep.mubr.msk.f32.mxu0 %vm7654_vm1, %v7653_v1  ;;  %v1035_v2 = vld [vmem:[#allocation2 + $0x129] sm:$0xff] }
  0xbf   : > { %6698 = vmatprep.mubr.msk.f32.mxu1 %vm7654_vm1, %v7653_v1 }
  0xc1   : > { %6821 = vmatmul.mubr.msk.f32.gmra.mrb[82].mxu0 %vm271_vm2, %v1580_v5 }
  0xc2   : > { %6699 = vmatmul.mubr.msk.f32.gmra.mrb[82].mxu1 %vm271_vm2, %v1019_v4  ;;  %6823 = vmatprep.mubr.msk.f32.mxu0 %vm7654_vm1, %v7653_v1 }
  0xc3   : > { %6701 = vmatprep.mubr.msk.f32.mxu1 %vm7654_vm1, %v7653_v1 }
  0xc5   : > { %6824 = vmatmul.mubr.msk.f32.gmra.mrb[84].mxu0 %vm271_vm2, %v1581_v7 }
  0xc6   : > { %6702 = vmatmul.mubr.msk.f32.gmra.mrb[84].mxu1 %vm271_vm2, %v1020_v6  ;;  %6826 = vmatprep.mubr.msk.f32.mxu0 %vm7654_vm1, %v7653_v1 }
  0xc7   : > { %6704 = vmatprep.mubr.msk.f32.mxu1 %vm7654_vm1, %v7653_v1 }
  0xc9   : > { %6827 = vmatmul.mubr.msk.f32.gmra.mrb[86].mxu0 %vm271_vm2, %v1582_v9  ;;  %v1597_v9 = vld [vmem:[#allocation2 + $0x12a] sm:$0xff] }
  0xca   : > { %6705 = vmatmul.mubr.msk.f32.gmra.mrb[86].mxu1 %vm271_vm2, %v1021_v8  ;;  %6829 = vmatprep.mubr.msk.f32.mxu0 %vm7654_vm1, %v7653_v1  ;;  %v1036_v8 = vld [vmem:[#allocation2 + $0x131] sm:$0xff] }
  0xcb   : > { %6707 = vmatprep.mubr.msk.f32.mxu1 %vm7654_vm1, %v7653_v1 }
  0xcd   : > { %6830 = vmatmul.mubr.msk.f32.gmra.mrb[88].mxu0 %vm271_vm2, %v1583_v11 }
  0xce   : > { %6708 = vmatmul.mubr.msk.f32.gmra.mrb[88].mxu1 %vm271_vm2, %v1022_v10  ;;  %6832 = vmatprep.mubr.msk.f32.mxu0 %vm7654_vm1, %v7653_v1 }
  0xcf   : > { %6710 = vmatprep.mubr.msk.f32.mxu1 %vm7654_vm1, %v7653_v1 }
  0xd1   : > { %6833 = vmatmul.mubr.msk.f32.gmra.mrb[90].mxu0 %vm271_vm2, %v1584_v13 }
  0xd2   : > { %6711 = vmatmul.mubr.msk.f32.gmra.mrb[90].mxu1 %vm271_vm2, %v1023_v12  ;;  %6835 = vmatprep.mubr.msk.f32.mxu0 %vm7654_vm1, %v7653_v1 }
  0xd3   : > { %6713 = vmatprep.mubr.msk.f32.mxu1 %vm7654_vm1, %v7653_v1 }
  0xd5   : > { %6836 = vmatmul.mubr.msk.f32.gmra.mrb[92].mxu0 %vm271_vm2, %v1585_v15  ;;  %v1598_v15 = vld [vmem:[#allocation2 + $0x132] sm:$0xff] }
  0xd6   : > { %6714 = vmatmul.mubr.msk.f32.gmra.mrb[92].mxu1 %vm271_vm2, %v1024_v14  ;;  %6838 = vmatprep.mubr.msk.f32.mxu0 %vm7654_vm1, %v7653_v1  ;;  %v1037_v14 = vld [vmem:[#allocation2 + $0x139] sm:$0xff] }
  0xd7   : > { %6716 = vmatprep.mubr.msk.f32.mxu1 %vm7654_vm1, %v7653_v1 }
  0xd9   : > { %6839 = vmatmul.mubr.msk.f32.gmra.mrb[94].mxu0 %vm271_vm2, %v1586_v17 }
  0xda   : > { %6717 = vmatmul.mubr.msk.f32.gmra.mrb[94].mxu1 %vm271_vm2, %v1025_v16  ;;  %6841 = vmatprep.mubr.msk.f32.mxu0 %vm7654_vm1, %v7653_v1 }
  0xdb   : > { %6719 = vmatprep.mubr.msk.f32.mxu1 %vm7654_vm1, %v7653_v1 }
  0xdd   : > { %6842 = vmatmul.mubr.msk.f32.gmra.mrb[96].mxu0 %vm271_vm2, %v1587_v19 }
  0xde   : > { %6720 = vmatmul.mubr.msk.f32.gmra.mrb[96].mxu1 %vm271_vm2, %v1026_v18  ;;  %6844 = vmatprep.mubr.msk.f32.mxu0 %vm7654_vm1, %v7653_v1 }
  0xdf   : > { %6722 = vmatprep.mubr.msk.f32.mxu1 %vm7654_vm1, %v7653_v1 }
  0xe1   : > { %6845 = vmatmul.mubr.msk.f32.gmra.mrb[98].mxu0 %vm271_vm2, %v1588_v21  ;;  %v1599_v21 = vld [vmem:[#allocation2 + $0x13a] sm:$0xff] }
  0xe2   : > { %6723 = vmatmul.mubr.msk.f32.gmra.mrb[98].mxu1 %vm271_vm2, %v1027_v20  ;;  %6847 = vmatprep.mubr.msk.f32.mxu0 %vm7654_vm1, %v7653_v1  ;;  %v1038_v20 = vld [vmem:[#allocation2 + $0x141] sm:$0xff] }
  0xe3   : > { %6725 = vmatprep.mubr.msk.f32.mxu1 %vm7654_vm1, %v7653_v1 }
  0xe5   : > { %6848 = vmatmul.mubr.msk.f32.gmra.mrb[100].mxu0 %vm271_vm2, %v1589_v23 }
  0xe6   : > { %6726 = vmatmul.mubr.msk.f32.gmra.mrb[100].mxu1 %vm271_vm2, %v1028_v22  ;;  %6850 = vmatprep.mubr.msk.f32.mxu0 %vm7654_vm1, %v7653_v1 }
  0xe7   : > { %6728 = vmatprep.mubr.msk.f32.mxu1 %vm7654_vm1, %v7653_v1 }
  0xe9   : > { %6851 = vmatmul.mubr.msk.f32.gmra.mrb[102].mxu0 %vm271_vm2, %v1590_v25 }
  0xea   : > { %6729 = vmatmul.mubr.msk.f32.gmra.mrb[102].mxu1 %vm271_vm2, %v1029_v24  ;;  %6853 = vmatprep.mubr.msk.f32.mxu0 %vm7654_vm1, %v7653_v1 }
  0xeb   : > { %6731 = vmatprep.mubr.msk.f32.mxu1 %vm7654_vm1, %v7653_v1 }
  0xed   : > { %6854 = vmatmul.mubr.msk.f32.gmra.mrb[104].mxu0 %vm271_vm2, %v1591_v27  ;;  %v5955_v27 = vld [vmem:[%s9472_s2 + $0x14] sm:$0xf] }
  0xee   : > { %6732 = vmatmul.mubr.msk.f32.gmra.mrb[104].mxu1 %vm271_vm2, %v1030_v26  ;;  %6856 = vmatprep.mubr.msk.f32.mxu0 %vm7654_vm1, %v7653_v1  ;;  %v1600_v26 = vld [vmem:[#allocation2 + $0x142] sm:$0xff] }
  0xef   : > { %6734 = vmatprep.mubr.msk.f32.mxu1 %vm7654_vm1, %v7653_v1 }
  0xf0   : > { %v8187_v32 = vpop.f32.mrb[0].mxu0 }
  0xf1   : > { %v817_v30 = vpop.f32.mrb[0].mxu1  ;;  %v6512_v36 = vpop.f32.mrb[1].mxu0  ;;  %6857 = vmatmul.mubr.msk.f32.gmra.mrb[106].mxu0 %vm271_vm2, %v1592_v29 }
  0xf2   : > { %v6575_v34 = vpop.f32.mrb[1].mxu1  ;;  %6735 = vmatmul.mubr.msk.f32.gmra.mrb[106].mxu1 %vm271_vm2, %v1031_v28  ;;  %6859 = vmatprep.mubr.msk.f32.mxu0 %vm7654_vm1, %v7653_v1  ;;  %978 = vst [vmem:[%s8185_s17 + $0xa8] sm:$0xff] %v817_v30  ;;  %v2684_v36 = vld [vmem:[#allocation2 + $0x13] sm:$0xff] }
  0xf3   : > { %6737 = vmatprep.mubr.msk.f32.mxu1 %vm7654_vm1, %v7653_v1 }
  0xf4   : > { %v8196_v43 = vpop.f32.mrb[2].mxu0 }
  0xf5   : > { %v822_v41 = vpop.f32.mrb[2].mxu1  ;;  %v6515_v47 = vpop.f32.mrb[3].mxu0  ;;  %6860 = vmatmul.mubr.msk.f32.gmra.mrb[108].mxu0 %vm271_vm2, %v1593_v39 }
  0xf6   : > { %v6578_v45 = vpop.f32.mrb[3].mxu1  ;;  %6738 = vmatmul.mubr.msk.f32.gmra.mrb[108].mxu1 %vm271_vm2, %v1032_v38  ;;  %6862 = vmatprep.mubr.msk.f32.mxu0 %vm7654_vm1, %v7653_v1  ;;  %979 = vst [vmem:[%s8185_s17 + $0xb0] sm:$0xff] %v822_v41  ;;  %v5998_v38 = vld [vmem:[%s9472_s2 + $0x18] sm:$0xf] }
  0xf7   : > { %6740 = vmatprep.mubr.msk.f32.mxu1 %vm7654_vm1, %v7653_v1  ;;  %v2685_v47 = vld [vmem:[#allocation2 + $0x1b] sm:$0xff] }
  0xf8   : > { %v8205_v55 = vpop.f32.mrb[4].mxu0 }
  0xf9   : > { %v827_v53 = vpop.f32.mrb[4].mxu1  ;;  %v6518_v58 = vpop.f32.mrb[5].mxu0  ;;  %6863 = vmatmul.mubr.msk.f32.gmra.mrb[110].mxu0 %vm271_vm2, %v1594_v51 }
  0xfa   : > { %v6581_v57 = vpop.f32.mrb[5].mxu1  ;;  %6741 = vmatmul.mubr.msk.f32.gmra.mrb[110].mxu1 %vm271_vm2, %v1033_v49  ;;  %6865 = vmatprep.mubr.msk.f32.mxu0 %vm7654_vm1, %v7653_v1  ;;  %980 = vst [vmem:[%s8185_s17 + $0xb8] sm:$0xff] %v827_v53 }
  0xfb   : > { %6743 = vmatprep.mubr.msk.f32.mxu1 %vm7654_vm1, %v7653_v1  ;;  %v2686_v57 = vld [vmem:[#allocation2 + $0x23] sm:$0xff] }
  0xfc   : > { %v8214_v62 = vpop.f32.mrb[6].mxu0 }
  0xfd   : > { %v832_v61 = vpop.f32.mrb[6].mxu1  ;;  %v6521_v0 = vpop.f32.mrb[7].mxu0  ;;  %6866 = vmatmul.mubr.msk.f32.gmra.mrb[112].mxu0 %vm271_vm2, %v1595_v60 }
  0xfe   : > { %v6584_v63 = vpop.f32.mrb[7].mxu1  ;;  %6744 = vmatmul.mubr.msk.f32.gmra.mrb[112].mxu1 %vm271_vm2, %v1034_v59  ;;  %6868 = vmatprep.mubr.msk.f32.mxu0 %vm7654_vm1, %v7653_v1  ;;  %981 = vst [vmem:[%s8185_s17 + $0xc0] sm:$0xff] %v832_v61  ;;  %v2687_v61 = vld [vmem:[#allocation2 + $0x2b] sm:$0xff] }
  0xff   : > { %6746 = vmatprep.mubr.msk.f32.mxu1 %vm7654_vm1, %v7653_v1 }
 0x100   : > { %v8223_v5 = vpop.f32.mrb[8].mxu0 }
 0x101   : > { %v837_v4 = vpop.f32.mrb[8].mxu1  ;;  %v6524_v7 = vpop.f32.mrb[9].mxu0  ;;  %6869 = vmatmul.mubr.msk.f32.gmra.mrb[114].mxu0 %vm271_vm2, %v1596_v3  ;;  %v2688_v3 = vld [vmem:[#allocation2 + $0x33] sm:$0xff] }
 0x102   : > { %v6587_v6 = vpop.f32.mrb[9].mxu1  ;;  %6747 = vmatmul.mubr.msk.f32.gmra.mrb[114].mxu1 %vm271_vm2, %v1035_v2  ;;  %6871 = vmatprep.mubr.msk.f32.mxu0 %vm7654_vm1, %v7653_v1  ;;  %982 = vst [vmem:[%s8185_s17 + $0xc8] sm:$0xff] %v837_v4  ;;  %v314_v7 = vld [vmem:[%s7986_s12 + $0x8] sm:$0xff] }
 0x103   : > { %6749 = vmatprep.mubr.msk.f32.mxu1 %vm7654_vm1, %v7653_v1  ;;  %355 = vst.msk [vmem:[#allocation2 + $0x150] sm:$0xff] %vm271_vm2, %v314_v7 }
 0x104   : > { %v8232_v11 = vpop.f32.mrb[10].mxu0 }
 0x105   : > { %v842_v10 = vpop.f32.mrb[10].mxu1  ;;  %v6527_v13 = vpop.f32.mrb[11].mxu0  ;;  %6872 = vmatmul.mubr.msk.f32.gmra.mrb[116].mxu0 %vm271_vm2, %v1597_v9  ;;  %v2689_v9 = vld [vmem:[#allocation2 + $0x3b] sm:$0xff] }
 0x106   : > { %v6590_v12 = vpop.f32.mrb[11].mxu1  ;;  %6750 = vmatmul.mubr.msk.f32.gmra.mrb[116].mxu1 %vm271_vm2, %v1036_v8  ;;  %6874 = vmatprep.mubr.msk.f32.mxu0 %vm7654_vm1, %v7653_v1  ;;  %983 = vst [vmem:[%s8185_s17 + $0xd0] sm:$0xff] %v842_v10  ;;  %v315_v13 = vld [vmem:[%s7986_s12 + $0x10] sm:$0xff] }
 0x107   : > { %6752 = vmatprep.mubr.msk.f32.mxu1 %vm7654_vm1, %v7653_v1  ;;  %356 = vst.msk [vmem:[#allocation2 + $0x158] sm:$0xff] %vm271_vm2, %v315_v13  ;;  %v2137_v13 = vld [vmem:[#allocation2 + $0x8a] sm:$0xff] }
 0x108   : > { %v8241_v17 = vpop.f32.mrb[12].mxu0 }
 0x109   : > { %v847_v16 = vpop.f32.mrb[12].mxu1  ;;  %v6530_v19 = vpop.f32.mrb[13].mxu0  ;;  %6875 = vmatmul.mubr.msk.f32.gmra.mrb[118].mxu0 %vm271_vm2, %v1598_v15  ;;  %v2690_v15 = vld [vmem:[#allocation2 + $0x43] sm:$0xff] }
 0x10a   : > { %v6593_v18 = vpop.f32.mrb[13].mxu1  ;;  %6753 = vmatmul.mubr.msk.f32.gmra.mrb[118].mxu1 %vm271_vm2, %v1037_v14  ;;  %6877 = vmatprep.mubr.msk.f32.mxu0 %vm7654_vm1, %v7653_v1  ;;  %984 = vst [vmem:[%s8185_s17 + $0xd8] sm:$0xff] %v847_v16 }
 0x10b   : > { %6755 = vmatprep.mubr.msk.f32.mxu1 %vm7654_vm1, %v7653_v1 }
 0x10c   : > { %v8250_v23 = vpop.f32.mrb[14].mxu0 }
 0x10d   : > { %v852_v22 = vpop.f32.mrb[14].mxu1  ;;  %v6533_v25 = vpop.f32.mrb[15].mxu0  ;;  %6878 = vmatmul.mubr.msk.f32.gmra.mrb[120].mxu0 %vm271_vm2, %v1599_v21 }
 0x10e   : > { %v6596_v24 = vpop.f32.mrb[15].mxu1  ;;  %6756 = vmatmul.mubr.msk.f32.gmra.mrb[120].mxu1 %vm271_vm2, %v1038_v20  ;;  %6880 = vmatprep.mubr.msk.f32.mxu0 %vm7654_vm1, %v7653_v1  ;;  %985 = vst [vmem:[%s8185_s17 + $0xe0] sm:$0xff] %v852_v22  ;;  %v2691_v20 = vld [vmem:[#allocation2 + $0x4b] sm:$0xff]  ;;  %v2692_v25 = vld [vmem:[#allocation2 + $0x53] sm:$0xff] }
 0x10f   : > { %6885 = vmatprep.mubr.msk.f32.mxu1 %vm7654_vm1, %v7653_v1 }
 0x110   : > { %v8262_v29 = vpop.f32.mrb[16].mxu0 }
 0x111   : > { %v857_v28 = vpop.f32.mrb[16].mxu1  ;;  %v6536_v34 = vpop.f32.mrb[17].mxu0  ;;  %6881 = vmatmul.mubr.msk.f32.gmra.mrb[122].mxu0 %vm271_vm2, %v1600_v26 }
 0x112   : > { %v6599_v30 = vpop.f32.mrb[17].mxu1  ;;  %6886 = vmatmul.mubr.msk.f32.vlgmr.msra.gmra.mrb[122].mxu1 %vm271_vm2, %v7952_v31  ;;  %986 = vst [vmem:[%s8185_s17 + $0xe8] sm:$0xff] %v857_v28  ;;  %7010 = vmatprep.mubr.msk.f32.mxu0 %vm7654_vm1, %v7653_v1 }
 0x113   : > { %7134 = vmatpush3.msk.msra.mxu1 %vm642_vm0, %v5955_v27  ;;  %6888 = vmatprep.mubr.msk.f32.mxu1 %vm7654_vm1, %v7653_v1  ;;  %v2693_v30 = vld [vmem:[#allocation2 + $0x5b] sm:$0xff] }
 0x114   : > { %7383 = vmatprep.subr.mxu1 %v7653_v1  ;;  %v8277_v39 = vpop.f32.mrb[18].mxu0 }
 0x115   : > { %v862_v31 = vpop.f32.mrb[18].mxu1  ;;  %v6539_v45 = vpop.f32.mrb[19].mxu0  ;;  %7011 = vmatmul.mubr.msk.f32.vlgmr.msra.gmra.mrb[124].mxu0 %vm271_vm2, %v2684_v36 }
 0x116   : > { %v6602_v41 = vpop.f32.mrb[19].mxu1  ;;  %6889 = vmatmul.mubr.msk.f32.gmra.mrb[124].mxu1 %vm271_vm2, %v7961_v33  ;;  %7259 = vmatpush3.msk.msra.mxu0 %vm642_vm0, %v5998_v38  ;;  %987 = vst [vmem:[%s8185_s17 + $0xf0] sm:$0xff] %v862_v31  ;;  %v2694_v31 = vld [vmem:[#allocation2 + $0x63] sm:$0xff] }
 0x117   : > { %6891 = vmatprep.mubr.msk.f32.mxu1 %vm7654_vm1, %v7653_v1  ;;  %7013 = vmatprep.mubr.msk.f32.mxu0 %vm7654_vm1, %v7653_v1 }
 0x118   : > { %7508 = vmatprep.subr.mxu0 %v7653_v1  ;;  %v8289_v51 = vpop.f32.mrb[20].mxu0 }
 0x119   : > { %v867_v49 = vpop.f32.mrb[20].mxu1  ;;  %v6542_v53 = vpop.f32.mrb[21].mxu0  ;;  %7014 = vmatmul.mubr.msk.f32.gmra.mrb[126].mxu0 %vm271_vm2, %v2685_v47 }
 0x11a   : > { %v6605_v33 = vpop.f32.mrb[21].mxu1  ;;  %6892 = vmatmul.mubr.msk.f32.gmra.mrb[126].mxu1 %vm271_vm2, %v7972_v35  ;;  %7016 = vmatprep.mubr.msk.f32.mxu0 %vm7654_vm1, %v7653_v1  ;;  %988 = vst [vmem:[%s8185_s17 + $0xf8] sm:$0xff] %v867_v49  ;;  %v2695_v49 = vld [vmem:[#allocation2 + $0x6b] sm:$0xff] }
 0x11b   : > { %6894 = vmatprep.mubr.msk.f32.mxu1 %vm7654_vm1, %v7653_v1 }
 0x11c   : > { %v8299_v59 = vpop.f32.mrb[22].mxu0 }
 0x11d   : > { %v872_v58 = vpop.f32.mrb[22].mxu1  ;;  %v6545_v35 = vpop.f32.mrb[23].mxu0  ;;  %7017 = vmatmul.mubr.msk.f32.gmra.mrb[128].mxu0 %vm271_vm2, %v2686_v57 }
 0x11e   : > { %v6608_v60 = vpop.f32.mrb[23].mxu1  ;;  %6895 = vmatmul.mubr.msk.f32.gmra.mrb[128].mxu1 %vm271_vm2, %v7981_v37  ;;  %7019 = vmatprep.mubr.msk.f32.mxu0 %vm7654_vm1, %v7653_v1  ;;  %989 = vst [vmem:[%s8185_s17 + $0x100] sm:$0xff] %v872_v58  ;;  %v2696_v35 = vld [vmem:[#allocation2 + $0x73] sm:$0xff] }
 0x11f   : > { %6897 = vmatprep.mubr.msk.f32.mxu1 %vm7654_vm1, %v7653_v1  ;;  %v2135_v60 = vld [vmem:[#allocation2 + $0x7a] sm:$0xff] }
 0x120   : > { %v8309_v0 = vpop.f32.mrb[24].mxu0 }
 0x121   : > { %v877_v63 = vpop.f32.mrb[24].mxu1  ;;  %v6548_v37 = vpop.f32.mrb[25].mxu0  ;;  %7020 = vmatmul.mubr.msk.f32.gmra.mrb[130].mxu0 %vm271_vm2, %v2687_v61 }
 0x122   : > { %v6611_v2 = vpop.f32.mrb[25].mxu1  ;;  %6898 = vmatmul.mubr.msk.f32.gmra.mrb[130].mxu1 %vm271_vm2, %v7997_v40  ;;  %7022 = vmatprep.mubr.msk.f32.mxu0 %vm7654_vm1, %v7653_v1  ;;  %990 = vst [vmem:[%s8185_s17 + $0x108] sm:$0xff] %v877_v63 }
 0x123   : > { %6900 = vmatprep.mubr.msk.f32.mxu1 %vm7654_vm1, %v7653_v1 }
 0x124   : > { %v8319_v6 = vpop.f32.mrb[26].mxu0 }
 0x125   : > { %v882_v4 = vpop.f32.mrb[26].mxu1  ;;  %v6551_v40 = vpop.f32.mrb[27].mxu0  ;;  %7023 = vmatmul.mubr.msk.f32.gmra.mrb[132].mxu0 %vm271_vm2, %v2688_v3  ;;  %v2136_v3 = vld [vmem:[#allocation2 + $0x82] sm:$0xff] }
 0x126   : > { %v6614_v8 = vpop.f32.mrb[27].mxu1  ;;  %6901 = vmatmul.mubr.msk.f32.gmra.mrb[132].mxu1 %vm271_vm2, %v8006_v42  ;;  %7025 = vmatprep.mubr.msk.f32.mxu0 %vm7654_vm1, %v7653_v1  ;;  %991 = vst [vmem:[%s8185_s17 + $0x110] sm:$0xff] %v882_v4  ;;  %v2697_v4 = vld [vmem:[#allocation2 + $0x7b] sm:$0xff] }
 0x127   : > { %6903 = vmatprep.mubr.msk.f32.mxu1 %vm7654_vm1, %v7653_v1 }
 0x128   : > { %v8331_v12 = vpop.f32.mrb[28].mxu0 }
 0x129   : > { %v887_v10 = vpop.f32.mrb[28].mxu1  ;;  %v6554_v42 = vpop.f32.mrb[29].mxu0  ;;  %7026 = vmatmul.mubr.msk.f32.gmra.mrb[134].mxu0 %vm271_vm2, %v2689_v9 }
 0x12a   : > { %v6617_v14 = vpop.f32.mrb[29].mxu1  ;;  %6904 = vmatmul.mubr.msk.f32.gmra.mrb[134].mxu1 %vm271_vm2, %v8015_v44  ;;  %7028 = vmatprep.mubr.msk.f32.mxu0 %vm7654_vm1, %v7653_v1  ;;  %992 = vst [vmem:[%s8185_s17 + $0x118] sm:$0xff] %v887_v10 }
 0x12b   : > { %6906 = vmatprep.mubr.msk.f32.mxu1 %vm7654_vm1, %v7653_v1  ;;  %v2698_v14 = vld [vmem:[#allocation2 + $0x83] sm:$0xff] }
 0x12c   : > { %v8343_v18 = vpop.f32.mrb[30].mxu0 }
 0x12d   : > { %v892_v16 = vpop.f32.mrb[30].mxu1  ;;  %v6557_v44 = vpop.f32.mrb[31].mxu0  ;;  %7029 = vmatmul.mubr.msk.f32.gmra.mrb[136].mxu0 %vm271_vm2, %v2690_v15 }
 0x12e   : > { %v6620_v19 = vpop.f32.mrb[31].mxu1  ;;  %6907 = vmatmul.mubr.msk.f32.gmra.mrb[136].mxu1 %vm271_vm2, %v8017_v46  ;;  %7031 = vmatprep.mubr.msk.f32.mxu0 %vm7654_vm1, %v7653_v1  ;;  %993 = vst [vmem:[%s8185_s17 + $0x120] sm:$0xff] %v892_v16 }
 0x12f   : > { %6909 = vmatprep.mubr.msk.f32.mxu1 %vm7654_vm1, %v7653_v1 }
 0x130   : > { %v8353_v22 = vpop.f32.mrb[32].mxu0 }
 0x131   : > { %v897_v21 = vpop.f32.mrb[32].mxu1  ;;  %v6560_v46 = vpop.f32.mrb[33].mxu0  ;;  %7032 = vmatmul.mubr.msk.f32.gmra.mrb[138].mxu0 %vm271_vm2, %v2691_v20  ;;  %v2138_v20 = vld [vmem:[#allocation2 + $0x92] sm:$0xff] }
 0x132   : > { %v6623_v24 = vpop.f32.mrb[33].mxu1  ;;  %6910 = vmatmul.mubr.msk.f32.gmra.mrb[138].mxu1 %vm271_vm2, %v8026_v48  ;;  %7034 = vmatprep.mubr.msk.f32.mxu0 %vm7654_vm1, %v7653_v1  ;;  %994 = vst [vmem:[%s8185_s17 + $0x128] sm:$0xff] %v897_v21  ;;  %v2699_v21 = vld [vmem:[#allocation2 + $0x8b] sm:$0xff] }
 0x133   : > { %6912 = vmatprep.mubr.msk.f32.mxu1 %vm7654_vm1, %v7653_v1 }
 0x134   : > { %v8363_v27 = vpop.f32.mrb[34].mxu0 }
 0x135   : > { %v902_v26 = vpop.f32.mrb[34].mxu1  ;;  %v6563_v48 = vpop.f32.mrb[35].mxu0  ;;  %7035 = vmatmul.mubr.msk.f32.gmra.mrb[140].mxu0 %vm271_vm2, %v2692_v25 }
 0x136   : > { %v6626_v28 = vpop.f32.mrb[35].mxu1  ;;  %6913 = vmatmul.mubr.msk.f32.gmra.mrb[140].mxu1 %vm271_vm2, %v8035_v50  ;;  %7037 = vmatprep.mubr.msk.f32.mxu0 %vm7654_vm1, %v7653_v1  ;;  %995 = vst [vmem:[%s8185_s17 + $0x130] sm:$0xff] %v902_v26  ;;  %v2139_v48 = vld [vmem:[#allocation2 + $0x9a] sm:$0xff] }
 0x137   : > { %6915 = vmatprep.mubr.msk.f32.mxu1 %vm7654_vm1, %v7653_v1 }
 0x138   : > { %v8373_v36 = vpop.f32.mrb[36].mxu0 }
 0x139   : > { %v907_v34 = vpop.f32.mrb[36].mxu1  ;;  %v6566_v50 = vpop.f32.mrb[37].mxu0  ;;  %7038 = vmatmul.mubr.msk.f32.gmra.mrb[142].mxu0 %vm271_vm2, %v2693_v30  ;;  %v2700_v30 = vld [vmem:[#allocation2 + $0x93] sm:$0xff] }
 0x13a   : > { %v6629_v38 = vpop.f32.mrb[37].mxu1  ;;  %6916 = vmatmul.mubr.msk.f32.gmra.mrb[142].mxu1 %vm271_vm2, %v8051_v52  ;;  %7040 = vmatprep.mubr.msk.f32.mxu0 %vm7654_vm1, %v7653_v1  ;;  %996 = vst [vmem:[%s8185_s17 + $0x138] sm:$0xff] %v907_v34 }
 0x13b   : > { %6918 = vmatprep.mubr.msk.f32.mxu1 %vm7654_vm1, %v7653_v1 }
 0x13c   : > { %v8383_v45 = vpop.f32.mrb[38].mxu0 }
 0x13d   : > { %v912_v41 = vpop.f32.mrb[38].mxu1  ;;  %v6569_v52 = vpop.f32.mrb[39].mxu0  ;;  %7041 = vmatmul.mubr.msk.f32.gmra.mrb[144].mxu0 %vm271_vm2, %v2694_v31 }
 0x13e   : > { %v6632_v47 = vpop.f32.mrb[39].mxu1  ;;  %6919 = vmatmul.mubr.msk.f32.gmra.mrb[144].mxu1 %vm271_vm2, %v8060_v54  ;;  %7043 = vmatprep.mubr.msk.f32.mxu0 %vm7654_vm1, %v7653_v1  ;;  %997 = vst [vmem:[%s8185_s17 + $0x140] sm:$0xff] %v912_v41  ;;  %v2701_v52 = vld [vmem:[#allocation2 + $0x9b] sm:$0xff] }
 0x13f   : > { %6921 = vmatprep.mubr.msk.f32.mxu1 %vm7654_vm1, %v7653_v1  ;;  %v2140_v47 = vld [vmem:[#allocation2 + $0xa2] sm:$0xff] }
 0x140   : > { %v8393_v53 = vpop.f32.mrb[40].mxu0 }
 0x141   : > { %v1274_v33 = vpop.f32.mrb[40].mxu1  ;;  %v6572_v54 = vpop.f32.mrb[41].mxu0  ;;  %7044 = vmatmul.mubr.msk.f32.gmra.mrb[146].mxu0 %vm271_vm2, %v2695_v49 }
 0x142   : > { %v1478_v57 = vadd.f32 %v1274_v33, %v8187_v32  ;;  %v6637_v58 = vpop.f32.mrb[41].mxu1  ;;  %6922 = vmatmul.mubr.msk.f32.gmra.mrb[146].mxu1 %vm271_vm2, %v8069_v56  ;;  %7046 = vmatprep.mubr.msk.f32.mxu0 %vm7654_vm1, %v7653_v1 }
 0x143   : > { %6924 = vmatprep.mubr.msk.f32.mxu1 %vm7654_vm1, %v7653_v1 }
 0x144   : > { %v1836_v63 = vpop.f32.mrb[42].mxu0 }
 0x145   : > { %v1279_v61 = vpop.f32.mrb[42].mxu1  ;;  %v2040_v56 = vadd.f32 %v1836_v63, %v1478_v57  ;;  %v6762_v37 = vpop.f32.mrb[43].mxu0  ;;  %7047 = vmatmul.mubr.msk.f32.gmra.mrb[148].mxu0 %vm271_vm2, %v2696_v35  ;;  %v2702_v35 = vld [vmem:[#allocation2 + $0xa3] sm:$0xff] }
 0x146   : > { %v1479_v32 = vadd.f32 %v1279_v61, %v8196_v43  ;;  %v6640_v2 = vpop.f32.mrb[43].mxu1  ;;  %6925 = vmatmul.mubr.msk.f32.gmra.mrb[148].mxu1 %vm271_vm2, %v2135_v60  ;;  %7049 = vmatprep.mubr.msk.f32.mxu0 %vm7654_vm1, %v7653_v1  ;;  %v2141_v60 = vld [vmem:[#allocation2 + $0xaa] sm:$0xff]  ;;  %v2142_v37 = vld [vmem:[#allocation2 + $0xb2] sm:$0xff] }
 0x147   : > { %6927 = vmatprep.mubr.msk.f32.mxu1 %vm7654_vm1, %v7653_v1  ;;  %2081 = vst [vmem:[%s8185_s17] sm:$0xff] %v2040_v56 }
 0x148   : > { %v1841_v8 = vpop.f32.mrb[44].mxu0 }
 0x149   : > { %v1284_v7 = vpop.f32.mrb[44].mxu1  ;;  %v2041_v9 = vadd.f32 %v1841_v8, %v1479_v32  ;;  %v6765_v10 = vpop.f32.mrb[45].mxu0  ;;  %7050 = vmatmul.mubr.msk.f32.gmra.mrb[150].mxu0 %vm271_vm2, %v2697_v4 }
 0x14a   : > { %v1480_v43 = vadd.f32 %v1284_v7, %v8205_v55  ;;  %v6643_v40 = vpop.f32.mrb[45].mxu1  ;;  %6928 = vmatmul.mubr.msk.f32.gmra.mrb[150].mxu1 %vm271_vm2, %v2136_v3  ;;  %7052 = vmatprep.mubr.msk.f32.mxu0 %vm7654_vm1, %v7653_v1  ;;  %v2703_v3 = vld [vmem:[#allocation2 + $0xab] sm:$0xff]  ;;  %v2704_v10 = vld [vmem:[#allocation2 + $0xb3] sm:$0xff] }
 0x14b   : > { %6930 = vmatprep.mubr.msk.f32.mxu1 %vm7654_vm1, %v7653_v1  ;;  %2082 = vst [vmem:[%s8185_s17 + $0x8] sm:$0xff] %v2041_v9  ;;  %v2143_v9 = vld [vmem:[#allocation2 + $0xba] sm:$0xff] }
 0x14c   : > { %v1846_v15 = vpop.f32.mrb[46].mxu0 }
 0x14d   : > { %v1289_v42 = vpop.f32.mrb[46].mxu1  ;;  %v2042_v19 = vadd.f32 %v1846_v15, %v1480_v43  ;;  %v6768_v44 = vpop.f32.mrb[47].mxu0  ;;  %7053 = vmatmul.mubr.msk.f32.gmra.mrb[152].mxu0 %vm271_vm2, %v2698_v14 }
 0x14e   : > { %v1481_v55 = vadd.f32 %v1289_v42, %v8214_v62  ;;  %v6646_v16 = vpop.f32.mrb[47].mxu1  ;;  %6931 = vmatmul.mubr.msk.f32.gmra.mrb[152].mxu1 %vm271_vm2, %v2137_v13  ;;  %7055 = vmatprep.mubr.msk.f32.mxu0 %vm7654_vm1, %v7653_v1 }
 0x14f   : > { %6933 = vmatprep.mubr.msk.f32.mxu1 %vm7654_vm1, %v7653_v1  ;;  %2083 = vst [vmem:[%s8185_s17 + $0x10] sm:$0xff] %v2042_v19  ;;  %v2144_v16 = vld [vmem:[#allocation2 + $0xc2] sm:$0xff] }
 0x150   : > { %v1851_v46 = vpop.f32.mrb[48].mxu0  ;;  %v2705_v19 = vld [vmem:[#allocation2 + $0xbb] sm:$0xff] }
 0x151   : > { %v1294_v24 = vpop.f32.mrb[48].mxu1  ;;  %v2043_v26 = vadd.f32 %v1851_v46, %v1481_v55  ;;  %v6771_v28 = vpop.f32.mrb[49].mxu0  ;;  %7056 = vmatmul.mubr.msk.f32.gmra.mrb[154].mxu0 %vm271_vm2, %v2699_v21 }
 0x152   : > { %v1482_v62 = vadd.f32 %v1294_v24, %v8223_v5  ;;  %v6649_v25 = vpop.f32.mrb[49].mxu1  ;;  %6934 = vmatmul.mubr.msk.f32.gmra.mrb[154].mxu1 %vm271_vm2, %v2138_v20  ;;  %7058 = vmatprep.mubr.msk.f32.mxu0 %vm7654_vm1, %v7653_v1 }
 0x153   : > { %6936 = vmatprep.mubr.msk.f32.mxu1 %vm7654_vm1, %v7653_v1  ;;  %2084 = vst [vmem:[%s8185_s17 + $0x18] sm:$0xff] %v2043_v26  ;;  %v2706_v25 = vld [vmem:[#allocation2 + $0xc3] sm:$0xff] }
 0x154   : > { %v1856_v38 = vpop.f32.mrb[50].mxu0 }
 0x155   : > { %v1299_v34 = vpop.f32.mrb[50].mxu1  ;;  %v2044_v31 = vadd.f32 %v1856_v38, %v1482_v62  ;;  %v6774_v41 = vpop.f32.mrb[51].mxu0  ;;  %7059 = vmatmul.mubr.msk.f32.gmra.mrb[156].mxu0 %vm271_vm2, %v2700_v30  ;;  %v2145_v62 = vld [vmem:[#allocation2 + $0xca] sm:$0xff]  ;;  %v2146_v38 = vld [vmem:[#allocation2 + $0xd2] sm:$0xff] }
 0x156   : > { %v1483_v5 = vadd.f32 %v1299_v34, %v8232_v11  ;;  %v6652_v50 = vpop.f32.mrb[51].mxu1  ;;  %6937 = vmatmul.mubr.msk.f32.gmra.mrb[156].mxu1 %vm271_vm2, %v2139_v48  ;;  %7061 = vmatprep.mubr.msk.f32.mxu0 %vm7654_vm1, %v7653_v1 }
 0x157   : > { %6939 = vmatprep.mubr.msk.f32.mxu1 %vm7654_vm1, %v7653_v1  ;;  %2085 = vst [vmem:[%s8185_s17 + $0x20] sm:$0xff] %v2044_v31 }
 0x158   : > { %v1861_v33 = vpop.f32.mrb[52].mxu0 }
 0x159   : > { %v1304_v49 = vpop.f32.mrb[52].mxu1  ;;  %v2045_v58 = vadd.f32 %v1861_v33, %v1483_v5  ;;  %v6777_v54 = vpop.f32.mrb[53].mxu0  ;;  %7062 = vmatmul.mubr.msk.f32.gmra.mrb[158].mxu0 %vm271_vm2, %v2701_v52  ;;  %v2707_v5 = vld [vmem:[#allocation2 + $0xcb] sm:$0xff]  ;;  %v2708_v33 = vld [vmem:[#allocation2 + $0xd3] sm:$0xff] }
 0x15a   : > { %v1484_v11 = vadd.f32 %v1304_v49, %v8241_v17  ;;  %v6655_v57 = vpop.f32.mrb[53].mxu1  ;;  %6940 = vmatmul.mubr.msk.f32.gmra.mrb[158].mxu1 %vm271_vm2, %v2140_v47  ;;  %7064 = vmatprep.mubr.msk.f32.mxu0 %vm7654_vm1, %v7653_v1  ;;  %v2147_v49 = vld [vmem:[#allocation2 + $0xda] sm:$0xff] }
 0x15b   : > { %6942 = vmatprep.mubr.msk.f32.mxu1 %vm7654_vm1, %v7653_v1  ;;  %2086 = vst [vmem:[%s8185_s17 + $0x28] sm:$0xff] %v2045_v58 }
 0x15c   : > { %v1866_v63 = vpop.f32.mrb[54].mxu0 }
 0x15d   : > { %v1309_v61 = vpop.f32.mrb[54].mxu1  ;;  %v2046_v2 = vadd.f32 %v1866_v63, %v1484_v11  ;;  %v6780_v56 = vpop.f32.mrb[55].mxu0  ;;  %7065 = vmatmul.mubr.msk.f32.gmra.mrb[160].mxu0 %vm271_vm2, %v2702_v35  ;;  %v2148_v35 = vld [vmem:[#allocation2 + $0xe2] sm:$0xff] }
 0x15e   : > { %v1485_v17 = vadd.f32 %v1309_v61, %v8250_v23  ;;  %v6658_v32 = vpop.f32.mrb[55].mxu1  ;;  %6943 = vmatmul.mubr.msk.f32.gmra.mrb[160].mxu1 %vm271_vm2, %v2141_v60  ;;  %7067 = vmatprep.mubr.msk.f32.mxu0 %vm7654_vm1, %v7653_v1  ;;  %v2709_v61 = vld [vmem:[#allocation2 + $0xdb] sm:$0xff] }
 0x15f   : > { %6945 = vmatprep.mubr.msk.f32.mxu1 %vm7654_vm1, %v7653_v1  ;;  %2087 = vst [vmem:[%s8185_s17 + $0x30] sm:$0xff] %v2046_v2 }
 0x160   : > { %v1871_v7 = vpop.f32.mrb[56].mxu0 }
 0x161   : > { %v1314_v4 = vpop.f32.mrb[56].mxu1  ;;  %v2047_v43 = vadd.f32 %v1871_v7, %v1485_v17  ;;  %v6783_v40 = vpop.f32.mrb[57].mxu0  ;;  %7068 = vmatmul.mubr.msk.f32.gmra.mrb[162].mxu0 %vm271_vm2, %v2703_v3  ;;  %v2710_v3 = vld [vmem:[#allocation2 + $0xe3] sm:$0xff] }
 0x162   : > { %v1486_v23 = vadd.f32 %v1314_v4, %v8262_v29  ;;  %v6661_v8 = vpop.f32.mrb[57].mxu1  ;;  %6946 = vmatmul.mubr.msk.f32.gmra.mrb[162].mxu1 %vm271_vm2, %v2142_v37  ;;  %7070 = vmatprep.mubr.msk.f32.mxu0 %vm7654_vm1, %v7653_v1  ;;  %v2149_v37 = vld [vmem:[#allocation2 + $0xea] sm:$0xff]  ;;  %v2150_v40 = vld [vmem:[#allocation2 + $0xf2] sm:$0xff] }
 0x163   : > { %6948 = vmatprep.mubr.msk.f32.mxu1 %vm7654_vm1, %v7653_v1  ;;  %2088 = vst [vmem:[%s8185_s17 + $0x38] sm:$0xff] %v2047_v43 }
 0x164   : > { %v1876_v14 = vpop.f32.mrb[58].mxu0 }
 0x165   : > { %v1319_v13 = vpop.f32.mrb[58].mxu1  ;;  %v2048_v15 = vadd.f32 %v1876_v14, %v1486_v23  ;;  %v6786_v55 = vpop.f32.mrb[59].mxu0  ;;  %7071 = vmatmul.mubr.msk.f32.gmra.mrb[164].mxu0 %vm271_vm2, %v2704_v10 }
 0x166   : > { %v1487_v29 = vadd.f32 %v1319_v13, %v8277_v39  ;;  %v6664_v42 = vpop.f32.mrb[59].mxu1  ;;  %6949 = vmatmul.mubr.msk.f32.gmra.mrb[164].mxu1 %vm271_vm2, %v2143_v9  ;;  %7073 = vmatprep.mubr.msk.f32.mxu0 %vm7654_vm1, %v7653_v1  ;;  %v2711_v9 = vld [vmem:[#allocation2 + $0xeb] sm:$0xff]  ;;  %v2712_v55 = vld [vmem:[#allocation2 + $0xf3] sm:$0xff] }
 0x167   : > { %6951 = vmatprep.mubr.msk.f32.mxu1 %vm7654_vm1, %v7653_v1  ;;  %2089 = vst [vmem:[%s8185_s17 + $0x40] sm:$0xff] %v2048_v15  ;;  %v2151_v15 = vld [vmem:[#allocation2 + $0xfa] sm:$0xff] }
 0x168   : > { %v1881_v20 = vpop.f32.mrb[60].mxu0 }
 0x169   : > { %v1324_v44 = vpop.f32.mrb[60].mxu1  ;;  %v2049_v24 = vadd.f32 %v1881_v20, %v1487_v29  ;;  %v6789_v46 = vpop.f32.mrb[61].mxu0  ;;  %7074 = vmatmul.mubr.msk.f32.gmra.mrb[166].mxu0 %vm271_vm2, %v2705_v19 }
 0x16a   : > { %v1488_v39 = vadd.f32 %v1324_v44, %v8289_v51  ;;  %v6667_v21 = vpop.f32.mrb[61].mxu1  ;;  %6952 = vmatmul.mubr.msk.f32.gmra.mrb[166].mxu1 %vm271_vm2, %v2144_v16  ;;  %7076 = vmatprep.mubr.msk.f32.mxu0 %vm7654_vm1, %v7653_v1 }
 0x16b   : > { %6954 = vmatprep.mubr.msk.f32.mxu1 %vm7654_vm1, %v7653_v1  ;;  %2090 = vst [vmem:[%s8185_s17 + $0x48] sm:$0xff] %v2049_v24  ;;  %v2152_v21 = vld [vmem:[#allocation2 + $0x102] sm:$0xff] }
 0x16c   : > { %v1886_v28 = vpop.f32.mrb[62].mxu0  ;;  %v2713_v24 = vld [vmem:[#allocation2 + $0xfb] sm:$0xff] }
 0x16d   : > { %v1329_v26 = vpop.f32.mrb[62].mxu1  ;;  %v2050_v30 = vadd.f32 %v1886_v28, %v1488_v39  ;;  %v6792_v34 = vpop.f32.mrb[63].mxu0  ;;  %7077 = vmatmul.mubr.msk.f32.gmra.mrb[168].mxu0 %vm271_vm2, %v2706_v25 }
 0x16e   : > { %v1489_v51 = vadd.f32 %v1329_v26, %v8299_v59  ;;  %v6670_v48 = vpop.f32.mrb[63].mxu1  ;;  %6955 = vmatmul.mubr.msk.f32.gmra.mrb[168].mxu1 %vm271_vm2, %v2145_v62  ;;  %7079 = vmatprep.mubr.msk.f32.mxu0 %vm7654_vm1, %v7653_v1 }
 0x16f   : > { %6957 = vmatprep.mubr.msk.f32.mxu1 %vm7654_vm1, %v7653_v1  ;;  %2091 = vst [vmem:[%s8185_s17 + $0x50] sm:$0xff] %v2050_v30  ;;  %v2714_v48 = vld [vmem:[#allocation2 + $0x103] sm:$0xff] }
 0x170   : > { %v1891_v31 = vpop.f32.mrb[64].mxu0 }
 0x171   : > { %v1334_v50 = vpop.f32.mrb[64].mxu1  ;;  %v2051_v47 = vadd.f32 %v1891_v31, %v1489_v51  ;;  %v6795_v52 = vpop.f32.mrb[65].mxu0  ;;  %7080 = vmatmul.mubr.msk.f32.gmra.mrb[170].mxu0 %vm271_vm2, %v2707_v5  ;;  %v2153_v51 = vld [vmem:[#allocation2 + $0x10a] sm:$0xff]  ;;  %v2154_v31 = vld [vmem:[#allocation2 + $0x112] sm:$0xff] }
 0x172   : > { %v1490_v59 = vadd.f32 %v1334_v50, %v8309_v0  ;;  %v6673_v41 = vpop.f32.mrb[65].mxu1  ;;  %6958 = vmatmul.mubr.msk.f32.gmra.mrb[170].mxu1 %vm271_vm2, %v2146_v38  ;;  %7082 = vmatprep.mubr.msk.f32.mxu0 %vm7654_vm1, %v7653_v1 }
 0x173   : > { %6960 = vmatprep.mubr.msk.f32.mxu1 %vm7654_vm1, %v7653_v1  ;;  %2092 = vst [vmem:[%s8185_s17 + $0x58] sm:$0xff] %v2051_v47 }
 0x174   : > { %v1896_v57 = vpop.f32.mrb[66].mxu0 }
 0x175   : > { %v1339_v11 = vpop.f32.mrb[66].mxu1  ;;  %v2052_v54 = vadd.f32 %v1896_v57, %v1490_v59  ;;  %v6798_v60 = vpop.f32.mrb[67].mxu0  ;;  %7083 = vmatmul.mubr.msk.f32.gmra.mrb[172].mxu0 %vm271_vm2, %v2708_v33  ;;  %v2715_v59 = vld [vmem:[#allocation2 + $0x10b] sm:$0xff]  ;;  %v2716_v57 = vld [vmem:[#allocation2 + $0x113] sm:$0xff] }
 0x176   : > { %v1491_v0 = vadd.f32 %v1339_v11, %v8319_v6  ;;  %v6676_v58 = vpop.f32.mrb[67].mxu1  ;;  %6961 = vmatmul.mubr.msk.f32.gmra.mrb[172].mxu1 %vm271_vm2, %v2147_v49  ;;  %7085 = vmatprep.mubr.msk.f32.mxu0 %vm7654_vm1, %v7653_v1  ;;  %v2155_v11 = vld [vmem:[#allocation2 + $0x11a] sm:$0xff] }
 0x177   : > { %6963 = vmatprep.mubr.msk.f32.mxu1 %vm7654_vm1, %v7653_v1  ;;  %2093 = vst [vmem:[%s8185_s17 + $0x60] sm:$0xff] %v2052_v54 }
 0x178   : > { %v1901_v17 = vpop.f32.mrb[68].mxu0 }
 0x179   : > { %v1344_v63 = vpop.f32.mrb[68].mxu1  ;;  %v2053_v2 = vadd.f32 %v1901_v17, %v1491_v0  ;;  %v6801_v56 = vpop.f32.mrb[69].mxu0  ;;  %7086 = vmatmul.mubr.msk.f32.gmra.mrb[174].mxu0 %vm271_vm2, %v2709_v61  ;;  %v2156_v61 = vld [vmem:[#allocation2 + $0x122] sm:$0xff] }
 0x17a   : > { %v1492_v6 = vadd.f32 %v1344_v63, %v8331_v12  ;;  %v6679_v32 = vpop.f32.mrb[69].mxu1  ;;  %6964 = vmatmul.mubr.msk.f32.gmra.mrb[174].mxu1 %vm271_vm2, %v2148_v35  ;;  %7088 = vmatprep.mubr.msk.f32.mxu0 %vm7654_vm1, %v7653_v1  ;;  %v1060_v35 = vld [vmem:[%s8185_s17 + $0xa8] sm:$0xff]  ;;  %v2717_v63 = vld [vmem:[#allocation2 + $0x11b] sm:$0xff] }
 0x17b   : > { %6966 = vmatprep.mubr.msk.f32.mxu1 %vm7654_vm1, %v7653_v1  ;;  %2094 = vst [vmem:[%s8185_s17 + $0x68] sm:$0xff] %v2053_v2 }
 0x17c   : > { %v1906_v7 = vpop.f32.mrb[70].mxu0 }
 0x17d   : > { %v1349_v4 = vpop.f32.mrb[70].mxu1  ;;  %v2054_v8 = vadd.f32 %v1906_v7, %v1492_v6  ;;  %v6804_v43 = vpop.f32.mrb[71].mxu0  ;;  %7089 = vmatmul.mubr.msk.f32.gmra.mrb[176].mxu0 %vm271_vm2, %v2710_v3  ;;  %v1061_v3 = vld [vmem:[%s8185_s17 + $0xb0] sm:$0xff]  ;;  %v2718_v7 = vld [vmem:[#allocation2 + $0x123] sm:$0xff] }
 0x17e   : > { %v1493_v12 = vadd.f32 %v1349_v4, %v8343_v18  ;;  %v6682_v23 = vpop.f32.mrb[71].mxu1  ;;  %6967 = vmatmul.mubr.msk.f32.gmra.mrb[176].mxu1 %vm271_vm2, %v2149_v37  ;;  %7091 = vmatprep.mubr.msk.f32.mxu0 %vm7654_vm1, %v7653_v1  ;;  %v2157_v4 = vld [vmem:[#allocation2 + $0x12a] sm:$0xff] }
 0x17f   : > { %6969 = vmatprep.mubr.msk.f32.mxu1 %vm7654_vm1, %v7653_v1  ;;  %2095 = vst [vmem:[%s8185_s17 + $0x70] sm:$0xff] %v2054_v8 }
 0x180   : > { %v1911_v13 = vpop.f32.mrb[72].mxu0 }
 0x181   : > { %v1354_v10 = vpop.f32.mrb[72].mxu1  ;;  %v2055_v29 = vadd.f32 %v1911_v13, %v1493_v12  ;;  %v6807_v42 = vpop.f32.mrb[73].mxu0  ;;  %7092 = vmatmul.mubr.msk.f32.gmra.mrb[178].mxu0 %vm271_vm2, %v2711_v9  ;;  %v2158_v13 = vld [vmem:[#allocation2 + $0x132] sm:$0xff] }
 0x182   : > { %v1494_v18 = vadd.f32 %v1354_v10, %v8353_v22  ;;  %v6685_v14 = vpop.f32.mrb[73].mxu1  ;;  %6970 = vmatmul.mubr.msk.f32.gmra.mrb[178].mxu1 %vm271_vm2, %v2150_v40  ;;  %7094 = vmatprep.mubr.msk.f32.mxu0 %vm7654_vm1, %v7653_v1  ;;  %v1062_v10 = vld [vmem:[%s8185_s17 + $0xb8] sm:$0xff] }
 0x183   : > { %6972 = vmatprep.mubr.msk.f32.mxu1 %vm7654_vm1, %v7653_v1  ;;  %2096 = vst [vmem:[%s8185_s17 + $0x78] sm:$0xff] %v2055_v29 }
 0x184   : > { %v1916_v19 = vpop.f32.mrb[74].mxu0 }
 0x185   : > { %v1359_v16 = vpop.f32.mrb[74].mxu1  ;;  %v2056_v20 = vadd.f32 %v1916_v19, %v1494_v18  ;;  %v6810_v39 = vpop.f32.mrb[75].mxu0  ;;  %7095 = vmatmul.mubr.msk.f32.gmra.mrb[180].mxu0 %vm271_vm2, %v2712_v55  ;;  %v2719_v18 = vld [vmem:[#allocation2 + $0x12b] sm:$0xff]  ;;  %v1063_v19 = vld [vmem:[%s8185_s17 + $0xc0] sm:$0xff] }
 0x186   : > { %v1495_v22 = vadd.f32 %v1359_v16, %v8363_v27  ;;  %v6688_v44 = vpop.f32.mrb[75].mxu1  ;;  %6973 = vmatmul.mubr.msk.f32.gmra.mrb[180].mxu1 %vm271_vm2, %v2151_v15  ;;  %7097 = vmatprep.mubr.msk.f32.mxu0 %vm7654_vm1, %v7653_v1 }
 0x187   : > { %6975 = vmatprep.mubr.msk.f32.mxu1 %vm7654_vm1, %v7653_v1  ;;  %2097 = vst [vmem:[%s8185_s17 + $0x80] sm:$0xff] %v2056_v20  ;;  %v2720_v44 = vld [vmem:[#allocation2 + $0x133] sm:$0xff] }
 0x188   : > { %v1921_v62 = vpop.f32.mrb[76].mxu0 }
 0x189   : > { %v1364_v46 = vpop.f32.mrb[76].mxu1  ;;  %v2057_v26 = vadd.f32 %v1921_v62, %v1495_v22  ;;  %v6813_v28 = vpop.f32.mrb[77].mxu0  ;;  %7098 = vmatmul.mubr.msk.f32.gmra.mrb[182].mxu0 %vm271_vm2, %v2713_v24  ;;  %v2159_v22 = vld [vmem:[#allocation2 + $0x13a] sm:$0xff] }
 0x18a   : > { %v1496_v27 = vadd.f32 %v1364_v46, %v8373_v36  ;;  %v6691_v25 = vpop.f32.mrb[77].mxu1  ;;  %6976 = vmatmul.mubr.msk.f32.gmra.mrb[182].mxu1 %vm271_vm2, %v2152_v21  ;;  %7100 = vmatprep.mubr.msk.f32.mxu0 %vm7654_vm1, %v7653_v1 }
 0x18b   : > { %6978 = vmatprep.mubr.msk.f32.mxu1 %vm7654_vm1, %v7653_v1  ;;  %2098 = vst [vmem:[%s8185_s17 + $0x88] sm:$0xff] %v2057_v26  ;;  %v2160_v25 = vld [vmem:[#allocation2 + $0x142] sm:$0xff] }
 0x18c   : > { %v1926_v34 = vpop.f32.mrb[78].mxu0  ;;  %v2721_v26 = vld [vmem:[#allocation2 + $0x13b] sm:$0xff] }
 0x18d   : > { %v1369_v30 = vpop.f32.mrb[78].mxu1  ;;  %v2058_v5 = vadd.f32 %v1926_v34, %v1496_v27  ;;  %v6816_v50 = vpop.f32.mrb[79].mxu0  ;;  %7101 = vmatmul.mubr.msk.f32.gmra.mrb[184].mxu0 %vm271_vm2, %v2714_v48  ;;  %v1064_v27 = vld [vmem:[%s8185_s17 + $0xc8] sm:$0xff] }
 0x18e   : > { %v1497_v36 = vadd.f32 %v1369_v30, %v8383_v45  ;;  %v6694_v38 = vpop.f32.mrb[79].mxu1  ;;  %6979 = vmatmul.mubr.msk.f32.gmra.mrb[184].mxu1 %vm271_vm2, %v2153_v51  ;;  %7103 = vmatprep.mubr.msk.f32.mxu0 %vm7654_vm1, %v7653_v1  ;;  %v2722_v50 = vld [vmem:[#allocation2 + $0x143] sm:$0xff] }
 0x18f   : > { %6981 = vmatprep.mubr.msk.f32.mxu1 %vm7654_vm1, %v7653_v1  ;;  %2099 = vst [vmem:[%s8185_s17 + $0x90] sm:$0xff] %v2058_v5  ;;  %v1065_v38 = vld [vmem:[%s8185_s17 + $0xd0] sm:$0xff] }
 0x190   : > { %v1931_v47 = vpop.f32.mrb[80].mxu0  ;;  %v2161_v5 = vld [vmem:[#allocation2 + $0x14a] sm:$0xff] }
 0x191   : > { %v1374_v41 = vpop.f32.mrb[80].mxu1  ;;  %v2059_v49 = vadd.f32 %v1931_v47, %v1497_v36  ;;  %v6819_v33 = vpop.f32.mrb[81].mxu0  ;;  %7104 = vmatmul.mubr.msk.f32.gmra.mrb[186].mxu0 %vm271_vm2, %v2715_v59 }
 0x192   : > { %v1498_v45 = vadd.f32 %v1374_v41, %v8393_v53  ;;  %v6697_v52 = vpop.f32.mrb[81].mxu1  ;;  %6982 = vmatmul.mubr.msk.f32.gmra.mrb[186].mxu1 %vm271_vm2, %v2154_v31  ;;  %7106 = vmatprep.mubr.msk.f32.mxu0 %vm7654_vm1, %v7653_v1  ;;  %v2162_v33 = vld [vmem:[#allocation2 + $0x152] sm:$0xff] }
 0x193   : > { %6984 = vmatprep.mubr.msk.f32.mxu1 %vm7654_vm1, %v7653_v1  ;;  %2100 = vst [vmem:[%s8185_s17 + $0x98] sm:$0xff] %v2059_v49  ;;  %v1066_v49 = vld [vmem:[%s8185_s17 + $0xd8] sm:$0xff] }
 0x194   : > { %v1936_v53 = vpop.f32.mrb[82].mxu0 }
 0x195   : > { %v1379_v0 = vpop.f32.mrb[82].mxu1  ;;  %v2060_v54 = vadd.f32 %v1936_v53, %v1498_v45  ;;  %v6822_v60 = vpop.f32.mrb[83].mxu0  ;;  %7107 = vmatmul.mubr.msk.f32.gmra.mrb[188].mxu0 %vm271_vm2, %v2716_v57 }
 0x196   : > { %v6700_v58 = vpop.f32.mrb[83].mxu1  ;;  %6985 = vmatmul.mubr.msk.f32.gmra.mrb[188].mxu1 %vm271_vm2, %v2155_v11  ;;  %7109 = vmatprep.mubr.msk.f32.mxu0 %vm7654_vm1, %v7653_v1  ;;  %v1499_v17 = vadd.f32 %v1379_v0, %v1060_v35  ;;  %v2723_v11 = vld [vmem:[#allocation2 + $0x14b] sm:$0xff]  ;;  %v1067_v35 = vld [vmem:[%s8185_s17 + $0xe0] sm:$0xff] }
 0x197   : > { %6987 = vmatprep.mubr.msk.f32.mxu1 %vm7654_vm1, %v7653_v1  ;;  %2101 = vst [vmem:[%s8185_s17 + $0xa0] sm:$0xff] %v2060_v54 }
 0x198   : > { %v1941_v32 = vpop.f32.mrb[84].mxu0 }
 0x199   : > { %v1384_v6 = vpop.f32.mrb[84].mxu1  ;;  %v2061_v56 = vadd.f32 %v1941_v32, %v1499_v17  ;;  %v6825_v37 = vpop.f32.mrb[85].mxu0  ;;  %7110 = vmatmul.mubr.msk.f32.gmra.mrb[190].mxu0 %vm271_vm2, %v2717_v63  ;;  %v2724_v63 = vld [vmem:[#allocation2 + $0x153] sm:$0xff] }
 0x19a   : > { %v6703_v2 = vpop.f32.mrb[85].mxu1  ;;  %6988 = vmatmul.mubr.msk.f32.gmra.mrb[190].mxu1 %vm271_vm2, %v2156_v61  ;;  %7112 = vmatprep.mubr.msk.f32.mxu0 %vm7654_vm1, %v7653_v1  ;;  %v1500_v12 = vadd.f32 %v1384_v6, %v1061_v3  ;;  %v3246_v61 = vld [vmem:[#allocation2 + $0x14] sm:$0xff]  ;;  %v6041_v6 = vld [vmem:[%s9472_s2 + $0x1c] sm:$0xf] }
 0x19b   : > { %6990 = vmatprep.mubr.msk.f32.mxu1 %vm7654_vm1, %v7653_v1  ;;  %2102 = vst [vmem:[%s8185_s17 + $0xa8] sm:$0xff] %v2061_v56 }
 0x19c   : > { %v1946_v8 = vpop.f32.mrb[86].mxu0 }
 0x19d   : > { %v1389_v23 = vpop.f32.mrb[86].mxu1  ;;  %v2062_v40 = vadd.f32 %v1946_v8, %v1500_v12  ;;  %v6828_v9 = vpop.f32.mrb[87].mxu0  ;;  %7113 = vmatmul.mubr.msk.f32.gmra.mrb[192].mxu0 %vm271_vm2, %v2718_v7  ;;  %v3247_v7 = vld [vmem:[#allocation2 + $0x1c] sm:$0xff]  ;;  %v3248_v12 = vld [vmem:[#allocation2 + $0x24] sm:$0xff] }
 0x19e   : > { %v6706_v43 = vpop.f32.mrb[87].mxu1  ;;  %6991 = vmatmul.mubr.msk.f32.gmra.mrb[192].mxu1 %vm271_vm2, %v2157_v4  ;;  %7115 = vmatprep.mubr.msk.f32.mxu0 %vm7654_vm1, %v7653_v1  ;;  %v1501_v14 = vadd.f32 %v1389_v23, %v1062_v10  ;;  %v1068_v4 = vld [vmem:[%s8185_s17 + $0xe8] sm:$0xff]  ;;  %v6084_v8 = vld [vmem:[%s9472_s2 + $0x20] sm:$0xf] }
 0x19f   : > { %6993 = vmatprep.mubr.msk.f32.mxu1 %vm7654_vm1, %v7653_v1  ;;  %2103 = vst [vmem:[%s8185_s17 + $0xb0] sm:$0xff] %v2062_v40 }
 0x1a0   : > { %v1951_v42 = vpop.f32.mrb[88].mxu0 }
 0x1a1   : > { %v1394_v29 = vpop.f32.mrb[88].mxu1  ;;  %v2063_v55 = vadd.f32 %v1951_v42, %v1501_v14  ;;  %v6831_v16 = vpop.f32.mrb[89].mxu0  ;;  %7116 = vmatmul.mubr.msk.f32.gmra.mrb[194].mxu0 %vm271_vm2, %v2719_v18  ;;  %v1069_v18 = vld [vmem:[%s8185_s17 + $0xf0] sm:$0xff] }
 0x1a2   : > { %v6709_v15 = vpop.f32.mrb[89].mxu1  ;;  %6994 = vmatmul.mubr.msk.f32.gmra.mrb[194].mxu1 %vm271_vm2, %v2158_v13  ;;  %7118 = vmatprep.mubr.msk.f32.mxu0 %vm7654_vm1, %v7653_v1  ;;  %v1502_v20 = vadd.f32 %v1394_v29, %v1063_v19  ;;  %v3249_v14 = vld [vmem:[#allocation2 + $0x2c] sm:$0xff] }
 0x1a3   : > { %6996 = vmatprep.mubr.msk.f32.mxu1 %vm7654_vm1, %v7653_v1  ;;  %2104 = vst [vmem:[%s8185_s17 + $0xb8] sm:$0xff] %v2063_v55 }
 0x1a4   : > { %v1956_v21 = vpop.f32.mrb[90].mxu0 }
 0x1a5   : > { %v1399_v39 = vpop.f32.mrb[90].mxu1  ;;  %v2064_v46 = vadd.f32 %v1956_v21, %v1502_v20  ;;  %v6834_v62 = vpop.f32.mrb[91].mxu0  ;;  %7119 = vmatmul.mubr.msk.f32.gmra.mrb[196].mxu0 %vm271_vm2, %v2720_v44  ;;  %v3250_v44 = vld [vmem:[#allocation2 + $0x34] sm:$0xff] }
 0x1a6   : > { %v6712_v24 = vpop.f32.mrb[91].mxu1  ;;  %6997 = vmatmul.mubr.msk.f32.gmra.mrb[196].mxu1 %vm271_vm2, %v2159_v22  ;;  %7121 = vmatprep.mubr.msk.f32.mxu0 %vm7654_vm1, %v7653_v1  ;;  %v1503_v28 = vadd.f32 %v1399_v39, %v1064_v27  ;;  %v1070_v22 = vld [vmem:[%s8185_s17 + $0xf8] sm:$0xff]  ;;  %v1071_v27 = vld [vmem:[%s8185_s17 + $0x100] sm:$0xff] }
 0x1a7   : > { %6999 = vmatprep.mubr.msk.f32.mxu1 %vm7654_vm1, %v7653_v1  ;;  %2105 = vst [vmem:[%s8185_s17 + $0xc0] sm:$0xff] %v2064_v46 }
 0x1a8   : > { %v1961_v48 = vpop.f32.mrb[92].mxu0 }
 0x1a9   : > { %v1404_v51 = vpop.f32.mrb[92].mxu1  ;;  %v2065_v34 = vadd.f32 %v1961_v48, %v1503_v28  ;;  %v6837_v36 = vpop.f32.mrb[93].mxu0  ;;  %7122 = vmatmul.mubr.msk.f32.gmra.mrb[198].mxu0 %vm271_vm2, %v2721_v26 }
 0x1aa   : > { %v6715_v30 = vpop.f32.mrb[93].mxu1  ;;  %7000 = vmatmul.mubr.msk.f32.gmra.mrb[198].mxu1 %vm271_vm2, %v2160_v25  ;;  %7124 = vmatprep.mubr.msk.f32.mxu0 %vm7654_vm1, %v7653_v1  ;;  %v1504_v31 = vadd.f32 %v1404_v51, %v1065_v38  ;;  %v3251_v25 = vld [vmem:[#allocation2 + $0x3c] sm:$0xff]  ;;  %v1072_v36 = vld [vmem:[%s8185_s17 + $0x108] sm:$0xff] }
 0x1ab   : > { %7002 = vmatprep.mubr.msk.f32.mxu1 %vm7654_vm1, %v7653_v1  ;;  %2106 = vst [vmem:[%s8185_s17 + $0xc8] sm:$0xff] %v2065_v34  ;;  %v3252_v38 = vld [vmem:[#allocation2 + $0x44] sm:$0xff] }
 0x1ac   : > { %v1966_v41 = vpop.f32.mrb[94].mxu0 }
 0x1ad   : > { %v1409_v59 = vpop.f32.mrb[94].mxu1  ;;  %v2066_v45 = vadd.f32 %v1966_v41, %v1504_v31  ;;  %v6840_v52 = vpop.f32.mrb[95].mxu0  ;;  %7125 = vmatmul.mubr.msk.f32.gmra.mrb[200].mxu0 %vm271_vm2, %v2722_v50 }
 0x1ae   : > { %v6718_v47 = vpop.f32.mrb[95].mxu1  ;;  %7003 = vmatmul.mubr.msk.f32.gmra.mrb[200].mxu1 %vm271_vm2, %v2161_v5  ;;  %7127 = vmatprep.mubr.msk.f32.mxu0 %vm7654_vm1, %v7653_v1  ;;  %v1505_v57 = vadd.f32 %v1409_v59, %v1066_v49  ;;  %v3253_v52 = vld [vmem:[#allocation2 + $0x4c] sm:$0xff] }
 0x1af   : > { %7005 = vmatprep.mubr.msk.f32.mxu1 %vm7654_vm1, %v7653_v1  ;;  %2107 = vst [vmem:[%s8185_s17 + $0xd0] sm:$0xff] %v2066_v45  ;;  %v1073_v45 = vld [vmem:[%s8185_s17 + $0x110] sm:$0xff] }
 0x1b0   : > { %v1971_v53 = vpop.f32.mrb[96].mxu0 }
 0x1b1   : > { %v1414_v0 = vpop.f32.mrb[96].mxu1  ;;  %v2067_v54 = vadd.f32 %v1971_v53, %v1505_v57  ;;  %v6843_v60 = vpop.f32.mrb[97].mxu0  ;;  %7128 = vmatmul.mubr.msk.f32.gmra.mrb[202].mxu0 %vm271_vm2, %v2723_v11  ;;  %v316_v57 = vld [vmem:[%s7986_s12 + $0x18] sm:$0xff] }
 0x1b2   : > { %v6721_v58 = vpop.f32.mrb[97].mxu1  ;;  %7006 = vmatmul.mubr.msk.f32.gmra.mrb[202].mxu1 %vm271_vm2, %v2162_v33  ;;  %7130 = vmatprep.mubr.msk.f32.mxu0 %vm7654_vm1, %v7653_v1  ;;  %v1506_v17 = vadd.f32 %v1414_v0, %v1067_v35  ;;  %357 = vst.msk [vmem:[#allocation2 + $0x160] sm:$0xff] %vm271_vm2, %v316_v57  ;;  %v3254_v60 = vld [vmem:[#allocation2 + $0x54] sm:$0xff] }
 0x1b3   : > { %7135 = vmatprep.mubr.msk.f32.mxu1 %vm7654_vm1, %v7653_v1  ;;  %2108 = vst [vmem:[%s8185_s17 + $0xd8] sm:$0xff] %v2067_v54  ;;  %v1074_v54 = vld [vmem:[%s8185_s17 + $0x118] sm:$0xff] }
 0x1b4   : > { %v1976_v2 = vpop.f32.mrb[98].mxu0 }
 0x1b5   : > { %v1419_v32 = vpop.f32.mrb[98].mxu1  ;;  %v2068_v37 = vadd.f32 %v1976_v2, %v1506_v17  ;;  %v6846_v3 = vpop.f32.mrb[99].mxu0  ;;  %7131 = vmatmul.mubr.msk.f32.gmra.mrb[204].mxu0 %vm271_vm2, %v2724_v63  ;;  %v317_v17 = vld [vmem:[%s7986_s12 + $0x20] sm:$0xff] }
 0x1b6   : > { %v6724_v56 = vpop.f32.mrb[99].mxu1  ;;  %7136 = vmatmul.mubr.msk.f32.vlgmr.msra.gmra.mrb[204].mxu1 %vm271_vm2, %v3246_v61  ;;  %v1507_v23 = vadd.f32 %v1419_v32, %v1068_v4  ;;  %7260 = vmatprep.mubr.msk.f32.mxu0 %vm7654_vm1, %v7653_v1  ;;  %358 = vst.msk [vmem:[#allocation2 + $0x168] sm:$0xff] %vm271_vm2, %v317_v17 }
 0x1b7   : > { %7384 = vmatpush3.msk.msra.mxu1 %vm642_vm0, %v6041_v6  ;;  %7138 = vmatprep.mubr.msk.f32.mxu1 %vm7654_vm1, %v7653_v1  ;;  %2109 = vst [vmem:[%s8185_s17 + $0xe0] sm:$0xff] %v2068_v37  ;;  %v1075_v56 = vld [vmem:[%s8185_s17 + $0x120] sm:$0xff] }
 0x1b8   : > { %v1981_v40 = vpop.f32.mrb[100].mxu0  ;;  %v3255_v37 = vld [vmem:[#allocation2 + $0x5c] sm:$0xff] }
 0x1b9   : > { %v1424_v43 = vpop.f32.mrb[100].mxu1  ;;  %v2069_v10 = vadd.f32 %v1981_v40, %v1507_v23  ;;  %v6849_v13 = vpop.f32.mrb[101].mxu0  ;;  %7261 = vmatmul.mubr.msk.f32.vlgmr.msra.gmra.mrb[206].mxu0 %vm271_vm2, %v3248_v12  ;;  %v3256_v40 = vld [vmem:[#allocation2 + $0x64] sm:$0xff] }
 0x1ba   : > { %v6727_v9 = vpop.f32.mrb[101].mxu1  ;;  %7139 = vmatmul.mubr.msk.f32.gmra.mrb[206].mxu1 %vm271_vm2, %v3247_v7  ;;  %7509 = vmatpush3.msk.msra.mxu0 %vm642_vm0, %v6084_v8  ;;  %v1508_v29 = vadd.f32 %v1424_v43, %v1069_v18  ;;  %v1076_v43 = vld [vmem:[%s8185_s17 + $0x128] sm:$0xff] }
 0x1bb   : > { %7141 = vmatprep.mubr.msk.f32.mxu1 %vm7654_vm1, %v7653_v1  ;;  %2110 = vst [vmem:[%s8185_s17 + $0xe8] sm:$0xff] %v2069_v10  ;;  %7263 = vmatprep.mubr.msk.f32.mxu0 %vm7654_vm1, %v7653_v1 }
 0x1bc   : > { %v1986_v15 = vpop.f32.mrb[102].mxu0 }
 0x1bd   : > { %v1429_v42 = vpop.f32.mrb[102].mxu1  ;;  %v2070_v16 = vadd.f32 %v1986_v15, %v1508_v29  ;;  %v6852_v19 = vpop.f32.mrb[103].mxu0  ;;  %7264 = vmatmul.mubr.msk.f32.gmra.mrb[208].mxu0 %vm271_vm2, %v3249_v14  ;;  %v3257_v15 = vld [vmem:[#allocation2 + $0x6c] sm:$0xff] }
 0x1be   : > { %v6730_v55 = vpop.f32.mrb[103].mxu1  ;;  %7142 = vmatmul.mubr.msk.f32.gmra.mrb[208].mxu1 %vm271_vm2, %v3248_v12  ;;  %7266 = vmatprep.mubr.msk.f32.mxu0 %vm7654_vm1, %v7653_v1  ;;  %v1509_v20 = vadd.f32 %v1429_v42, %v1070_v22  ;;  %v1077_v42 = vld [vmem:[%s8185_s17 + $0x130] sm:$0xff] }
 0x1bf   : > { %7144 = vmatprep.mubr.msk.f32.mxu1 %vm7654_vm1, %v7653_v1  ;;  %2111 = vst [vmem:[%s8185_s17 + $0xf0] sm:$0xff] %v2070_v16 }
 0x1c0   : > { %v1991_v21 = vpop.f32.mrb[104].mxu0 }
 0x1c1   : > { %v1434_v39 = vpop.f32.mrb[104].mxu1  ;;  %v2071_v46 = vadd.f32 %v1991_v21, %v1509_v20  ;;  %v6855_v62 = vpop.f32.mrb[105].mxu0  ;;  %7267 = vmatmul.mubr.msk.f32.gmra.mrb[210].mxu0 %vm271_vm2, %v3250_v44  ;;  %v3258_v21 = vld [vmem:[#allocation2 + $0x74] sm:$0xff] }
 0x1c2   : > { %v6733_v24 = vpop.f32.mrb[105].mxu1  ;;  %7145 = vmatmul.mubr.msk.f32.gmra.mrb[210].mxu1 %vm271_vm2, %v3249_v14  ;;  %7269 = vmatprep.mubr.msk.f32.mxu0 %vm7654_vm1, %v7653_v1  ;;  %v1510_v26 = vadd.f32 %v1434_v39, %v1071_v27  ;;  %v1078_v39 = vld [vmem:[%s8185_s17 + $0x138] sm:$0xff] }
 0x1c3   : > { %7147 = vmatprep.mubr.msk.f32.mxu1 %vm7654_vm1, %v7653_v1  ;;  %2112 = vst [vmem:[%s8185_s17 + $0xf8] sm:$0xff] %v2071_v46 }
 0x1c4   : > { %v1996_v51 = vpop.f32.mrb[106].mxu0 }
 0x1c5   : > { %v1439_v28 = vpop.f32.mrb[106].mxu1  ;;  %v2072_v30 = vadd.f32 %v1996_v51, %v1510_v26  ;;  %v6858_v34 = vpop.f32.mrb[107].mxu0  ;;  %7270 = vmatmul.mubr.msk.f32.gmra.mrb[212].mxu0 %vm271_vm2, %v3251_v25  ;;  %v3259_v51 = vld [vmem:[#allocation2 + $0x7c] sm:$0xff] }
 0x1c6   : > { %v6736_v48 = vpop.f32.mrb[107].mxu1  ;;  %7148 = vmatmul.mubr.msk.f32.gmra.mrb[212].mxu1 %vm271_vm2, %v3250_v44  ;;  %7272 = vmatprep.mubr.msk.f32.mxu0 %vm7654_vm1, %v7653_v1  ;;  %v1511_v5 = vadd.f32 %v1439_v28, %v1072_v36  ;;  %v1079_v28 = vld [vmem:[%s8185_s17 + $0x140] sm:$0xff] }
 0x1c7   : > { %7150 = vmatprep.mubr.msk.f32.mxu1 %vm7654_vm1, %v7653_v1  ;;  %2113 = vst [vmem:[%s8185_s17 + $0x100] sm:$0xff] %v2072_v30 }
 0x1c8   : > { %v2001_v31 = vpop.f32.mrb[108].mxu0 }
 0x1c9   : > { %v1444_v50 = vpop.f32.mrb[108].mxu1  ;;  %v2073_v41 = vadd.f32 %v2001_v31, %v1511_v5  ;;  %v6861_v47 = vpop.f32.mrb[109].mxu0  ;;  %7273 = vmatmul.mubr.msk.f32.gmra.mrb[214].mxu0 %vm271_vm2, %v3252_v38  ;;  %v3260_v31 = vld [vmem:[#allocation2 + $0x84] sm:$0xff] }
 0x1ca   : > { %v6739_v59 = vpop.f32.mrb[109].mxu1  ;;  %7151 = vmatmul.mubr.msk.f32.gmra.mrb[214].mxu1 %vm271_vm2, %v3251_v25  ;;  %7275 = vmatprep.mubr.msk.f32.mxu0 %vm7654_vm1, %v7653_v1  ;;  %v1512_v49 = vadd.f32 %v1444_v50, %v1073_v45  ;;  %v2163_v50 = vld [vmem:[%s8185_s17] sm:$0xff] }
 0x1cb   : > { %7153 = vmatprep.mubr.msk.f32.mxu1 %vm7654_vm1, %v7653_v1  ;;  %2114 = vst [vmem:[%s8185_s17 + $0x108] sm:$0xff] %v2073_v41 }
 0x1cc   : > { %v2006_v11 = vpop.f32.mrb[110].mxu0 }
 0x1cd   : > { %v1449_v33 = vpop.f32.mrb[110].mxu1  ;;  %v2074_v53 = vadd.f32 %v2006_v11, %v1512_v49  ;;  %v6864_v58 = vpop.f32.mrb[111].mxu0  ;;  %7276 = vmatmul.mubr.msk.f32.gmra.mrb[216].mxu0 %vm271_vm2, %v3253_v52  ;;  %v3261_v11 = vld [vmem:[#allocation2 + $0x8c] sm:$0xff] }
 0x1ce   : > { %v6742_v0 = vpop.f32.mrb[111].mxu1  ;;  %7154 = vmatmul.mubr.msk.f32.gmra.mrb[216].mxu1 %vm271_vm2, %v3252_v38  ;;  %7278 = vmatprep.mubr.msk.f32.mxu0 %vm7654_vm1, %v7653_v1  ;;  %v1513_v35 = vadd.f32 %v1449_v33, %v1074_v54  ;;  %v2164_v33 = vld [vmem:[%s8185_s17 + $0x8] sm:$0xff] }
 0x1cf   : > { %7156 = vmatprep.mubr.msk.f32.mxu1 %vm7654_vm1, %v7653_v1  ;;  %2115 = vst [vmem:[%s8185_s17 + $0x110] sm:$0xff] %v2074_v53 }
 0x1d0   : > { %v2011_v63 = vpop.f32.mrb[112].mxu0 }
 0x1d1   : > { %v1454_v61 = vpop.f32.mrb[112].mxu1  ;;  %v2075_v32 = vadd.f32 %v2011_v63, %v1513_v35  ;;  %v6867_v2 = vpop.f32.mrb[113].mxu0  ;;  %7279 = vmatmul.mubr.msk.f32.gmra.mrb[218].mxu0 %vm271_vm2, %v3254_v60  ;;  %v2165_v35 = vld [vmem:[%s8185_s17 + $0x10] sm:$0xff] }
 0x1d2   : > { %v6745_v6 = vpop.f32.mrb[113].mxu1  ;;  %7157 = vmatmul.mubr.msk.f32.gmra.mrb[218].mxu1 %vm271_vm2, %v3253_v52  ;;  %7281 = vmatprep.mubr.msk.f32.mxu0 %vm7654_vm1, %v7653_v1  ;;  %v1514_v3 = vadd.f32 %v1454_v61, %v1075_v56  ;;  %v3262_v61 = vld [vmem:[#allocation2 + $0x94] sm:$0xff] }
 0x1d3   : > { %7159 = vmatprep.mubr.msk.f32.mxu1 %vm7654_vm1, %v7653_v1  ;;  %2116 = vst [vmem:[%s8185_s17 + $0x118] sm:$0xff] %v2075_v32 }
 0x1d4   : > { %v2016_v7 = vpop.f32.mrb[114].mxu0 }
 0x1d5   : > { %v1459_v4 = vpop.f32.mrb[114].mxu1  ;;  %v2076_v23 = vadd.f32 %v2016_v7, %v1514_v3  ;;  %v6870_v8 = vpop.f32.mrb[115].mxu0  ;;  %7282 = vmatmul.mubr.msk.f32.gmra.mrb[220].mxu0 %vm271_vm2, %v3255_v37  ;;  %v3263_v3 = vld [vmem:[#allocation2 + $0x9c] sm:$0xff] }
 0x1d6   : > { %v6748_v12 = vpop.f32.mrb[115].mxu1  ;;  %7160 = vmatmul.mubr.msk.f32.gmra.mrb[220].mxu1 %vm271_vm2, %v3254_v60  ;;  %7284 = vmatprep.mubr.msk.f32.mxu0 %vm7654_vm1, %v7653_v1  ;;  %v1515_v9 = vadd.f32 %v1459_v4, %v1076_v43 }
 0x1d7   : > { %7162 = vmatprep.mubr.msk.f32.mxu1 %vm7654_vm1, %v7653_v1  ;;  %2117 = vst [vmem:[%s8185_s17 + $0x120] sm:$0xff] %v2076_v23 }
 0x1d8   : > { %v2021_v13 = vpop.f32.mrb[116].mxu0 }
 0x1d9   : > { %v1464_v10 = vpop.f32.mrb[116].mxu1  ;;  %v2077_v14 = vadd.f32 %v2021_v13, %v1515_v9  ;;  %v6873_v29 = vpop.f32.mrb[117].mxu0  ;;  %7285 = vmatmul.mubr.msk.f32.gmra.mrb[222].mxu0 %vm271_vm2, %v3256_v40  ;;  %v3264_v9 = vld [vmem:[#allocation2 + $0xa4] sm:$0xff] }
 0x1da   : > { %v6751_v18 = vpop.f32.mrb[117].mxu1  ;;  %7163 = vmatmul.mubr.msk.f32.gmra.mrb[222].mxu1 %vm271_vm2, %v3255_v37  ;;  %7287 = vmatprep.mubr.msk.f32.mxu0 %vm7654_vm1, %v7653_v1  ;;  %v1516_v55 = vadd.f32 %v1464_v10, %v1077_v42  ;;  %v2166_v37 = vld [vmem:[%s8185_s17 + $0x18] sm:$0xff] }
 0x1db   : > { %7165 = vmatprep.mubr.msk.f32.mxu1 %vm7654_vm1, %v7653_v1  ;;  %2118 = vst [vmem:[%s8185_s17 + $0x128] sm:$0xff] %v2077_v14 }
 0x1dc   : > { %v2026_v19 = vpop.f32.mrb[118].mxu0 }
 0x1dd   : > { %v1469_v16 = vpop.f32.mrb[118].mxu1  ;;  %v2078_v44 = vadd.f32 %v2026_v19, %v1516_v55  ;;  %v6876_v20 = vpop.f32.mrb[119].mxu0  ;;  %7288 = vmatmul.mubr.msk.f32.gmra.mrb[224].mxu0 %vm271_vm2, %v3257_v15  ;;  %v3265_v55 = vld [vmem:[#allocation2 + $0xac] sm:$0xff] }
 0x1de   : > { %v6754_v22 = vpop.f32.mrb[119].mxu1  ;;  %7166 = vmatmul.mubr.msk.f32.gmra.mrb[224].mxu1 %vm271_vm2, %v3256_v40  ;;  %7290 = vmatprep.mubr.msk.f32.mxu0 %vm7654_vm1, %v7653_v1  ;;  %v1517_v24 = vadd.f32 %v1469_v16, %v1078_v39  ;;  %v2167_v40 = vld [vmem:[%s8185_s17 + $0x20] sm:$0xff] }
 0x1df   : > { %7168 = vmatprep.mubr.msk.f32.mxu1 %vm7654_vm1, %v7653_v1  ;;  %2119 = vst [vmem:[%s8185_s17 + $0x130] sm:$0xff] %v2078_v44 }
 0x1e0   : > { %v2031_v62 = vpop.f32.mrb[120].mxu0 }
 0x1e1   : > { %v1474_v46 = vpop.f32.mrb[120].mxu1  ;;  %v2079_v25 = vadd.f32 %v2031_v62, %v1517_v24  ;;  %v6879_v26 = vpop.f32.mrb[121].mxu0  ;;  %7291 = vmatmul.mubr.msk.f32.gmra.mrb[226].mxu0 %vm271_vm2, %v3258_v21  ;;  %v3266_v24 = vld [vmem:[#allocation2 + $0xb4] sm:$0xff] }
 0x1e2   : > { %v6757_v27 = vpop.f32.mrb[121].mxu1  ;;  %7169 = vmatmul.mubr.msk.f32.gmra.mrb[226].mxu1 %vm271_vm2, %v3257_v15  ;;  %7293 = vmatprep.mubr.msk.f32.mxu0 %vm7654_vm1, %v7653_v1  ;;  %v1518_v48 = vadd.f32 %v1474_v46, %v1079_v28  ;;  %v2168_v15 = vld [vmem:[%s8185_s17 + $0x28] sm:$0xff] }
 0x1e3   : > { %7171 = vmatprep.mubr.msk.f32.mxu1 %vm7654_vm1, %v7653_v1  ;;  %2120 = vst [vmem:[%s8185_s17 + $0x138] sm:$0xff] %v2079_v25 }
 0x1e4   : > { %v2036_v34 = vpop.f32.mrb[122].mxu0 }
 0x1e5   : > { %v2398_v30 = vpop.f32.mrb[122].mxu1  ;;  %v2080_v38 = vadd.f32 %v2036_v34, %v1518_v48  ;;  %v6882_v5 = vpop.f32.mrb[123].mxu0  ;;  %7294 = vmatmul.mubr.msk.f32.gmra.mrb[228].mxu0 %vm271_vm2, %v3259_v51  ;;  %v3267_v48 = vld [vmem:[#allocation2 + $0xbc] sm:$0xff] }
 0x1e6   : > { %v6887_v36 = vpop.f32.mrb[123].mxu1  ;;  %7172 = vmatmul.mubr.msk.f32.gmra.mrb[228].mxu1 %vm271_vm2, %v3258_v21  ;;  %7296 = vmatprep.mubr.msk.f32.mxu0 %vm7654_vm1, %v7653_v1  ;;  %v2602_v59 = vadd.f32 %v2398_v30, %v2163_v50  ;;  %v2169_v21 = vld [vmem:[%s8185_s17 + $0x30] sm:$0xff] }
 0x1e7   : > { %7174 = vmatprep.mubr.msk.f32.mxu1 %vm7654_vm1, %v7653_v1  ;;  %2121 = vst [vmem:[%s8185_s17 + $0x140] sm:$0xff] %v2080_v38 }
 0x1e8   : > { %v2960_v47 = vpop.f32.mrb[124].mxu0 }
 0x1e9   : > { %v2403_v41 = vpop.f32.mrb[124].mxu1  ;;  %v3164_v52 = vadd.f32 %v2960_v47, %v2602_v59  ;;  %v7012_v49 = vpop.f32.mrb[125].mxu0  ;;  %7297 = vmatmul.mubr.msk.f32.gmra.mrb[230].mxu0 %vm271_vm2, %v3260_v31  ;;  %v3268_v59 = vld [vmem:[#allocation2 + $0xc4] sm:$0xff] }
 0x1ea   : > { %v6890_v45 = vpop.f32.mrb[125].mxu1  ;;  %7175 = vmatmul.mubr.msk.f32.gmra.mrb[230].mxu1 %vm271_vm2, %v3259_v51  ;;  %7299 = vmatprep.mubr.msk.f32.mxu0 %vm7654_vm1, %v7653_v1  ;;  %v2603_v57 = vadd.f32 %v2403_v41, %v2164_v33  ;;  %v2170_v51 = vld [vmem:[%s8185_s17 + $0x38] sm:$0xff] }
 0x1eb   : > { %7177 = vmatprep.mubr.msk.f32.mxu1 %vm7654_vm1, %v7653_v1  ;;  %3205 = vst [vmem:[%s8185_s17] sm:$0xff] %v3164_v52 }
 0x1ec   : > { %v2965_v53 = vpop.f32.mrb[126].mxu0 }
 0x1ed   : > { %v2408_v0 = vpop.f32.mrb[126].mxu1  ;;  %v3165_v54 = vadd.f32 %v2965_v53, %v2603_v57  ;;  %v7015_v60 = vpop.f32.mrb[127].mxu0  ;;  %7300 = vmatmul.mubr.msk.f32.gmra.mrb[232].mxu0 %vm271_vm2, %v3261_v11  ;;  %v3269_v57 = vld [vmem:[#allocation2 + $0xcc] sm:$0xff] }
 0x1ee   : > { %v6893_v58 = vpop.f32.mrb[127].mxu1  ;;  %7178 = vmatmul.mubr.msk.f32.gmra.mrb[232].mxu1 %vm271_vm2, %v3260_v31  ;;  %7302 = vmatprep.mubr.msk.f32.mxu0 %vm7654_vm1, %v7653_v1  ;;  %v2604_v63 = vadd.f32 %v2408_v0, %v2165_v35  ;;  %v2171_v31 = vld [vmem:[%s8185_s17 + $0x40] sm:$0xff] }
 0x1ef   : > { %7180 = vmatprep.mubr.msk.f32.mxu1 %vm7654_vm1, %v7653_v1  ;;  %3206 = vst [vmem:[%s8185_s17 + $0x8] sm:$0xff] %v3165_v54 }
 0x1f0   : > { %v2970_v6 = vpop.f32.mrb[128].mxu0 }
 0x1f1   : > { %v2413_v17 = vpop.f32.mrb[128].mxu1  ;;  %v3166_v2 = vadd.f32 %v2970_v6, %v2604_v63  ;;  %v7018_v56 = vpop.f32.mrb[129].mxu0  ;;  %7303 = vmatmul.mubr.msk.f32.gmra.mrb[234].mxu0 %vm271_vm2, %v3262_v61  ;;  %v3270_v63 = vld [vmem:[#allocation2 + $0xd4] sm:$0xff] }
 0x1f2   : > { %v6896_v32 = vpop.f32.mrb[129].mxu1  ;;  %7181 = vmatmul.mubr.msk.f32.gmra.mrb[234].mxu1 %vm271_vm2, %v3261_v11  ;;  %7305 = vmatprep.mubr.msk.f32.mxu0 %vm7654_vm1, %v7653_v1  ;;  %v2605_v4 = vadd.f32 %v2413_v17, %v2166_v37  ;;  %v2172_v11 = vld [vmem:[%s8185_s17 + $0x48] sm:$0xff] }
 0x1f3   : > { %7183 = vmatprep.mubr.msk.f32.mxu1 %vm7654_vm1, %v7653_v1  ;;  %3207 = vst [vmem:[%s8185_s17 + $0x10] sm:$0xff] %v3166_v2 }
 0x1f4   : > { %v2975_v12 = vpop.f32.mrb[130].mxu0 }
 0x1f5   : > { %v2418_v7 = vpop.f32.mrb[130].mxu1  ;;  %v3167_v8 = vadd.f32 %v2975_v12, %v2605_v4  ;;  %v7021_v43 = vpop.f32.mrb[131].mxu0  ;;  %7306 = vmatmul.mubr.msk.f32.gmra.mrb[236].mxu0 %vm271_vm2, %v3263_v3  ;;  %v3271_v4 = vld [vmem:[#allocation2 + $0xdc] sm:$0xff] }
 0x1f6   : > { %v6899_v23 = vpop.f32.mrb[131].mxu1  ;;  %7184 = vmatmul.mubr.msk.f32.gmra.mrb[236].mxu1 %vm271_vm2, %v3262_v61  ;;  %7308 = vmatprep.mubr.msk.f32.mxu0 %vm7654_vm1, %v7653_v1  ;;  %v2606_v10 = vadd.f32 %v2418_v7, %v2167_v40  ;;  %v2173_v61 = vld [vmem:[%s8185_s17 + $0x50] sm:$0xff] }
 0x1f7   : > { %7186 = vmatprep.mubr.msk.f32.mxu1 %vm7654_vm1, %v7653_v1  ;;  %3208 = vst [vmem:[%s8185_s17 + $0x18] sm:$0xff] %v3167_v8 }
 0x1f8   : > { %v2980_v18 = vpop.f32.mrb[132].mxu0 }
 0x1f9   : > { %v2423_v13 = vpop.f32.mrb[132].mxu1  ;;  %v3168_v29 = vadd.f32 %v2980_v18, %v2606_v10  ;;  %v7024_v42 = vpop.f32.mrb[133].mxu0  ;;  %7309 = vmatmul.mubr.msk.f32.gmra.mrb[238].mxu0 %vm271_vm2, %v3264_v9  ;;  %v3272_v10 = vld [vmem:[#allocation2 + $0xe4] sm:$0xff] }
 0x1fa   : > { %v6902_v14 = vpop.f32.mrb[133].mxu1  ;;  %7187 = vmatmul.mubr.msk.f32.gmra.mrb[238].mxu1 %vm271_vm2, %v3263_v3  ;;  %7311 = vmatprep.mubr.msk.f32.mxu0 %vm7654_vm1, %v7653_v1  ;;  %v2607_v16 = vadd.f32 %v2423_v13, %v2168_v15  ;;  %v2174_v3 = vld [vmem:[%s8185_s17 + $0x58] sm:$0xff] }
 0x1fb   : > { %7189 = vmatprep.mubr.msk.f32.mxu1 %vm7654_vm1, %v7653_v1  ;;  %3209 = vst [vmem:[%s8185_s17 + $0x20] sm:$0xff] %v3168_v29 }
 0x1fc   : > { %v2985_v22 = vpop.f32.mrb[134].mxu0 }
 0x1fd   : > { %v2428_v19 = vpop.f32.mrb[134].mxu1  ;;  %v3169_v20 = vadd.f32 %v2985_v22, %v2607_v16  ;;  %v7027_v39 = vpop.f32.mrb[135].mxu0  ;;  %7312 = vmatmul.mubr.msk.f32.gmra.mrb[240].mxu0 %vm271_vm2, %v3265_v55  ;;  %v3273_v16 = vld [vmem:[#allocation2 + $0xec] sm:$0xff] }
 0x1fe   : > { %v6905_v44 = vpop.f32.mrb[135].mxu1  ;;  %7190 = vmatmul.mubr.msk.f32.gmra.mrb[240].mxu1 %vm271_vm2, %v3264_v9  ;;  %7314 = vmatprep.mubr.msk.f32.mxu0 %vm7654_vm1, %v7653_v1  ;;  %v2608_v46 = vadd.f32 %v2428_v19, %v2169_v21  ;;  %v2175_v9 = vld [vmem:[%s8185_s17 + $0x60] sm:$0xff] }
 0x1ff   : > { %7192 = vmatprep.mubr.msk.f32.mxu1 %vm7654_vm1, %v7653_v1  ;;  %3210 = vst [vmem:[%s8185_s17 + $0x28] sm:$0xff] %v3169_v20 }
 0x200   : > { %v2990_v27 = vpop.f32.mrb[136].mxu0 }
 0x201   : > { %v2433_v62 = vpop.f32.mrb[136].mxu1  ;;  %v3170_v26 = vadd.f32 %v2990_v27, %v2608_v46  ;;  %v7030_v28 = vpop.f32.mrb[137].mxu0  ;;  %7315 = vmatmul.mubr.msk.f32.gmra.mrb[242].mxu0 %vm271_vm2, %v3266_v24  ;;  %v3274_v46 = vld [vmem:[#allocation2 + $0xf4] sm:$0xff] }
 0x202   : > { %v6908_v25 = vpop.f32.mrb[137].mxu1  ;;  %7193 = vmatmul.mubr.msk.f32.gmra.mrb[242].mxu1 %vm271_vm2, %v3265_v55  ;;  %7317 = vmatprep.mubr.msk.f32.mxu0 %vm7654_vm1, %v7653_v1  ;;  %v2609_v30 = vadd.f32 %v2433_v62, %v2170_v51  ;;  %v2176_v55 = vld [vmem:[%s8185_s17 + $0x68] sm:$0xff] }
 0x203   : > { %7195 = vmatprep.mubr.msk.f32.mxu1 %vm7654_vm1, %v7653_v1  ;;  %3211 = vst [vmem:[%s8185_s17 + $0x30] sm:$0xff] %v3170_v26 }
 0x204   : > { %v2995_v36 = vpop.f32.mrb[138].mxu0 }
 0x205   : > { %v2438_v34 = vpop.f32.mrb[138].mxu1  ;;  %v3171_v5 = vadd.f32 %v2995_v36, %v2609_v30  ;;  %v7033_v50 = vpop.f32.mrb[139].mxu0  ;;  %7318 = vmatmul.mubr.msk.f32.gmra.mrb[244].mxu0 %vm271_vm2, %v3267_v48  ;;  %v3275_v30 = vld [vmem:[#allocation2 + $0xfc] sm:$0xff] }
 0x206   : > { %v6911_v38 = vpop.f32.mrb[139].mxu1  ;;  %7196 = vmatmul.mubr.msk.f32.gmra.mrb[244].mxu1 %vm271_vm2, %v3266_v24  ;;  %7320 = vmatprep.mubr.msk.f32.mxu0 %vm7654_vm1, %v7653_v1  ;;  %v2610_v41 = vadd.f32 %v2438_v34, %v2171_v31  ;;  %v2177_v24 = vld [vmem:[%s8185_s17 + $0x70] sm:$0xff] }
 0x207   : > { %7198 = vmatprep.mubr.msk.f32.mxu1 %vm7654_vm1, %v7653_v1  ;;  %3212 = vst [vmem:[%s8185_s17 + $0x38] sm:$0xff] %v3171_v5 }
 0x208   : > { %v3000_v45 = vpop.f32.mrb[140].mxu0 }
 0x209   : > { %v2443_v47 = vpop.f32.mrb[140].mxu1  ;;  %v3172_v49 = vadd.f32 %v3000_v45, %v2610_v41  ;;  %v7036_v33 = vpop.f32.mrb[141].mxu0  ;;  %7321 = vmatmul.mubr.msk.f32.gmra.mrb[246].mxu0 %vm271_vm2, %v3268_v59  ;;  %v3276_v41 = vld [vmem:[#allocation2 + $0x104] sm:$0xff] }
 0x20a   : > { %v6914_v52 = vpop.f32.mrb[141].mxu1  ;;  %7199 = vmatmul.mubr.msk.f32.gmra.mrb[246].mxu1 %vm271_vm2, %v3267_v48  ;;  %7323 = vmatprep.mubr.msk.f32.mxu0 %vm7654_vm1, %v7653_v1  ;;  %v2611_v0 = vadd.f32 %v2443_v47, %v2172_v11  ;;  %v2178_v48 = vld [vmem:[%s8185_s17 + $0x78] sm:$0xff] }
 0x20b   : > { %7201 = vmatprep.mubr.msk.f32.mxu1 %vm7654_vm1, %v7653_v1  ;;  %3213 = vst [vmem:[%s8185_s17 + $0x40] sm:$0xff] %v3172_v49 }
 0x20c   : > { %v3005_v58 = vpop.f32.mrb[142].mxu0 }
 0x20d   : > { %v2448_v53 = vpop.f32.mrb[142].mxu1  ;;  %v3173_v60 = vadd.f32 %v3005_v58, %v2611_v0  ;;  %v7039_v35 = vpop.f32.mrb[143].mxu0  ;;  %7324 = vmatmul.mubr.msk.f32.gmra.mrb[248].mxu0 %vm271_vm2, %v3269_v57  ;;  %v3277_v0 = vld [vmem:[#allocation2 + $0x10c] sm:$0xff] }
 0x20e   : > { %v6917_v54 = vpop.f32.mrb[143].mxu1  ;;  %7202 = vmatmul.mubr.msk.f32.gmra.mrb[248].mxu1 %vm271_vm2, %v3268_v59  ;;  %7326 = vmatprep.mubr.msk.f32.mxu0 %vm7654_vm1, %v7653_v1  ;;  %v2612_v17 = vadd.f32 %v2448_v53, %v2173_v61  ;;  %v2179_v59 = vld [vmem:[%s8185_s17 + $0x80] sm:$0xff] }
 0x20f   : > { %7204 = vmatprep.mubr.msk.f32.mxu1 %vm7654_vm1, %v7653_v1  ;;  %3214 = vst [vmem:[%s8185_s17 + $0x48] sm:$0xff] %v3173_v60 }
 0x210   : > { %v3010_v32 = vpop.f32.mrb[144].mxu0 }
 0x211   : > { %v2453_v6 = vpop.f32.mrb[144].mxu1  ;;  %v3174_v56 = vadd.f32 %v3010_v32, %v2612_v17  ;;  %v7042_v37 = vpop.f32.mrb[145].mxu0  ;;  %7327 = vmatmul.mubr.msk.f32.gmra.mrb[250].mxu0 %vm271_vm2, %v3270_v63  ;;  %v3278_v17 = vld [vmem:[#allocation2 + $0x114] sm:$0xff] }
 0x212   : > { %v6920_v2 = vpop.f32.mrb[145].mxu1  ;;  %7205 = vmatmul.mubr.msk.f32.gmra.mrb[250].mxu1 %vm271_vm2, %v3269_v57  ;;  %7329 = vmatprep.mubr.msk.f32.mxu0 %vm7654_vm1, %v7653_v1  ;;  %v2613_v7 = vadd.f32 %v2453_v6, %v2174_v3  ;;  %v2180_v57 = vld [vmem:[%s8185_s17 + $0x88] sm:$0xff] }
 0x213   : > { %7207 = vmatprep.mubr.msk.f32.mxu1 %vm7654_vm1, %v7653_v1  ;;  %3215 = vst [vmem:[%s8185_s17 + $0x50] sm:$0xff] %v3174_v56 }
 0x214   : > { %v3015_v23 = vpop.f32.mrb[146].mxu0 }
 0x215   : > { %v2458_v12 = vpop.f32.mrb[146].mxu1  ;;  %v3175_v43 = vadd.f32 %v3015_v23, %v2613_v7  ;;  %v7045_v40 = vpop.f32.mrb[147].mxu0  ;;  %7330 = vmatmul.mubr.msk.f32.gmra.mrb[252].mxu0 %vm271_vm2, %v3271_v4  ;;  %v3279_v7 = vld [vmem:[#allocation2 + $0x11c] sm:$0xff] }
 0x216   : > { %v6923_v8 = vpop.f32.mrb[147].mxu1  ;;  %7208 = vmatmul.mubr.msk.f32.gmra.mrb[252].mxu1 %vm271_vm2, %v3270_v63  ;;  %7332 = vmatprep.mubr.msk.f32.mxu0 %vm7654_vm1, %v7653_v1  ;;  %v2614_v13 = vadd.f32 %v2458_v12, %v2175_v9  ;;  %v2181_v63 = vld [vmem:[%s8185_s17 + $0x90] sm:$0xff] }
 0x217   : > { %7210 = vmatprep.mubr.msk.f32.mxu1 %vm7654_vm1, %v7653_v1  ;;  %3216 = vst [vmem:[%s8185_s17 + $0x58] sm:$0xff] %v3175_v43 }
 0x218   : > { %v3020_v14 = vpop.f32.mrb[148].mxu0 }
 0x219   : > { %v2463_v18 = vpop.f32.mrb[148].mxu1  ;;  %v3176_v42 = vadd.f32 %v3020_v14, %v2614_v13  ;;  %v7048_v15 = vpop.f32.mrb[149].mxu0  ;;  %7333 = vmatmul.mubr.msk.f32.gmra.mrb[254].mxu0 %vm271_vm2, %v3272_v10  ;;  %v3280_v13 = vld [vmem:[#allocation2 + $0x124] sm:$0xff] }
 0x21a   : > { %v6926_v29 = vpop.f32.mrb[149].mxu1  ;;  %7211 = vmatmul.mubr.msk.f32.gmra.mrb[254].mxu1 %vm271_vm2, %v3271_v4  ;;  %7335 = vmatprep.mubr.msk.f32.mxu0 %vm7654_vm1, %v7653_v1  ;;  %v2615_v19 = vadd.f32 %v2463_v18, %v2176_v55  ;;  %v2182_v4 = vld [vmem:[%s8185_s17 + $0x98] sm:$0xff] }
 0x21b   : > { %7213 = vmatprep.mubr.msk.f32.mxu1 %vm7654_vm1, %v7653_v1  ;;  %3217 = vst [vmem:[%s8185_s17 + $0x60] sm:$0xff] %v3176_v42 }
 0x21c   : > { %v3025_v44 = vpop.f32.mrb[150].mxu0 }
 0x21d   : > { %v2468_v22 = vpop.f32.mrb[150].mxu1  ;;  %v3177_v39 = vadd.f32 %v3025_v44, %v2615_v19  ;;  %v7051_v21 = vpop.f32.mrb[151].mxu0  ;;  %7336 = vmatmul.mubr.msk.f32.gmra.mrb[0].mxu0 %vm271_vm2, %v3273_v16  ;;  %v3281_v19 = vld [vmem:[#allocation2 + $0x12c] sm:$0xff] }
 0x21e   : > { %v6929_v20 = vpop.f32.mrb[151].mxu1  ;;  %7214 = vmatmul.mubr.msk.f32.gmra.mrb[0].mxu1 %vm271_vm2, %v3272_v10  ;;  %7338 = vmatprep.mubr.msk.f32.mxu0 %vm7654_vm1, %v7653_v1  ;;  %v2616_v62 = vadd.f32 %v2468_v22, %v2177_v24  ;;  %v2183_v10 = vld [vmem:[%s8185_s17 + $0xa0] sm:$0xff] }
 0x21f   : > { %7216 = vmatprep.mubr.msk.f32.mxu1 %vm7654_vm1, %v7653_v1  ;;  %3218 = vst [vmem:[%s8185_s17 + $0x68] sm:$0xff] %v3177_v39 }
 0x220   : > { %v3030_v25 = vpop.f32.mrb[152].mxu0 }
 0x221   : > { %v2473_v27 = vpop.f32.mrb[152].mxu1  ;;  %v3178_v28 = vadd.f32 %v3030_v25, %v2616_v62  ;;  %v7054_v51 = vpop.f32.mrb[153].mxu0  ;;  %7339 = vmatmul.mubr.msk.f32.gmra.mrb[2].mxu0 %vm271_vm2, %v3274_v46  ;;  %v3282_v62 = vld [vmem:[#allocation2 + $0x134] sm:$0xff] }
 0x222   : > { %v6932_v26 = vpop.f32.mrb[153].mxu1  ;;  %7217 = vmatmul.mubr.msk.f32.gmra.mrb[2].mxu1 %vm271_vm2, %v3273_v16  ;;  %7341 = vmatprep.mubr.msk.f32.mxu0 %vm7654_vm1, %v7653_v1  ;;  %v2617_v34 = vadd.f32 %v2473_v27, %v2178_v48  ;;  %v2184_v16 = vld [vmem:[%s8185_s17 + $0xa8] sm:$0xff] }
 0x223   : > { %7219 = vmatprep.mubr.msk.f32.mxu1 %vm7654_vm1, %v7653_v1  ;;  %3219 = vst [vmem:[%s8185_s17 + $0x70] sm:$0xff] %v3178_v28 }
 0x224   : > { %v3035_v38 = vpop.f32.mrb[154].mxu0 }
 0x225   : > { %v2478_v36 = vpop.f32.mrb[154].mxu1  ;;  %v3179_v50 = vadd.f32 %v3035_v38, %v2617_v34  ;;  %v7057_v31 = vpop.f32.mrb[155].mxu0  ;;  %7342 = vmatmul.mubr.msk.f32.gmra.mrb[4].mxu0 %vm271_vm2, %v3275_v30  ;;  %v3283_v34 = vld [vmem:[#allocation2 + $0x13c] sm:$0xff] }
 0x226   : > { %v6935_v5 = vpop.f32.mrb[155].mxu1  ;;  %7220 = vmatmul.mubr.msk.f32.gmra.mrb[4].mxu1 %vm271_vm2, %v3274_v46  ;;  %7344 = vmatprep.mubr.msk.f32.mxu0 %vm7654_vm1, %v7653_v1  ;;  %v2618_v47 = vadd.f32 %v2478_v36, %v2179_v59  ;;  %v2185_v46 = vld [vmem:[%s8185_s17 + $0xb0] sm:$0xff] }
 0x227   : > { %7222 = vmatprep.mubr.msk.f32.mxu1 %vm7654_vm1, %v7653_v1  ;;  %3220 = vst [vmem:[%s8185_s17 + $0x78] sm:$0xff] %v3179_v50 }
 0x228   : > { %v3040_v52 = vpop.f32.mrb[156].mxu0 }
 0x229   : > { %v2483_v45 = vpop.f32.mrb[156].mxu1  ;;  %v3180_v33 = vadd.f32 %v3040_v52, %v2618_v47  ;;  %v7060_v11 = vpop.f32.mrb[157].mxu0  ;;  %7345 = vmatmul.mubr.msk.f32.gmra.mrb[6].mxu0 %vm271_vm2, %v3276_v41  ;;  %v3284_v47 = vld [vmem:[#allocation2 + $0x144] sm:$0xff] }
 0x22a   : > { %v6938_v49 = vpop.f32.mrb[157].mxu1  ;;  %7223 = vmatmul.mubr.msk.f32.gmra.mrb[6].mxu1 %vm271_vm2, %v3275_v30  ;;  %7347 = vmatprep.mubr.msk.f32.mxu0 %vm7654_vm1, %v7653_v1  ;;  %v2619_v53 = vadd.f32 %v2483_v45, %v2180_v57  ;;  %v2186_v30 = vld [vmem:[%s8185_s17 + $0xb8] sm:$0xff] }
 0x22b   : > { %7225 = vmatprep.mubr.msk.f32.mxu1 %vm7654_vm1, %v7653_v1  ;;  %3221 = vst [vmem:[%s8185_s17 + $0x80] sm:$0xff] %v3180_v33 }
 0x22c   : > { %v3045_v54 = vpop.f32.mrb[158].mxu0 }
 0x22d   : > { %v2488_v58 = vpop.f32.mrb[158].mxu1  ;;  %v3181_v35 = vadd.f32 %v3045_v54, %v2619_v53  ;;  %v7063_v61 = vpop.f32.mrb[159].mxu0  ;;  %7348 = vmatmul.mubr.msk.f32.gmra.mrb[8].mxu0 %vm271_vm2, %v3277_v0  ;;  %v3285_v53 = vld [vmem:[#allocation2 + $0x14c] sm:$0xff] }
 0x22e   : > { %v6941_v60 = vpop.f32.mrb[159].mxu1  ;;  %7226 = vmatmul.mubr.msk.f32.gmra.mrb[8].mxu1 %vm271_vm2, %v3276_v41  ;;  %7350 = vmatprep.mubr.msk.f32.mxu0 %vm7654_vm1, %v7653_v1  ;;  %v2620_v6 = vadd.f32 %v2488_v58, %v2181_v63  ;;  %v2187_v41 = vld [vmem:[%s8185_s17 + $0xc0] sm:$0xff] }
 0x22f   : > { %7228 = vmatprep.mubr.msk.f32.mxu1 %vm7654_vm1, %v7653_v1  ;;  %3222 = vst [vmem:[%s8185_s17 + $0x88] sm:$0xff] %v3181_v35 }
 0x230   : > { %v3050_v2 = vpop.f32.mrb[160].mxu0 }
 0x231   : > { %v2493_v32 = vpop.f32.mrb[160].mxu1  ;;  %v3182_v37 = vadd.f32 %v3050_v2, %v2620_v6  ;;  %v7066_v3 = vpop.f32.mrb[161].mxu0  ;;  %7351 = vmatmul.mubr.msk.f32.gmra.mrb[10].mxu0 %vm271_vm2, %v3278_v17  ;;  %v3286_v6 = vld [vmem:[#allocation2 + $0x154] sm:$0xff] }
 0x232   : > { %v6944_v56 = vpop.f32.mrb[161].mxu1  ;;  %7229 = vmatmul.mubr.msk.f32.gmra.mrb[10].mxu1 %vm271_vm2, %v3277_v0  ;;  %7353 = vmatprep.mubr.msk.f32.mxu0 %vm7654_vm1, %v7653_v1  ;;  %v2621_v12 = vadd.f32 %v2493_v32, %v2182_v4  ;;  %v2188_v0 = vld [vmem:[%s8185_s17 + $0xc8] sm:$0xff] }
 0x233   : > { %7231 = vmatprep.mubr.msk.f32.mxu1 %vm7654_vm1, %v7653_v1  ;;  %3223 = vst [vmem:[%s8185_s17 + $0x90] sm:$0xff] %v3182_v37 }
 0x234   : > { %v3055_v8 = vpop.f32.mrb[162].mxu0 }
 0x235   : > { %v2498_v23 = vpop.f32.mrb[162].mxu1  ;;  %v3183_v40 = vadd.f32 %v3055_v8, %v2621_v12  ;;  %v7069_v9 = vpop.f32.mrb[163].mxu0  ;;  %7354 = vmatmul.mubr.msk.f32.gmra.mrb[12].mxu0 %vm271_vm2, %v3279_v7  ;;  %v3847_v12 = vld [vmem:[#allocation2 + $0x15c] sm:$0xff] }
 0x236   : > { %v6947_v43 = vpop.f32.mrb[163].mxu1  ;;  %7232 = vmatmul.mubr.msk.f32.gmra.mrb[12].mxu1 %vm271_vm2, %v3278_v17  ;;  %7356 = vmatprep.mubr.msk.f32.mxu0 %vm7654_vm1, %v7653_v1  ;;  %v2622_v18 = vadd.f32 %v2498_v23, %v2183_v10  ;;  %v2189_v17 = vld [vmem:[%s8185_s17 + $0xd0] sm:$0xff] }
 0x237   : > { %7234 = vmatprep.mubr.msk.f32.mxu1 %vm7654_vm1, %v7653_v1  ;;  %3224 = vst [vmem:[%s8185_s17 + $0x98] sm:$0xff] %v3183_v40 }
 0x238   : > { %v3060_v29 = vpop.f32.mrb[164].mxu0 }
 0x239   : > { %v2503_v14 = vpop.f32.mrb[164].mxu1  ;;  %v3184_v15 = vadd.f32 %v3060_v29, %v2622_v18  ;;  %v7072_v55 = vpop.f32.mrb[165].mxu0  ;;  %7357 = vmatmul.mubr.msk.f32.gmra.mrb[14].mxu0 %vm271_vm2, %v3280_v13  ;;  %v4370_v18 = vld [vmem:[#allocation2 + $0x25] sm:$0xff] }
 0x23a   : > { %v6950_v42 = vpop.f32.mrb[165].mxu1  ;;  %7235 = vmatmul.mubr.msk.f32.gmra.mrb[14].mxu1 %vm271_vm2, %v3279_v7  ;;  %7359 = vmatprep.mubr.msk.f32.mxu0 %vm7654_vm1, %v7653_v1  ;;  %v2623_v22 = vadd.f32 %v2503_v14, %v2184_v16  ;;  %v2190_v7 = vld [vmem:[%s8185_s17 + $0xd8] sm:$0xff]  ;;  %v3848_v14 = vld [vmem:[#allocation2 + $0x164] sm:$0xff] }
 0x23b   : > { %7237 = vmatprep.mubr.msk.f32.mxu1 %vm7654_vm1, %v7653_v1  ;;  %3225 = vst [vmem:[%s8185_s17 + $0xa0] sm:$0xff] %v3184_v15 }
 0x23c   : > { %v3065_v20 = vpop.f32.mrb[166].mxu0 }
 0x23d   : > { %v2508_v44 = vpop.f32.mrb[166].mxu1  ;;  %v3185_v21 = vadd.f32 %v3065_v20, %v2623_v22  ;;  %v7075_v24 = vpop.f32.mrb[167].mxu0  ;;  %7360 = vmatmul.mubr.msk.f32.gmra.mrb[16].mxu0 %vm271_vm2, %v3281_v19  ;;  %v2192_v22 = vld [vmem:[%s8185_s17 + $0xe8] sm:$0xff] }
 0x23e   : > { %v6953_v39 = vpop.f32.mrb[167].mxu1  ;;  %7238 = vmatmul.mubr.msk.f32.gmra.mrb[16].mxu1 %vm271_vm2, %v3280_v13  ;;  %7362 = vmatprep.mubr.msk.f32.mxu0 %vm7654_vm1, %v7653_v1  ;;  %v2624_v27 = vadd.f32 %v2508_v44, %v2185_v46  ;;  %v2191_v13 = vld [vmem:[%s8185_s17 + $0xe0] sm:$0xff]  ;;  %v4371_v44 = vld [vmem:[#allocation2 + $0x2d] sm:$0xff] }
 0x23f   : > { %7240 = vmatprep.mubr.msk.f32.mxu1 %vm7654_vm1, %v7653_v1  ;;  %3226 = vst [vmem:[%s8185_s17 + $0xa8] sm:$0xff] %v3185_v21  ;;  %v4932_v20 = vld [vmem:[#allocation2 + $0x26] sm:$0xff] }
 0x240   : > { %v3070_v26 = vpop.f32.mrb[168].mxu0 }
 0x241   : > { %v2513_v25 = vpop.f32.mrb[168].mxu1  ;;  %v3186_v51 = vadd.f32 %v3070_v26, %v2624_v27  ;;  %v7078_v48 = vpop.f32.mrb[169].mxu0  ;;  %7363 = vmatmul.mubr.msk.f32.gmra.mrb[18].mxu0 %vm271_vm2, %v3282_v62  ;;  %v4372_v26 = vld [vmem:[#allocation2 + $0x35] sm:$0xff] }
 0x242   : > { %v6956_v28 = vpop.f32.mrb[169].mxu1  ;;  %7241 = vmatmul.mubr.msk.f32.gmra.mrb[18].mxu1 %vm271_vm2, %v3281_v19  ;;  %7365 = vmatprep.mubr.msk.f32.mxu0 %vm7654_vm1, %v7653_v1  ;;  %v2625_v36 = vadd.f32 %v2513_v25, %v2186_v30  ;;  %v2193_v25 = vld [vmem:[%s8185_s17 + $0xf0] sm:$0xff] }
 0x243   : > { %7243 = vmatprep.mubr.msk.f32.mxu1 %vm7654_vm1, %v7653_v1  ;;  %3227 = vst [vmem:[%s8185_s17 + $0xb0] sm:$0xff] %v3186_v51  ;;  %v4933_v28 = vld [vmem:[#allocation2 + $0x2e] sm:$0xff] }
 0x244   : > { %v3075_v5 = vpop.f32.mrb[170].mxu0 }
 0x245   : > { %v2518_v38 = vpop.f32.mrb[170].mxu1  ;;  %v3187_v31 = vadd.f32 %v3075_v5, %v2625_v36  ;;  %v7081_v59 = vpop.f32.mrb[171].mxu0  ;;  %7366 = vmatmul.mubr.msk.f32.gmra.mrb[20].mxu0 %vm271_vm2, %v3283_v34  ;;  %v2194_v5 = vld [vmem:[%s8185_s17 + $0xf8] sm:$0xff] }
 0x246   : > { %v6959_v50 = vpop.f32.mrb[171].mxu1  ;;  %7244 = vmatmul.mubr.msk.f32.gmra.mrb[20].mxu1 %vm271_vm2, %v3282_v62  ;;  %7368 = vmatprep.mubr.msk.f32.mxu0 %vm7654_vm1, %v7653_v1  ;;  %v2626_v45 = vadd.f32 %v2518_v38, %v2187_v41 }
 0x247   : > { %7246 = vmatprep.mubr.msk.f32.mxu1 %vm7654_vm1, %v7653_v1  ;;  %3228 = vst [vmem:[%s8185_s17 + $0xb8] sm:$0xff] %v3187_v31  ;;  %v4373_v50 = vld [vmem:[#allocation2 + $0x3d] sm:$0xff] }
 0x248   : > { %v3080_v49 = vpop.f32.mrb[172].mxu0  ;;  %v4934_v31 = vld [vmem:[#allocation2 + $0x36] sm:$0xff] }
 0x249   : > { %v2523_v52 = vpop.f32.mrb[172].mxu1  ;;  %v3188_v11 = vadd.f32 %v3080_v49, %v2626_v45  ;;  %v7084_v57 = vpop.f32.mrb[173].mxu0  ;;  %7369 = vmatmul.mubr.msk.f32.gmra.mrb[22].mxu0 %vm271_vm2, %v3284_v47 }
 0x24a   : > { %v6962_v33 = vpop.f32.mrb[173].mxu1  ;;  %7247 = vmatmul.mubr.msk.f32.gmra.mrb[22].mxu1 %vm271_vm2, %v3283_v34  ;;  %7371 = vmatprep.mubr.msk.f32.mxu0 %vm7654_vm1, %v7653_v1  ;;  %v2627_v58 = vadd.f32 %v2523_v52, %v2188_v0  ;;  %v4935_v57 = vld [vmem:[#allocation2 + $0x3e] sm:$0xff] }
 0x24b   : > { %7249 = vmatprep.mubr.msk.f32.mxu1 %vm7654_vm1, %v7653_v1  ;;  %3229 = vst [vmem:[%s8185_s17 + $0xc0] sm:$0xff] %v3188_v11  ;;  %v2195_v33 = vld [vmem:[%s8185_s17 + $0x100] sm:$0xff] }
 0x24c   : > { %v3085_v60 = vpop.f32.mrb[174].mxu0  ;;  %v4374_v11 = vld [vmem:[#allocation2 + $0x45] sm:$0xff] }
 0x24d   : > { %v2528_v54 = vpop.f32.mrb[174].mxu1  ;;  %v3189_v61 = vadd.f32 %v3085_v60, %v2627_v58  ;;  %v7087_v63 = vpop.f32.mrb[175].mxu0  ;;  %7372 = vmatmul.mubr.msk.f32.gmra.mrb[24].mxu0 %vm271_vm2, %v3285_v53 }
 0x24e   : > { %v6965_v35 = vpop.f32.mrb[175].mxu1  ;;  %7250 = vmatmul.mubr.msk.f32.gmra.mrb[24].mxu1 %vm271_vm2, %v3284_v47  ;;  %7374 = vmatprep.mubr.msk.f32.mxu0 %vm7654_vm1, %v7653_v1  ;;  %v2628_v32 = vadd.f32 %v2528_v54, %v2189_v17  ;;  %v4375_v63 = vld [vmem:[#allocation2 + $0x4d] sm:$0xff] }
 0x24f   : > { %7252 = vmatprep.mubr.msk.f32.mxu1 %vm7654_vm1, %v7653_v1  ;;  %3230 = vst [vmem:[%s8185_s17 + $0xc8] sm:$0xff] %v3189_v61  ;;  %v2196_v61 = vld [vmem:[%s8185_s17 + $0x108] sm:$0xff] }
 0x250   : > { %v3090_v56 = vpop.f32.mrb[176].mxu0  ;;  %v4936_v17 = vld [vmem:[#allocation2 + $0x46] sm:$0xff] }
 0x251   : > { %v2533_v2 = vpop.f32.mrb[176].mxu1  ;;  %v3190_v3 = vadd.f32 %v3090_v56, %v2628_v32  ;;  %v7090_v4 = vpop.f32.mrb[177].mxu0  ;;  %7375 = vmatmul.mubr.msk.f32.gmra.mrb[26].mxu0 %vm271_vm2, %v3286_v6 }
 0x252   : > { %v6968_v37 = vpop.f32.mrb[177].mxu1  ;;  %7253 = vmatmul.mubr.msk.f32.gmra.mrb[26].mxu1 %vm271_vm2, %v3285_v53  ;;  %7377 = vmatprep.mubr.msk.f32.mxu0 %vm7654_vm1, %v7653_v1  ;;  %v2629_v23 = vadd.f32 %v2533_v2, %v2190_v7  ;;  %v2197_v4 = vld [vmem:[%s8185_s17 + $0x110] sm:$0xff] }
 0x253   : > { %7255 = vmatprep.mubr.msk.f32.mxu1 %vm7654_vm1, %v7653_v1  ;;  %3231 = vst [vmem:[%s8185_s17 + $0xd0] sm:$0xff] %v3190_v3  ;;  %v4376_v7 = vld [vmem:[#allocation2 + $0x55] sm:$0xff] }
 0x254   : > { %v3095_v43 = vpop.f32.mrb[178].mxu0 }
 0x255   : > { %v2538_v8 = vpop.f32.mrb[178].mxu1  ;;  %v3191_v9 = vadd.f32 %v3095_v43, %v2629_v23  ;;  %v7093_v10 = vpop.f32.mrb[179].mxu0  ;;  %7378 = vmatmul.mubr.msk.f32.gmra.mrb[28].mxu0 %vm271_vm2, %v3847_v12  ;;  %v4937_v12 = vld [vmem:[#allocation2 + $0x4e] sm:$0xff] }
 0x256   : > { %v6971_v40 = vpop.f32.mrb[179].mxu1  ;;  %7256 = vmatmul.mubr.msk.f32.gmra.mrb[28].mxu1 %vm271_vm2, %v3286_v6  ;;  %7380 = vmatprep.mubr.msk.f32.mxu0 %vm7654_vm1, %v7653_v1  ;;  %v2630_v29 = vadd.f32 %v2538_v8, %v2191_v13  ;;  %v2198_v13 = vld [vmem:[%s8185_s17 + $0x118] sm:$0xff] }
 0x257   : > { %7385 = vmatprep.mubr.msk.f32.mxu1 %vm7654_vm1, %v7653_v1  ;;  %3232 = vst [vmem:[%s8185_s17 + $0xd8] sm:$0xff] %v3191_v9 }
 0x258   : > { %v3100_v15 = vpop.f32.mrb[180].mxu0 }
 0x259   : > { %v2543_v42 = vpop.f32.mrb[180].mxu1  ;;  %v3192_v16 = vadd.f32 %v3100_v15, %v2630_v29  ;;  %v7096_v19 = vpop.f32.mrb[181].mxu0  ;;  %7381 = vmatmul.mubr.msk.f32.gmra.mrb[30].mxu0 %vm271_vm2, %v3848_v14  ;;  %v4938_v14 = vld [vmem:[#allocation2 + $0x56] sm:$0xff] }
 0x25a   : > { %v6974_v55 = vpop.f32.mrb[181].mxu1  ;;  %7386 = vmatmul.mubr.msk.f32.vlgmr.msra.gmra.mrb[30].mxu1 %vm271_vm2, %v4370_v18  ;;  %7510 = vmatprep.mubr.msk.f32.mxu0 %vm7654_vm1, %v7653_v1  ;;  %v2631_v39 = vadd.f32 %v2543_v42, %v2192_v22  ;;  %v4377_v18 = vld [vmem:[#allocation2 + $0x5d] sm:$0xff] }
 0x25b   : > { %7388 = vmatprep.mubr.msk.f32.mxu1 %vm7654_vm1, %v7653_v1  ;;  %3233 = vst [vmem:[%s8185_s17 + $0xe0] sm:$0xff] %v3192_v16  ;;  %v2199_v22 = vld [vmem:[%s8185_s17 + $0x120] sm:$0xff] }
 0x25c   : > { %v3105_v24 = vpop.f32.mrb[182].mxu0 }
 0x25d   : > { %v2548_v21 = vpop.f32.mrb[182].mxu1  ;;  %v3193_v62 = vadd.f32 %v3105_v24, %v2631_v39  ;;  %v7099_v27 = vpop.f32.mrb[183].mxu0  ;;  %7511 = vmatmul.mubr.msk.f32.vlgmr.msra.gmra.mrb[32].mxu0 %vm271_vm2, %v4932_v20  ;;  %v4939_v20 = vld [vmem:[#allocation2 + $0x5e] sm:$0xff] }
 0x25e   : > { %v6977_v46 = vpop.f32.mrb[183].mxu1  ;;  %7389 = vmatmul.mubr.msk.f32.gmra.mrb[32].mxu1 %vm271_vm2, %v4371_v44  ;;  %7513 = vmatprep.mubr.msk.f32.mxu0 %vm7654_vm1, %v7653_v1  ;;  %v2632_v51 = vadd.f32 %v2548_v21, %v2193_v25  ;;  %v4378_v44 = vld [vmem:[#allocation2 + $0x65] sm:$0xff] }
 0x25f   : > { %7391 = vmatprep.mubr.msk.f32.mxu1 %vm7654_vm1, %v7653_v1  ;;  %3234 = vst [vmem:[%s8185_s17 + $0xe8] sm:$0xff] %v3193_v62  ;;  %v2200_v25 = vld [vmem:[%s8185_s17 + $0x128] sm:$0xff] }
 0x260   : > { %v3110_v30 = vpop.f32.mrb[184].mxu0 }
 0x261   : > { %v2553_v48 = vpop.f32.mrb[184].mxu1  ;;  %v3194_v36 = vadd.f32 %v3110_v30, %v2632_v51  ;;  %v7102_v38 = vpop.f32.mrb[185].mxu0  ;;  %7514 = vmatmul.mubr.msk.f32.gmra.mrb[34].mxu0 %vm271_vm2, %v4933_v28  ;;  %v4940_v28 = vld [vmem:[#allocation2 + $0x66] sm:$0xff] }
 0x262   : > { %v6980_v34 = vpop.f32.mrb[185].mxu1  ;;  %7392 = vmatmul.mubr.msk.f32.gmra.mrb[34].mxu1 %vm271_vm2, %v4372_v26  ;;  %7516 = vmatprep.mubr.msk.f32.mxu0 %vm7654_vm1, %v7653_v1  ;;  %v2633_v59 = vadd.f32 %v2553_v48, %v2194_v5  ;;  %v4379_v26 = vld [vmem:[#allocation2 + $0x6d] sm:$0xff] }
 0x263   : > { %7394 = vmatprep.mubr.msk.f32.mxu1 %vm7654_vm1, %v7653_v1  ;;  %3235 = vst [vmem:[%s8185_s17 + $0xf0] sm:$0xff] %v3194_v36  ;;  %v2201_v5 = vld [vmem:[%s8185_s17 + $0x130] sm:$0xff] }
 0x264   : > { %v3115_v47 = vpop.f32.mrb[186].mxu0 }
 0x265   : > { %v2558_v41 = vpop.f32.mrb[186].mxu1  ;;  %v3195_v52 = vadd.f32 %v3115_v47, %v2633_v59  ;;  %v7105_v49 = vpop.f32.mrb[187].mxu0  ;;  %7517 = vmatmul.mubr.msk.f32.gmra.mrb[36].mxu0 %vm271_vm2, %v4934_v31  ;;  %v4941_v31 = vld [vmem:[#allocation2 + $0x6e] sm:$0xff] }
 0x266   : > { %v6983_v45 = vpop.f32.mrb[187].mxu1  ;;  %7395 = vmatmul.mubr.msk.f32.gmra.mrb[36].mxu1 %vm271_vm2, %v4373_v50  ;;  %7519 = vmatprep.mubr.msk.f32.mxu0 %vm7654_vm1, %v7653_v1  ;;  %v2634_v0 = vadd.f32 %v2558_v41, %v2195_v33  ;;  %v4380_v50 = vld [vmem:[#allocation2 + $0x75] sm:$0xff] }
 0x267   : > { %7397 = vmatprep.mubr.msk.f32.mxu1 %vm7654_vm1, %v7653_v1  ;;  %3236 = vst [vmem:[%s8185_s17 + $0xf8] sm:$0xff] %v3195_v52  ;;  %v2202_v33 = vld [vmem:[%s8185_s17 + $0x138] sm:$0xff] }
 0x268   : > { %v3120_v58 = vpop.f32.mrb[188].mxu0 }
 0x269   : > { %v2563_v53 = vpop.f32.mrb[188].mxu1  ;;  %v3196_v60 = vadd.f32 %v3120_v58, %v2634_v0  ;;  %v7108_v35 = vpop.f32.mrb[189].mxu0  ;;  %7520 = vmatmul.mubr.msk.f32.gmra.mrb[38].mxu0 %vm271_vm2, %v4935_v57  ;;  %v4942_v57 = vld [vmem:[#allocation2 + $0x76] sm:$0xff] }
 0x26a   : > { %v6986_v54 = vpop.f32.mrb[189].mxu1  ;;  %7398 = vmatmul.mubr.msk.f32.gmra.mrb[38].mxu1 %vm271_vm2, %v4374_v11  ;;  %7522 = vmatprep.mubr.msk.f32.mxu0 %vm7654_vm1, %v7653_v1  ;;  %v2635_v6 = vadd.f32 %v2563_v53, %v2196_v61  ;;  %v4381_v11 = vld [vmem:[#allocation2 + $0x7d] sm:$0xff] }
 0x26b   : > { %7400 = vmatprep.mubr.msk.f32.mxu1 %vm7654_vm1, %v7653_v1  ;;  %3237 = vst [vmem:[%s8185_s17 + $0x100] sm:$0xff] %v3196_v60  ;;  %v2203_v61 = vld [vmem:[%s8185_s17 + $0x140] sm:$0xff] }
 0x26c   : > { %v3125_v2 = vpop.f32.mrb[190].mxu0 }
 0x26d   : > { %v2568_v32 = vpop.f32.mrb[190].mxu1  ;;  %v3197_v37 = vadd.f32 %v3125_v2, %v2635_v6  ;;  %v7111_v3 = vpop.f32.mrb[191].mxu0  ;;  %7523 = vmatmul.mubr.msk.f32.gmra.mrb[40].mxu0 %vm271_vm2, %v4936_v17  ;;  %v4943_v17 = vld [vmem:[#allocation2 + $0x7e] sm:$0xff] }
 0x26e   : > { %v6989_v56 = vpop.f32.mrb[191].mxu1  ;;  %7401 = vmatmul.mubr.msk.f32.gmra.mrb[40].mxu1 %vm271_vm2, %v4375_v63  ;;  %7525 = vmatprep.mubr.msk.f32.mxu0 %vm7654_vm1, %v7653_v1  ;;  %v2636_v23 = vadd.f32 %v2568_v32, %v2197_v4  ;;  %v4382_v63 = vld [vmem:[#allocation2 + $0x85] sm:$0xff] }
 0x26f   : > { %7403 = vmatprep.mubr.msk.f32.mxu1 %vm7654_vm1, %v7653_v1  ;;  %3238 = vst [vmem:[%s8185_s17 + $0x108] sm:$0xff] %v3197_v37  ;;  %v3287_v4 = vld [vmem:[%s8185_s17] sm:$0xff] }
 0x270   : > { %v3130_v43 = vpop.f32.mrb[192].mxu0 }
 0x271   : > { %v2573_v8 = vpop.f32.mrb[192].mxu1  ;;  %v3198_v9 = vadd.f32 %v3130_v43, %v2636_v23  ;;  %v7114_v10 = vpop.f32.mrb[193].mxu0  ;;  %7526 = vmatmul.mubr.msk.f32.gmra.mrb[42].mxu0 %vm271_vm2, %v4937_v12  ;;  %v4944_v12 = vld [vmem:[#allocation2 + $0x86] sm:$0xff] }
 0x272   : > { %v6992_v40 = vpop.f32.mrb[193].mxu1  ;;  %7404 = vmatmul.mubr.msk.f32.gmra.mrb[42].mxu1 %vm271_vm2, %v4376_v7  ;;  %7528 = vmatprep.mubr.msk.f32.mxu0 %vm7654_vm1, %v7653_v1  ;;  %v2637_v29 = vadd.f32 %v2573_v8, %v2198_v13  ;;  %v4383_v7 = vld [vmem:[#allocation2 + $0x8d] sm:$0xff] }
 0x273   : > { %7406 = vmatprep.mubr.msk.f32.mxu1 %vm7654_vm1, %v7653_v1  ;;  %3239 = vst [vmem:[%s8185_s17 + $0x110] sm:$0xff] %v3198_v9  ;;  %v3288_v13 = vld [vmem:[%s8185_s17 + $0x8] sm:$0xff] }
 0x274   : > { %v3135_v15 = vpop.f32.mrb[194].mxu0 }
 0x275   : > { %v2578_v42 = vpop.f32.mrb[194].mxu1  ;;  %v3199_v16 = vadd.f32 %v3135_v15, %v2637_v29  ;;  %v7117_v19 = vpop.f32.mrb[195].mxu0  ;;  %7529 = vmatmul.mubr.msk.f32.gmra.mrb[44].mxu0 %vm271_vm2, %v4938_v14  ;;  %v4945_v14 = vld [vmem:[#allocation2 + $0x8e] sm:$0xff] }
 0x276   : > { %v6995_v55 = vpop.f32.mrb[195].mxu1  ;;  %7407 = vmatmul.mubr.msk.f32.gmra.mrb[44].mxu1 %vm271_vm2, %v4377_v18  ;;  %7531 = vmatprep.mubr.msk.f32.mxu0 %vm7654_vm1, %v7653_v1  ;;  %v2638_v39 = vadd.f32 %v2578_v42, %v2199_v22  ;;  %v4384_v18 = vld [vmem:[#allocation2 + $0x95] sm:$0xff] }
 0x277   : > { %7409 = vmatprep.mubr.msk.f32.mxu1 %vm7654_vm1, %v7653_v1  ;;  %3240 = vst [vmem:[%s8185_s17 + $0x118] sm:$0xff] %v3199_v16  ;;  %v3289_v22 = vld [vmem:[%s8185_s17 + $0x10] sm:$0xff] }
 0x278   : > { %v3140_v24 = vpop.f32.mrb[196].mxu0 }
 0x279   : > { %v2583_v21 = vpop.f32.mrb[196].mxu1  ;;  %v3200_v62 = vadd.f32 %v3140_v24, %v2638_v39  ;;  %v7120_v27 = vpop.f32.mrb[197].mxu0  ;;  %7532 = vmatmul.mubr.msk.f32.gmra.mrb[46].mxu0 %vm271_vm2, %v4939_v20  ;;  %v4946_v20 = vld [vmem:[#allocation2 + $0x96] sm:$0xff] }
 0x27a   : > { %v6998_v46 = vpop.f32.mrb[197].mxu1  ;;  %7410 = vmatmul.mubr.msk.f32.gmra.mrb[46].mxu1 %vm271_vm2, %v4378_v44  ;;  %7534 = vmatprep.mubr.msk.f32.mxu0 %vm7654_vm1, %v7653_v1  ;;  %v2639_v51 = vadd.f32 %v2583_v21, %v2200_v25  ;;  %v4385_v44 = vld [vmem:[#allocation2 + $0x9d] sm:$0xff] }
 0x27b   : > { %7412 = vmatprep.mubr.msk.f32.mxu1 %vm7654_vm1, %v7653_v1  ;;  %3241 = vst [vmem:[%s8185_s17 + $0x120] sm:$0xff] %v3200_v62  ;;  %v3290_v25 = vld [vmem:[%s8185_s17 + $0x18] sm:$0xff] }
 0x27c   : > { %v3145_v30 = vpop.f32.mrb[198].mxu0 }
 0x27d   : > { %v2588_v48 = vpop.f32.mrb[198].mxu1  ;;  %v3201_v36 = vadd.f32 %v3145_v30, %v2639_v51  ;;  %v7123_v38 = vpop.f32.mrb[199].mxu0  ;;  %7535 = vmatmul.mubr.msk.f32.gmra.mrb[48].mxu0 %vm271_vm2, %v4940_v28  ;;  %v4947_v28 = vld [vmem:[#allocation2 + $0x9e] sm:$0xff] }
 0x27e   : > { %v7001_v34 = vpop.f32.mrb[199].mxu1  ;;  %7413 = vmatmul.mubr.msk.f32.gmra.mrb[48].mxu1 %vm271_vm2, %v4379_v26  ;;  %7537 = vmatprep.mubr.msk.f32.mxu0 %vm7654_vm1, %v7653_v1  ;;  %v2640_v59 = vadd.f32 %v2588_v48, %v2201_v5  ;;  %v4386_v26 = vld [vmem:[#allocation2 + $0xa5] sm:$0xff] }
 0x27f   : > { %7415 = vmatprep.mubr.msk.f32.mxu1 %vm7654_vm1, %v7653_v1  ;;  %3242 = vst [vmem:[%s8185_s17 + $0x128] sm:$0xff] %v3201_v36  ;;  %v3291_v5 = vld [vmem:[%s8185_s17 + $0x20] sm:$0xff] }
 0x280   : > { %v3150_v47 = vpop.f32.mrb[200].mxu0 }
 0x281   : > { %v2593_v41 = vpop.f32.mrb[200].mxu1  ;;  %v3202_v52 = vadd.f32 %v3150_v47, %v2640_v59  ;;  %v7126_v49 = vpop.f32.mrb[201].mxu0  ;;  %7538 = vmatmul.mubr.msk.f32.gmra.mrb[50].mxu0 %vm271_vm2, %v4941_v31  ;;  %v4948_v31 = vld [vmem:[#allocation2 + $0xa6] sm:$0xff] }
 0x282   : > { %v7004_v45 = vpop.f32.mrb[201].mxu1  ;;  %7416 = vmatmul.mubr.msk.f32.gmra.mrb[50].mxu1 %vm271_vm2, %v4380_v50  ;;  %7540 = vmatprep.mubr.msk.f32.mxu0 %vm7654_vm1, %v7653_v1  ;;  %v2641_v0 = vadd.f32 %v2593_v41, %v2202_v33  ;;  %v4387_v50 = vld [vmem:[#allocation2 + $0xad] sm:$0xff] }
 0x283   : > { %7418 = vmatprep.mubr.msk.f32.mxu1 %vm7654_vm1, %v7653_v1  ;;  %3243 = vst [vmem:[%s8185_s17 + $0x130] sm:$0xff] %v3202_v52  ;;  %v3292_v33 = vld [vmem:[%s8185_s17 + $0x28] sm:$0xff] }
 0x284   : > { %v3155_v58 = vpop.f32.mrb[202].mxu0 }
 0x285   : > { %v2598_v53 = vpop.f32.mrb[202].mxu1  ;;  %v3203_v60 = vadd.f32 %v3155_v58, %v2641_v0  ;;  %v7129_v35 = vpop.f32.mrb[203].mxu0  ;;  %7541 = vmatmul.mubr.msk.f32.gmra.mrb[52].mxu0 %vm271_vm2, %v4942_v57  ;;  %v4949_v57 = vld [vmem:[#allocation2 + $0xae] sm:$0xff] }
 0x286   : > { %v7007_v54 = vpop.f32.mrb[203].mxu1  ;;  %7419 = vmatmul.mubr.msk.f32.gmra.mrb[52].mxu1 %vm271_vm2, %v4381_v11  ;;  %7543 = vmatprep.mubr.msk.f32.mxu0 %vm7654_vm1, %v7653_v1  ;;  %v2642_v6 = vadd.f32 %v2598_v53, %v2203_v61  ;;  %v4388_v11 = vld [vmem:[#allocation2 + $0xb5] sm:$0xff] }
 0x287   : > { %7421 = vmatprep.mubr.msk.f32.mxu1 %vm7654_vm1, %v7653_v1  ;;  %3244 = vst [vmem:[%s8185_s17 + $0x138] sm:$0xff] %v3203_v60  ;;  %v3293_v61 = vld [vmem:[%s8185_s17 + $0x30] sm:$0xff] }
 0x288   : > { %v3160_v2 = vpop.f32.mrb[204].mxu0 }
 0x289   : > { %v3522_v32 = vpop.f32.mrb[204].mxu1  ;;  %v3204_v37 = vadd.f32 %v3160_v2, %v2642_v6  ;;  %v7132_v3 = vpop.f32.mrb[205].mxu0  ;;  %7544 = vmatmul.mubr.msk.f32.gmra.mrb[54].mxu0 %vm271_vm2, %v4943_v17  ;;  %v4950_v17 = vld [vmem:[#allocation2 + $0xb6] sm:$0xff] }
 0x28a   : > { %v7137_v56 = vpop.f32.mrb[205].mxu1  ;;  %7422 = vmatmul.mubr.msk.f32.gmra.mrb[54].mxu1 %vm271_vm2, %v4382_v63  ;;  %7546 = vmatprep.mubr.msk.f32.mxu0 %vm7654_vm1, %v7653_v1  ;;  %v3726_v23 = vadd.f32 %v3522_v32, %v3287_v4  ;;  %v4389_v63 = vld [vmem:[#allocation2 + $0xbd] sm:$0xff] }
 0x28b   : > { %7424 = vmatprep.mubr.msk.f32.mxu1 %vm7654_vm1, %v7653_v1  ;;  %3245 = vst [vmem:[%s8185_s17 + $0x140] sm:$0xff] %v3204_v37  ;;  %v3294_v4 = vld [vmem:[%s8185_s17 + $0x38] sm:$0xff] }
 0x28c   : > { %v4084_v43 = vpop.f32.mrb[206].mxu0 }
 0x28d   : > { %v3527_v8 = vpop.f32.mrb[206].mxu1  ;;  %v4288_v9 = vadd.f32 %v4084_v43, %v3726_v23  ;;  %v7262_v10 = vpop.f32.mrb[207].mxu0  ;;  %7547 = vmatmul.mubr.msk.f32.gmra.mrb[56].mxu0 %vm271_vm2, %v4944_v12  ;;  %v4951_v12 = vld [vmem:[#allocation2 + $0xbe] sm:$0xff] }
 0x28e   : > { %v7140_v40 = vpop.f32.mrb[207].mxu1  ;;  %7425 = vmatmul.mubr.msk.f32.gmra.mrb[56].mxu1 %vm271_vm2, %v4383_v7  ;;  %7549 = vmatprep.mubr.msk.f32.mxu0 %vm7654_vm1, %v7653_v1  ;;  %v3727_v29 = vadd.f32 %v3527_v8, %v3288_v13  ;;  %v4390_v7 = vld [vmem:[#allocation2 + $0xc5] sm:$0xff] }
 0x28f   : > { %7427 = vmatprep.mubr.msk.f32.mxu1 %vm7654_vm1, %v7653_v1  ;;  %4329 = vst [vmem:[%s8185_s17] sm:$0xff] %v4288_v9  ;;  %v3295_v13 = vld [vmem:[%s8185_s17 + $0x40] sm:$0xff] }
 0x290   : > { %v4089_v15 = vpop.f32.mrb[208].mxu0 }
 0x291   : > { %v3532_v42 = vpop.f32.mrb[208].mxu1  ;;  %v4289_v16 = vadd.f32 %v4089_v15, %v3727_v29  ;;  %v7265_v19 = vpop.f32.mrb[209].mxu0  ;;  %7550 = vmatmul.mubr.msk.f32.gmra.mrb[58].mxu0 %vm271_vm2, %v4945_v14  ;;  %v4952_v14 = vld [vmem:[#allocation2 + $0xc6] sm:$0xff] }
 0x292   : > { %v7143_v55 = vpop.f32.mrb[209].mxu1  ;;  %7428 = vmatmul.mubr.msk.f32.gmra.mrb[58].mxu1 %vm271_vm2, %v4384_v18  ;;  %7552 = vmatprep.mubr.msk.f32.mxu0 %vm7654_vm1, %v7653_v1  ;;  %v3728_v39 = vadd.f32 %v3532_v42, %v3289_v22  ;;  %v4391_v18 = vld [vmem:[#allocation2 + $0xcd] sm:$0xff] }
 0x293   : > { %7430 = vmatprep.mubr.msk.f32.mxu1 %vm7654_vm1, %v7653_v1  ;;  %4330 = vst [vmem:[%s8185_s17 + $0x8] sm:$0xff] %v4289_v16  ;;  %v3296_v22 = vld [vmem:[%s8185_s17 + $0x48] sm:$0xff] }
 0x294   : > { %v4094_v24 = vpop.f32.mrb[210].mxu0 }
 0x295   : > { %v3537_v21 = vpop.f32.mrb[210].mxu1  ;;  %v4290_v62 = vadd.f32 %v4094_v24, %v3728_v39  ;;  %v7268_v27 = vpop.f32.mrb[211].mxu0  ;;  %7553 = vmatmul.mubr.msk.f32.gmra.mrb[60].mxu0 %vm271_vm2, %v4946_v20  ;;  %v4953_v20 = vld [vmem:[#allocation2 + $0xce] sm:$0xff] }
 0x296   : > { %v7146_v46 = vpop.f32.mrb[211].mxu1  ;;  %7431 = vmatmul.mubr.msk.f32.gmra.mrb[60].mxu1 %vm271_vm2, %v4385_v44  ;;  %7555 = vmatprep.mubr.msk.f32.mxu0 %vm7654_vm1, %v7653_v1  ;;  %v3729_v51 = vadd.f32 %v3537_v21, %v3290_v25  ;;  %v4392_v44 = vld [vmem:[#allocation2 + $0xd5] sm:$0xff] }
 0x297   : > { %7433 = vmatprep.mubr.msk.f32.mxu1 %vm7654_vm1, %v7653_v1  ;;  %4331 = vst [vmem:[%s8185_s17 + $0x10] sm:$0xff] %v4290_v62  ;;  %v3297_v25 = vld [vmem:[%s8185_s17 + $0x50] sm:$0xff] }
 0x298   : > { %v4099_v30 = vpop.f32.mrb[212].mxu0 }
 0x299   : > { %v3542_v48 = vpop.f32.mrb[212].mxu1  ;;  %v4291_v36 = vadd.f32 %v4099_v30, %v3729_v51  ;;  %v7271_v38 = vpop.f32.mrb[213].mxu0  ;;  %7556 = vmatmul.mubr.msk.f32.gmra.mrb[62].mxu0 %vm271_vm2, %v4947_v28  ;;  %v4954_v28 = vld [vmem:[#allocation2 + $0xd6] sm:$0xff] }
 0x29a   : > { %v7149_v34 = vpop.f32.mrb[213].mxu1  ;;  %7434 = vmatmul.mubr.msk.f32.gmra.mrb[62].mxu1 %vm271_vm2, %v4386_v26  ;;  %7558 = vmatprep.mubr.msk.f32.mxu0 %vm7654_vm1, %v7653_v1  ;;  %v3730_v59 = vadd.f32 %v3542_v48, %v3291_v5  ;;  %v4393_v26 = vld [vmem:[#allocation2 + $0xdd] sm:$0xff] }
 0x29b   : > { %7436 = vmatprep.mubr.msk.f32.mxu1 %vm7654_vm1, %v7653_v1  ;;  %4332 = vst [vmem:[%s8185_s17 + $0x18] sm:$0xff] %v4291_v36  ;;  %v3298_v5 = vld [vmem:[%s8185_s17 + $0x58] sm:$0xff] }
 0x29c   : > { %v4104_v47 = vpop.f32.mrb[214].mxu0 }
 0x29d   : > { %v3547_v41 = vpop.f32.mrb[214].mxu1  ;;  %v4292_v52 = vadd.f32 %v4104_v47, %v3730_v59  ;;  %v7274_v49 = vpop.f32.mrb[215].mxu0  ;;  %7559 = vmatmul.mubr.msk.f32.gmra.mrb[64].mxu0 %vm271_vm2, %v4948_v31  ;;  %v4955_v31 = vld [vmem:[#allocation2 + $0xde] sm:$0xff] }
 0x29e   : > { %v7152_v45 = vpop.f32.mrb[215].mxu1  ;;  %7437 = vmatmul.mubr.msk.f32.gmra.mrb[64].mxu1 %vm271_vm2, %v4387_v50  ;;  %7561 = vmatprep.mubr.msk.f32.mxu0 %vm7654_vm1, %v7653_v1  ;;  %v3731_v0 = vadd.f32 %v3547_v41, %v3292_v33  ;;  %v4394_v50 = vld [vmem:[#allocation2 + $0xe5] sm:$0xff] }
 0x29f   : > { %7439 = vmatprep.mubr.msk.f32.mxu1 %vm7654_vm1, %v7653_v1  ;;  %4333 = vst [vmem:[%s8185_s17 + $0x20] sm:$0xff] %v4292_v52  ;;  %v3299_v33 = vld [vmem:[%s8185_s17 + $0x60] sm:$0xff] }
 0x2a0   : > { %v4109_v58 = vpop.f32.mrb[216].mxu0 }
 0x2a1   : > { %v3552_v53 = vpop.f32.mrb[216].mxu1  ;;  %v4293_v60 = vadd.f32 %v4109_v58, %v3731_v0  ;;  %v7277_v35 = vpop.f32.mrb[217].mxu0  ;;  %7562 = vmatmul.mubr.msk.f32.gmra.mrb[66].mxu0 %vm271_vm2, %v4949_v57  ;;  %v4956_v57 = vld [vmem:[#allocation2 + $0xe6] sm:$0xff] }
 0x2a2   : > { %v7155_v54 = vpop.f32.mrb[217].mxu1  ;;  %7440 = vmatmul.mubr.msk.f32.gmra.mrb[66].mxu1 %vm271_vm2, %v4388_v11  ;;  %7564 = vmatprep.mubr.msk.f32.mxu0 %vm7654_vm1, %v7653_v1  ;;  %v3732_v6 = vadd.f32 %v3552_v53, %v3293_v61  ;;  %v4395_v11 = vld [vmem:[#allocation2 + $0xed] sm:$0xff] }
 0x2a3   : > { %7442 = vmatprep.mubr.msk.f32.mxu1 %vm7654_vm1, %v7653_v1  ;;  %4334 = vst [vmem:[%s8185_s17 + $0x28] sm:$0xff] %v4293_v60  ;;  %v3300_v61 = vld [vmem:[%s8185_s17 + $0x68] sm:$0xff] }
 0x2a4   : > { %v4114_v2 = vpop.f32.mrb[218].mxu0 }
 0x2a5   : > { %v3557_v32 = vpop.f32.mrb[218].mxu1  ;;  %v4294_v37 = vadd.f32 %v4114_v2, %v3732_v6  ;;  %v7280_v3 = vpop.f32.mrb[219].mxu0  ;;  %7565 = vmatmul.mubr.msk.f32.gmra.mrb[68].mxu0 %vm271_vm2, %v4950_v17  ;;  %v4957_v17 = vld [vmem:[#allocation2 + $0xee] sm:$0xff] }
 0x2a6   : > { %v7158_v56 = vpop.f32.mrb[219].mxu1  ;;  %7443 = vmatmul.mubr.msk.f32.gmra.mrb[68].mxu1 %vm271_vm2, %v4389_v63  ;;  %7567 = vmatprep.mubr.msk.f32.mxu0 %vm7654_vm1, %v7653_v1  ;;  %v3733_v23 = vadd.f32 %v3557_v32, %v3294_v4  ;;  %v4396_v63 = vld [vmem:[#allocation2 + $0xf5] sm:$0xff] }
 0x2a7   : > { %7445 = vmatprep.mubr.msk.f32.mxu1 %vm7654_vm1, %v7653_v1  ;;  %4335 = vst [vmem:[%s8185_s17 + $0x30] sm:$0xff] %v4294_v37  ;;  %v3301_v4 = vld [vmem:[%s8185_s17 + $0x70] sm:$0xff] }
 0x2a8   : > { %v4119_v43 = vpop.f32.mrb[220].mxu0 }
 0x2a9   : > { %v3562_v8 = vpop.f32.mrb[220].mxu1  ;;  %v4295_v9 = vadd.f32 %v4119_v43, %v3733_v23  ;;  %v7283_v10 = vpop.f32.mrb[221].mxu0  ;;  %7568 = vmatmul.mubr.msk.f32.gmra.mrb[70].mxu0 %vm271_vm2, %v4951_v12  ;;  %v4958_v12 = vld [vmem:[#allocation2 + $0xf6] sm:$0xff] }
 0x2aa   : > { %v7161_v40 = vpop.f32.mrb[221].mxu1  ;;  %7446 = vmatmul.mubr.msk.f32.gmra.mrb[70].mxu1 %vm271_vm2, %v4390_v7  ;;  %7570 = vmatprep.mubr.msk.f32.mxu0 %vm7654_vm1, %v7653_v1  ;;  %v3734_v29 = vadd.f32 %v3562_v8, %v3295_v13  ;;  %v4397_v7 = vld [vmem:[#allocation2 + $0xfd] sm:$0xff] }
 0x2ab   : > { %7448 = vmatprep.mubr.msk.f32.mxu1 %vm7654_vm1, %v7653_v1  ;;  %4336 = vst [vmem:[%s8185_s17 + $0x38] sm:$0xff] %v4295_v9  ;;  %v3302_v13 = vld [vmem:[%s8185_s17 + $0x78] sm:$0xff] }
 0x2ac   : > { %v4124_v15 = vpop.f32.mrb[222].mxu0 }
 0x2ad   : > { %v3567_v42 = vpop.f32.mrb[222].mxu1  ;;  %v4296_v16 = vadd.f32 %v4124_v15, %v3734_v29  ;;  %v7286_v19 = vpop.f32.mrb[223].mxu0  ;;  %7571 = vmatmul.mubr.msk.f32.gmra.mrb[72].mxu0 %vm271_vm2, %v4952_v14  ;;  %v4959_v14 = vld [vmem:[#allocation2 + $0xfe] sm:$0xff] }
 0x2ae   : > { %v7164_v55 = vpop.f32.mrb[223].mxu1  ;;  %7449 = vmatmul.mubr.msk.f32.gmra.mrb[72].mxu1 %vm271_vm2, %v4391_v18  ;;  %7573 = vmatprep.mubr.msk.f32.mxu0 %vm7654_vm1, %v7653_v1  ;;  %v3735_v39 = vadd.f32 %v3567_v42, %v3296_v22  ;;  %v4398_v18 = vld [vmem:[#allocation2 + $0x105] sm:$0xff] }
 0x2af   : > { %7451 = vmatprep.mubr.msk.f32.mxu1 %vm7654_vm1, %v7653_v1  ;;  %4337 = vst [vmem:[%s8185_s17 + $0x40] sm:$0xff] %v4296_v16  ;;  %v3303_v22 = vld [vmem:[%s8185_s17 + $0x80] sm:$0xff] }
 0x2b0   : > { %v4129_v24 = vpop.f32.mrb[224].mxu0 }
 0x2b1   : > { %v3572_v21 = vpop.f32.mrb[224].mxu1  ;;  %v4297_v62 = vadd.f32 %v4129_v24, %v3735_v39  ;;  %v7289_v27 = vpop.f32.mrb[225].mxu0  ;;  %7574 = vmatmul.mubr.msk.f32.gmra.mrb[74].mxu0 %vm271_vm2, %v4953_v20  ;;  %v4960_v20 = vld [vmem:[#allocation2 + $0x106] sm:$0xff] }
 0x2b2   : > { %v7167_v46 = vpop.f32.mrb[225].mxu1  ;;  %7452 = vmatmul.mubr.msk.f32.gmra.mrb[74].mxu1 %vm271_vm2, %v4392_v44  ;;  %7576 = vmatprep.mubr.msk.f32.mxu0 %vm7654_vm1, %v7653_v1  ;;  %v3736_v51 = vadd.f32 %v3572_v21, %v3297_v25  ;;  %v4399_v44 = vld [vmem:[#allocation2 + $0x10d] sm:$0xff] }
 0x2b3   : > { %7454 = vmatprep.mubr.msk.f32.mxu1 %vm7654_vm1, %v7653_v1  ;;  %4338 = vst [vmem:[%s8185_s17 + $0x48] sm:$0xff] %v4297_v62  ;;  %v3304_v25 = vld [vmem:[%s8185_s17 + $0x88] sm:$0xff] }
 0x2b4   : > { %v4134_v30 = vpop.f32.mrb[226].mxu0 }
 0x2b5   : > { %v3577_v48 = vpop.f32.mrb[226].mxu1  ;;  %v4298_v36 = vadd.f32 %v4134_v30, %v3736_v51  ;;  %v7292_v38 = vpop.f32.mrb[227].mxu0  ;;  %7577 = vmatmul.mubr.msk.f32.gmra.mrb[76].mxu0 %vm271_vm2, %v4954_v28  ;;  %v4961_v28 = vld [vmem:[#allocation2 + $0x10e] sm:$0xff] }
 0x2b6   : > { %v7170_v34 = vpop.f32.mrb[227].mxu1  ;;  %7455 = vmatmul.mubr.msk.f32.gmra.mrb[76].mxu1 %vm271_vm2, %v4393_v26  ;;  %7579 = vmatprep.mubr.msk.f32.mxu0 %vm7654_vm1, %v7653_v1  ;;  %v3737_v59 = vadd.f32 %v3577_v48, %v3298_v5  ;;  %v4400_v26 = vld [vmem:[#allocation2 + $0x115] sm:$0xff] }
 0x2b7   : > { %7457 = vmatprep.mubr.msk.f32.mxu1 %vm7654_vm1, %v7653_v1  ;;  %4339 = vst [vmem:[%s8185_s17 + $0x50] sm:$0xff] %v4298_v36  ;;  %v3305_v5 = vld [vmem:[%s8185_s17 + $0x90] sm:$0xff] }
 0x2b8   : > { %v4139_v47 = vpop.f32.mrb[228].mxu0 }
 0x2b9   : > { %v3582_v41 = vpop.f32.mrb[228].mxu1  ;;  %v4299_v52 = vadd.f32 %v4139_v47, %v3737_v59  ;;  %v7295_v49 = vpop.f32.mrb[229].mxu0  ;;  %7580 = vmatmul.mubr.msk.f32.gmra.mrb[78].mxu0 %vm271_vm2, %v4955_v31  ;;  %v4962_v31 = vld [vmem:[#allocation2 + $0x116] sm:$0xff] }
 0x2ba   : > { %v7173_v45 = vpop.f32.mrb[229].mxu1  ;;  %7458 = vmatmul.mubr.msk.f32.gmra.mrb[78].mxu1 %vm271_vm2, %v4394_v50  ;;  %7582 = vmatprep.mubr.msk.f32.mxu0 %vm7654_vm1, %v7653_v1  ;;  %v3738_v0 = vadd.f32 %v3582_v41, %v3299_v33  ;;  %v4401_v50 = vld [vmem:[#allocation2 + $0x11d] sm:$0xff] }
 0x2bb   : > { %7460 = vmatprep.mubr.msk.f32.mxu1 %vm7654_vm1, %v7653_v1  ;;  %4340 = vst [vmem:[%s8185_s17 + $0x58] sm:$0xff] %v4299_v52  ;;  %v3306_v33 = vld [vmem:[%s8185_s17 + $0x98] sm:$0xff] }
 0x2bc   : > { %v4144_v58 = vpop.f32.mrb[230].mxu0 }
 0x2bd   : > { %v3587_v53 = vpop.f32.mrb[230].mxu1  ;;  %v4300_v60 = vadd.f32 %v4144_v58, %v3738_v0  ;;  %v7298_v35 = vpop.f32.mrb[231].mxu0  ;;  %7583 = vmatmul.mubr.msk.f32.gmra.mrb[80].mxu0 %vm271_vm2, %v4956_v57  ;;  %v4963_v57 = vld [vmem:[#allocation2 + $0x11e] sm:$0xff] }
 0x2be   : > { %v7176_v54 = vpop.f32.mrb[231].mxu1  ;;  %7461 = vmatmul.mubr.msk.f32.gmra.mrb[80].mxu1 %vm271_vm2, %v4395_v11  ;;  %7585 = vmatprep.mubr.msk.f32.mxu0 %vm7654_vm1, %v7653_v1  ;;  %v3739_v6 = vadd.f32 %v3587_v53, %v3300_v61  ;;  %v4402_v11 = vld [vmem:[#allocation2 + $0x125] sm:$0xff] }
 0x2bf   : > { %7463 = vmatprep.mubr.msk.f32.mxu1 %vm7654_vm1, %v7653_v1  ;;  %4341 = vst [vmem:[%s8185_s17 + $0x60] sm:$0xff] %v4300_v60  ;;  %v3307_v61 = vld [vmem:[%s8185_s17 + $0xa0] sm:$0xff] }
 0x2c0   : > { %v4149_v2 = vpop.f32.mrb[232].mxu0 }
 0x2c1   : > { %v3592_v32 = vpop.f32.mrb[232].mxu1  ;;  %v4301_v37 = vadd.f32 %v4149_v2, %v3739_v6  ;;  %v7301_v3 = vpop.f32.mrb[233].mxu0  ;;  %7586 = vmatmul.mubr.msk.f32.gmra.mrb[82].mxu0 %vm271_vm2, %v4957_v17  ;;  %v4964_v17 = vld [vmem:[#allocation2 + $0x126] sm:$0xff] }
 0x2c2   : > { %v7179_v56 = vpop.f32.mrb[233].mxu1  ;;  %7464 = vmatmul.mubr.msk.f32.gmra.mrb[82].mxu1 %vm271_vm2, %v4396_v63  ;;  %7588 = vmatprep.mubr.msk.f32.mxu0 %vm7654_vm1, %v7653_v1  ;;  %v3740_v23 = vadd.f32 %v3592_v32, %v3301_v4  ;;  %v4403_v63 = vld [vmem:[#allocation2 + $0x12d] sm:$0xff] }
 0x2c3   : > { %7466 = vmatprep.mubr.msk.f32.mxu1 %vm7654_vm1, %v7653_v1  ;;  %4342 = vst [vmem:[%s8185_s17 + $0x68] sm:$0xff] %v4301_v37  ;;  %v3308_v4 = vld [vmem:[%s8185_s17 + $0xa8] sm:$0xff] }
 0x2c4   : > { %v4154_v43 = vpop.f32.mrb[234].mxu0 }
 0x2c5   : > { %v3597_v8 = vpop.f32.mrb[234].mxu1  ;;  %v4302_v9 = vadd.f32 %v4154_v43, %v3740_v23  ;;  %v7304_v10 = vpop.f32.mrb[235].mxu0  ;;  %7589 = vmatmul.mubr.msk.f32.gmra.mrb[84].mxu0 %vm271_vm2, %v4958_v12  ;;  %v4965_v12 = vld [vmem:[#allocation2 + $0x12e] sm:$0xff] }
 0x2c6   : > { %v7182_v40 = vpop.f32.mrb[235].mxu1  ;;  %7467 = vmatmul.mubr.msk.f32.gmra.mrb[84].mxu1 %vm271_vm2, %v4397_v7  ;;  %7591 = vmatprep.mubr.msk.f32.mxu0 %vm7654_vm1, %v7653_v1  ;;  %v3741_v29 = vadd.f32 %v3597_v8, %v3302_v13  ;;  %v4404_v7 = vld [vmem:[#allocation2 + $0x135] sm:$0xff] }
 0x2c7   : > { %7469 = vmatprep.mubr.msk.f32.mxu1 %vm7654_vm1, %v7653_v1  ;;  %4343 = vst [vmem:[%s8185_s17 + $0x70] sm:$0xff] %v4302_v9  ;;  %v3309_v13 = vld [vmem:[%s8185_s17 + $0xb0] sm:$0xff] }
 0x2c8   : > { %v4159_v15 = vpop.f32.mrb[236].mxu0 }
 0x2c9   : > { %v3602_v42 = vpop.f32.mrb[236].mxu1  ;;  %v9192_v16 = vadd.f32 %v4159_v15, %v3741_v29  ;;  %v7307_v19 = vpop.f32.mrb[237].mxu0  ;;  %7592 = vmatmul.mubr.msk.f32.gmra.mrb[86].mxu0 %vm271_vm2, %v4959_v14  ;;  %v4966_v14 = vld [vmem:[#allocation2 + $0x136] sm:$0xff] }
 0x2ca   : > { %v7185_v55 = vpop.f32.mrb[237].mxu1  ;;  %7470 = vmatmul.mubr.msk.f32.gmra.mrb[86].mxu1 %vm271_vm2, %v4398_v18  ;;  %7594 = vmatprep.mubr.msk.f32.mxu0 %vm7654_vm1, %v7653_v1  ;;  %v3742_v39 = vadd.f32 %v3602_v42, %v3303_v22  ;;  %v4405_v18 = vld [vmem:[#allocation2 + $0x13d] sm:$0xff] }
 0x2cb   : > { %7472 = vmatprep.mubr.msk.f32.mxu1 %vm7654_vm1, %v7653_v1 }
 0x2cc   : > { %v4164_v24 = vpop.f32.mrb[238].mxu0 }
 0x2cd   : > { %v3607_v21 = vpop.f32.mrb[238].mxu1  ;;  %v9201_v62 = vadd.f32 %v4164_v24, %v3742_v39  ;;  %v7310_v27 = vpop.f32.mrb[239].mxu0  ;;  %7595 = vmatmul.mubr.msk.f32.gmra.mrb[88].mxu0 %vm271_vm2, %v4960_v20  ;;  %v4406_v20 = vld [vmem:[#allocation2 + $0x145] sm:$0xff] }
 0x2ce   : > { %v7188_v46 = vpop.f32.mrb[239].mxu1  ;;  %7473 = vmatmul.mubr.msk.f32.gmra.mrb[88].mxu1 %vm271_vm2, %v4399_v44  ;;  %7597 = vmatprep.mubr.msk.f32.mxu0 %vm7654_vm1, %v7653_v1  ;;  %v3743_v51 = vadd.f32 %v3607_v21, %v3304_v25  ;;  %v3310_v44 = vld [vmem:[%s8185_s17 + $0xb8] sm:$0xff] }
 0x2cf   : > { %7475 = vmatprep.mubr.msk.f32.mxu1 %vm7654_vm1, %v7653_v1  ;;  %v4967_v39 = vld [vmem:[#allocation2 + $0x13e] sm:$0xff] }
 0x2d0   : > { %v4169_v30 = vpop.f32.mrb[240].mxu0 }
 0x2d1   : > { %v3612_v48 = vpop.f32.mrb[240].mxu1  ;;  %v9210_v36 = vadd.f32 %v4169_v30, %v3743_v51  ;;  %v7313_v38 = vpop.f32.mrb[241].mxu0  ;;  %7598 = vmatmul.mubr.msk.f32.gmra.mrb[90].mxu0 %vm271_vm2, %v4961_v28  ;;  %v3311_v28 = vld [vmem:[%s8185_s17 + $0xc0] sm:$0xff]  ;;  %v4407_v51 = vld [vmem:[#allocation2 + $0x14d] sm:$0xff] }
 0x2d2   : > { %v7191_v34 = vpop.f32.mrb[241].mxu1  ;;  %7476 = vmatmul.mubr.msk.f32.gmra.mrb[90].mxu1 %vm271_vm2, %v4400_v26  ;;  %7600 = vmatprep.mubr.msk.f32.mxu0 %vm7654_vm1, %v7653_v1  ;;  %v3744_v59 = vadd.f32 %v3612_v48, %v3305_v5  ;;  %v4968_v48 = vld [vmem:[#allocation2 + $0x146] sm:$0xff] }
 0x2d3   : > { %7478 = vmatprep.mubr.msk.f32.mxu1 %vm7654_vm1, %v7653_v1 }
 0x2d4   : > { %v4174_v47 = vpop.f32.mrb[242].mxu0 }
 0x2d5   : > { %v3617_v41 = vpop.f32.mrb[242].mxu1  ;;  %v9219_v52 = vadd.f32 %v4174_v47, %v3744_v59  ;;  %v7316_v49 = vpop.f32.mrb[243].mxu0  ;;  %7601 = vmatmul.mubr.msk.f32.gmra.mrb[92].mxu0 %vm271_vm2, %v4962_v31  ;;  %v3312_v59 = vld [vmem:[%s8185_s17 + $0xc8] sm:$0xff] }
 0x2d6   : > { %v7194_v45 = vpop.f32.mrb[243].mxu1  ;;  %7479 = vmatmul.mubr.msk.f32.gmra.mrb[92].mxu1 %vm271_vm2, %v4401_v50  ;;  %7603 = vmatprep.mubr.msk.f32.mxu0 %vm7654_vm1, %v7653_v1  ;;  %v3745_v0 = vadd.f32 %v3617_v41, %v3306_v33  ;;  %v4408_v41 = vld [vmem:[#allocation2 + $0x155] sm:$0xff] }
 0x2d7   : > { %7481 = vmatprep.mubr.msk.f32.mxu1 %vm7654_vm1, %v7653_v1  ;;  %v4969_v47 = vld [vmem:[#allocation2 + $0x14e] sm:$0xff] }
 0x2d8   : > { %v4179_v58 = vpop.f32.mrb[244].mxu0 }
 0x2d9   : > { %v3622_v53 = vpop.f32.mrb[244].mxu1  ;;  %v9228_v60 = vadd.f32 %v4179_v58, %v3745_v0  ;;  %v7319_v35 = vpop.f32.mrb[245].mxu0  ;;  %7604 = vmatmul.mubr.msk.f32.gmra.mrb[94].mxu0 %vm271_vm2, %v4963_v57  ;;  %v4409_v58 = vld [vmem:[#allocation2 + $0x15d] sm:$0xff] }
 0x2da   : > { %v7197_v54 = vpop.f32.mrb[245].mxu1  ;;  %7482 = vmatmul.mubr.msk.f32.gmra.mrb[94].mxu1 %vm271_vm2, %v4402_v11  ;;  %7606 = vmatprep.mubr.msk.f32.mxu0 %vm7654_vm1, %v7653_v1  ;;  %v3746_v6 = vadd.f32 %v3622_v53, %v3307_v61  ;;  %v3313_v53 = vld [vmem:[%s8185_s17 + $0xd0] sm:$0xff] }
 0x2db   : > { %7484 = vmatprep.mubr.msk.f32.mxu1 %vm7654_vm1, %v7653_v1  ;;  %v4970_v54 = vld [vmem:[#allocation2 + $0x156] sm:$0xff] }
 0x2dc   : > { %v4184_v2 = vpop.f32.mrb[246].mxu0 }
 0x2dd   : > { %v3627_v32 = vpop.f32.mrb[246].mxu1  ;;  %v9237_v37 = vadd.f32 %v4184_v2, %v3746_v6  ;;  %v7322_v3 = vpop.f32.mrb[247].mxu0  ;;  %7607 = vmatmul.mubr.msk.f32.gmra.mrb[96].mxu0 %vm271_vm2, %v4964_v17  ;;  %v3314_v2 = vld [vmem:[%s8185_s17 + $0xd8] sm:$0xff] }
 0x2de   : > { %v7200_v56 = vpop.f32.mrb[247].mxu1  ;;  %7485 = vmatmul.mubr.msk.f32.gmra.mrb[96].mxu1 %vm271_vm2, %v4403_v63  ;;  %7609 = vmatprep.mubr.msk.f32.mxu0 %vm7654_vm1, %v7653_v1  ;;  %v3747_v23 = vadd.f32 %v3627_v32, %v3308_v4  ;;  %v4971_v3 = vld [vmem:[#allocation2 + $0x15e] sm:$0xff] }
 0x2df   : > { %7487 = vmatprep.mubr.msk.f32.mxu1 %vm7654_vm1, %v7653_v1  ;;  %v4410_v56 = vld [vmem:[#allocation2 + $0x165] sm:$0xff] }
 0x2e0   : > { %v4189_v43 = vpop.f32.mrb[248].mxu0 }
 0x2e1   : > { %v3632_v8 = vpop.f32.mrb[248].mxu1  ;;  %v9246_v9 = vadd.f32 %v4189_v43, %v3747_v23  ;;  %v7325_v10 = vpop.f32.mrb[249].mxu0  ;;  %7610 = vmatmul.mubr.msk.f32.gmra.mrb[98].mxu0 %vm271_vm2, %v4965_v12 }
 0x2e2   : > { %v7203_v40 = vpop.f32.mrb[249].mxu1  ;;  %7488 = vmatmul.mubr.msk.f32.gmra.mrb[98].mxu1 %vm271_vm2, %v4404_v7  ;;  %7612 = vmatprep.mubr.msk.f32.mxu0 %vm7654_vm1, %v7653_v1  ;;  %v3748_v29 = vadd.f32 %v3632_v8, %v3309_v13  ;;  %v4972_v10 = vld [vmem:[#allocation2 + $0x166] sm:$0xff] }
 0x2e3   : > { %7490 = vmatprep.mubr.msk.f32.mxu1 %vm7654_vm1, %v7653_v1  ;;  %v3315_v40 = vld [vmem:[%s8185_s17 + $0xe0] sm:$0xff] }
 0x2e4   : > { %v4194_v15 = vpop.f32.mrb[250].mxu0 }
 0x2e5   : > { %v3637_v42 = vpop.f32.mrb[250].mxu1  ;;  %v9255_v19 = vadd.f32 %v4194_v15, %v3748_v29  ;;  %v7328_v22 = vpop.f32.mrb[251].mxu0  ;;  %7613 = vmatmul.mubr.msk.f32.gmra.mrb[100].mxu0 %vm271_vm2, %v4966_v14 }
 0x2e6   : > { %v7206_v55 = vpop.f32.mrb[251].mxu1  ;;  %7491 = vmatmul.mubr.msk.f32.gmra.mrb[100].mxu1 %vm271_vm2, %v4405_v18  ;;  %7615 = vmatprep.mubr.msk.f32.mxu0 %vm7654_vm1, %v7653_v1  ;;  %v3749_v21 = vadd.f32 %v3637_v42, %v3310_v44 }
 0x2e7   : > { %7493 = vmatprep.mubr.msk.f32.mxu1 %vm7654_vm1, %v7653_v1  ;;  %v3316_v55 = vld [vmem:[%s8185_s17 + $0xe8] sm:$0xff] }
 0x2e8   : > { %v4199_v46 = vpop.f32.mrb[252].mxu0 }
 0x2e9   : > { %v3642_v24 = vpop.f32.mrb[252].mxu1  ;;  %v9264_v25 = vadd.f32 %v4199_v46, %v3749_v21  ;;  %v7331_v26 = vpop.f32.mrb[253].mxu0  ;;  %7616 = vmatmul.mubr.msk.f32.gmra.mrb[102].mxu0 %vm271_vm2, %v4967_v39 }
 0x2ea   : > { %v7209_v27 = vpop.f32.mrb[253].mxu1  ;;  %7494 = vmatmul.mubr.msk.f32.gmra.mrb[102].mxu1 %vm271_vm2, %v4406_v20  ;;  %7618 = vmatprep.mubr.msk.f32.mxu0 %vm7654_vm1, %v7653_v1  ;;  %v3750_v30 = vadd.f32 %v3642_v24, %v3311_v28  ;;  %v3317_v24 = vld [vmem:[%s8185_s17 + $0xf0] sm:$0xff] }
 0x2eb   : > { %7496 = vmatprep.mubr.msk.f32.mxu1 %vm7654_vm1, %v7653_v1 }
 0x2ec   : > { %v4204_v38 = vpop.f32.mrb[254].mxu0 }
 0x2ed   : > { %v3647_v34 = vpop.f32.mrb[254].mxu1  ;;  %v9273_v50 = vadd.f32 %v4204_v38, %v3750_v30  ;;  %v7334_v31 = vpop.f32.mrb[255].mxu0  ;;  %7619 = vmatmul.mubr.msk.f32.gmra.mrb[104].mxu0 %vm271_vm2, %v4968_v48  ;;  %v3318_v30 = vld [vmem:[%s8185_s17 + $0xf8] sm:$0xff] }
 0x2ee   : > { %v7212_v5 = vpop.f32.mrb[255].mxu1  ;;  %7497 = vmatmul.mubr.msk.f32.gmra.mrb[104].mxu1 %vm271_vm2, %v4407_v51  ;;  %7621 = vmatprep.mubr.msk.f32.mxu0 %vm7654_vm1, %v7653_v1  ;;  %v3751_v45 = vadd.f32 %v3647_v34, %v3312_v59 }
 0x2ef   : > { %7499 = vmatprep.mubr.msk.f32.mxu1 %vm7654_vm1, %v7653_v1 }
 0x2f0   : > { %v4209_v33 = vpop.f32.mrb[0].mxu0 }
 0x2f1   : > { %v3652_v49 = vpop.f32.mrb[0].mxu1  ;;  %v9282_v57 = vadd.f32 %v4209_v33, %v3751_v45  ;;  %v7337_v0 = vpop.f32.mrb[1].mxu0  ;;  %7622 = vmatmul.mubr.msk.f32.gmra.mrb[106].mxu0 %vm271_vm2, %v4969_v47  ;;  %v3319_v47 = vld [vmem:[%s8185_s17 + $0x100] sm:$0xff] }
 0x2f2   : > { %v7215_v11 = vpop.f32.mrb[1].mxu1  ;;  %7500 = vmatmul.mubr.msk.f32.gmra.mrb[106].mxu1 %vm271_vm2, %v4408_v41  ;;  %7624 = vmatprep.mubr.msk.f32.mxu0 %vm7654_vm1, %v7653_v1  ;;  %v3752_v35 = vadd.f32 %v3652_v49, %v3313_v53 }
 0x2f3   : > { %7502 = vmatprep.mubr.msk.f32.mxu1 %vm7654_vm1, %v7653_v1 }
 0x2f4   : > { %v4214_v63 = vpop.f32.mrb[2].mxu0 }
 0x2f5   : > { %v3657_v61 = vpop.f32.mrb[2].mxu1  ;;  %v9291_v6 = vadd.f32 %v4214_v63, %v3752_v35  ;;  %v7340_v32 = vpop.f32.mrb[3].mxu0  ;;  %7625 = vmatmul.mubr.msk.f32.gmra.mrb[108].mxu0 %vm271_vm2, %v4970_v54 }
 0x2f6   : > { %v7218_v17 = vpop.f32.mrb[3].mxu1  ;;  %7503 = vmatmul.mubr.msk.f32.gmra.mrb[108].mxu1 %vm271_vm2, %v4409_v58  ;;  %7627 = vmatprep.mubr.msk.f32.mxu0 %vm7654_vm1, %v7653_v1  ;;  %v3753_v4 = vadd.f32 %v3657_v61, %v3314_v2  ;;  %v3320_v58 = vld [vmem:[%s8185_s17 + $0x108] sm:$0xff]  ;;  %v3321_v2 = vld [vmem:[%s8185_s17 + $0x110] sm:$0xff] }
 0x2f7   : > { %7505 = vmatprep.mubr.msk.f32.mxu1 %vm7654_vm1, %v7653_v1 }
 0x2f8   : > { %v4219_v12 = vpop.f32.mrb[4].mxu0 }
 0x2f9   : > { %v3662_v7 = vpop.f32.mrb[4].mxu1  ;;  %v9300_v8 = vadd.f32 %v4219_v12, %v3753_v4  ;;  %v7343_v43 = vpop.f32.mrb[5].mxu0  ;;  %7628 = vmatmul.mubr.msk.f32.gmra.mrb[110].mxu0 %vm271_vm2, %v4971_v3 }
 0x2fa   : > { %v7221_v23 = vpop.f32.mrb[5].mxu1  ;;  %7506 = vmatmul.mubr.msk.f32.gmra.mrb[110].mxu1 %vm271_vm2, %v4410_v56  ;;  %7630 = vmatprep.mubr.msk.f32.mxu0 %vm7654_vm1, %v7653_v1  ;;  %v3754_v13 = vadd.f32 %v3662_v7, %v3315_v40  ;;  %v3322_v43 = vld [vmem:[%s8185_s17 + $0x118] sm:$0xff] }
 0x2fc   : > { %v4224_v14 = vpop.f32.mrb[6].mxu0 }
 0x2fd   : > { %v3667_v18 = vpop.f32.mrb[6].mxu1  ;;  %v9306_v42 = vadd.f32 %v4224_v14, %v3754_v13  ;;  %v7346_v15 = vpop.f32.mrb[7].mxu0  ;;  %7631 = vmatmul.mubr.msk.f32.gmra.mrb[112].mxu0 %vm271_vm2, %v4972_v10 }
 0x2fe   : > { %v7224_v29 = vpop.f32.mrb[7].mxu1  ;;  %v3755_v22 = vadd.f32 %v3667_v18, %v3316_v55  ;;  %v3323_v15 = vld [vmem:[%s8185_s17 + $0x120] sm:$0xff] }
 0x300   : > { %v4229_v20 = vpop.f32.mrb[8].mxu0 }
 0x301   : > { %v3672_v44 = vpop.f32.mrb[8].mxu1  ;;  %v9310_v21 = vadd.f32 %v4229_v20, %v3755_v22  ;;  %v7349_v1 = vpop.f32.mrb[9].mxu0 }
 0x302   : > { %v7227_v39 = vpop.f32.mrb[9].mxu1  ;;  %v3756_v46 = vadd.f32 %v3672_v44, %v3317_v24  ;;  %v3324_v24 = vld [vmem:[%s8185_s17 + $0x128] sm:$0xff] }
 0x304   : > { %v4234_v26 = vpop.f32.mrb[10].mxu0 }
 0x305   : > { %v3677_v27 = vpop.f32.mrb[10].mxu1  ;;  %v9313_v51 = vadd.f32 %v4234_v26, %v3756_v46  ;;  %v7352_v48 = vpop.f32.mrb[11].mxu0 }
 0x306   : > { %v7230_v28 = vpop.f32.mrb[11].mxu1  ;;  %v3757_v34 = vadd.f32 %v3677_v27, %v3318_v30 }
 0x308   : > { %v4239_v5 = vpop.f32.mrb[12].mxu0 }
 0x309   : > { %v3682_v38 = vpop.f32.mrb[12].mxu1  ;;  %v9316_v59 = vadd.f32 %v4239_v5, %v3757_v34  ;;  %v7355_v41 = vpop.f32.mrb[13].mxu0  ;;  %v3325_v34 = vld [vmem:[%s8185_s17 + $0x130] sm:$0xff] }
 0x30a   : > { %v7233_v31 = vpop.f32.mrb[13].mxu1  ;;  %v3758_v45 = vadd.f32 %v3682_v38, %v3319_v47 }
 0x30c   : > { %v4244_v33 = vpop.f32.mrb[14].mxu0 }
 0x30d   : > { %v3687_v49 = vpop.f32.mrb[14].mxu1  ;;  %v9319_v0 = vadd.f32 %v4244_v33, %v3758_v45  ;;  %v7358_v53 = vpop.f32.mrb[15].mxu0 }
 0x30e   : > { %v7236_v11 = vpop.f32.mrb[15].mxu1  ;;  %v3759_v54 = vadd.f32 %v3687_v49, %v3320_v58  ;;  %v3326_v49 = vld [vmem:[%s8185_s17 + $0x138] sm:$0xff] }
 0x310   : > { %v4249_v61 = vpop.f32.mrb[16].mxu0 }
 0x311   : > { %v3692_v35 = vpop.f32.mrb[16].mxu1  ;;  %v9322_v17 = vadd.f32 %v4249_v61, %v3759_v54  ;;  %v7361_v32 = vpop.f32.mrb[17].mxu0  ;;  %v3327_v61 = vld [vmem:[%s8185_s17 + $0x140] sm:$0xff] }
 0x312   : > { %v7239_v63 = vpop.f32.mrb[17].mxu1  ;;  %v3760_v56 = vadd.f32 %v3692_v35, %v3321_v2 }
 0x314   : > { %v4254_v4 = vpop.f32.mrb[18].mxu0 }
 0x315   : > { %v3697_v3 = vpop.f32.mrb[18].mxu1  ;;  %v9325_v12 = vadd.f32 %v4254_v4, %v3760_v56  ;;  %v7364_v23 = vpop.f32.mrb[19].mxu0 }
 0x316   : > { %v7242_v7 = vpop.f32.mrb[19].mxu1  ;;  %v3761_v40 = vadd.f32 %v3697_v3, %v3322_v43 }
 0x317   : > { %v4411_v7 = vld [vmem:[%s8185_s17] sm:$0xff] }
 0x318   : > { %v4259_v13 = vpop.f32.mrb[20].mxu0 }
 0x319   : > { %v3702_v10 = vpop.f32.mrb[20].mxu1  ;;  %v4323_v14 = vadd.f32 %v4259_v13, %v3761_v40  ;;  %v7367_v29 = vpop.f32.mrb[21].mxu0 }
 0x31a   : > { %v7245_v18 = vpop.f32.mrb[21].mxu1  ;;  %v3762_v55 = vadd.f32 %v3702_v10, %v3323_v15  ;;  %v9343_v10 = vld [vmem:[%s9473_s3] ss:$0 sm:$0xff]  ;;  %v4412_v29 = vld [vmem:[%s8185_s17 + $0x8] sm:$0xff] }
 0x31b   : > { %4364 = vst [vmem:[%s8185_s17 + $0x118] sm:$0xff] %v4323_v14 }
 0x31c   : > { %v4264_v44 = vpop.f32.mrb[22].mxu0 }
 0x31d   : > { %v3707_v22 = vpop.f32.mrb[22].mxu1  ;;  %v4324_v39 = vadd.f32 %v4264_v44, %v3762_v55  ;;  %v7370_v1 = vpop.f32.mrb[23].mxu0 }
 0x31e   : > { %v7248_v20 = vpop.f32.mrb[23].mxu1  ;;  %v3763_v46 = vadd.f32 %v3707_v22, %v3324_v24 }
 0x31f   : > { %4365 = vst [vmem:[%s8185_s17 + $0x120] sm:$0xff] %v4324_v39 }
 0x320   : > { %v4269_v26 = vpop.f32.mrb[24].mxu0 }
 0x321   : > { %v3712_v27 = vpop.f32.mrb[24].mxu1  ;;  %v4325_v48 = vadd.f32 %v4269_v26, %v3763_v46  ;;  %v7373_v30 = vpop.f32.mrb[25].mxu0  ;;  %v4413_v46 = vld [vmem:[%s8185_s17 + $0x10] sm:$0xff] }
 0x322   : > { %v7251_v28 = vpop.f32.mrb[25].mxu1  ;;  %v3764_v38 = vadd.f32 %v3712_v27, %v3325_v34 }
 0x323   : > { %4366 = vst [vmem:[%s8185_s17 + $0x128] sm:$0xff] %v4325_v48 }
 0x324   : > { %v4274_v31 = vpop.f32.mrb[26].mxu0 }
 0x325   : > { %v3717_v5 = vpop.f32.mrb[26].mxu1  ;;  %v4326_v47 = vadd.f32 %v4274_v31, %v3764_v38  ;;  %v7376_v45 = vpop.f32.mrb[27].mxu0  ;;  %v4414_v31 = vld [vmem:[%s8185_s17 + $0x18] sm:$0xff] }
 0x326   : > { %v7254_v41 = vpop.f32.mrb[27].mxu1  ;;  %v3765_v33 = vadd.f32 %v3717_v5, %v3326_v49 }
 0x327   : > { %4367 = vst [vmem:[%s8185_s17 + $0x130] sm:$0xff] %v4326_v47 }
 0x328   : > { %v4279_v53 = vpop.f32.mrb[28].mxu0 }
 0x329   : > { %v3722_v11 = vpop.f32.mrb[28].mxu1  ;;  %v4327_v54 = vadd.f32 %v4279_v53, %v3765_v33  ;;  %v7379_v35 = vpop.f32.mrb[29].mxu0 }
 0x32a   : > { %v7257_v58 = vpop.f32.mrb[29].mxu1  ;;  %v3766_v63 = vadd.f32 %v3722_v11, %v3327_v61 }
 0x32b   : > { %4368 = vst [vmem:[%s8185_s17 + $0x138] sm:$0xff] %v4327_v54  ;;  %v4415_v54 = vld [vmem:[%s8185_s17 + $0x20] sm:$0xff] }
 0x32c   : > { %v4284_v2 = vpop.f32.mrb[30].mxu0 }
 0x32d   : > { %v4646_v32 = vpop.f32.mrb[30].mxu1  ;;  %v4328_v3 = vadd.f32 %v4284_v2, %v3766_v63  ;;  %v7382_v4 = vpop.f32.mrb[31].mxu0 }
 0x32e   : > { %v7387_v56 = vpop.f32.mrb[31].mxu1  ;;  %v4850_v23 = vadd.f32 %v4646_v32, %v4411_v7  ;;  %v4416_v7 = vld [vmem:[%s8185_s17 + $0x28] sm:$0xff] }
 0x32f   : > { %4369 = vst [vmem:[%s8185_s17 + $0x140] sm:$0xff] %v4328_v3 }
 0x330   : > { %v5208_v40 = vpop.f32.mrb[32].mxu0 }
 0x331   : > { %v4651_v43 = vpop.f32.mrb[32].mxu1  ;;  %v5412_v18 = vadd.f32 %v5208_v40, %v4850_v23  ;;  %v7512_v14 = vpop.f32.mrb[33].mxu0 }
 0x332   : > { %v7390_v13 = vpop.f32.mrb[33].mxu1  ;;  %v4851_v15 = vadd.f32 %v4651_v43, %v4412_v29 }
 0x333   : > { %v5542_v55 = vadd.f32 %v9343_v10, %v5412_v18 }
 0x334   : > { %v5213_v44 = vpop.f32.mrb[34].mxu0 }
 0x335   : > { %v4656_v22 = vpop.f32.mrb[34].mxu1  ;;  %v5583_v39 = vmax.f32 %v5542_v55, 0.0  ;;  %v5413_v1 = vadd.f32 %v5213_v44, %v4851_v15  ;;  %v7515_v24 = vpop.f32.mrb[35].mxu0  ;;  %v4417_v55 = vld [vmem:[%s8185_s17 + $0x30] sm:$0xff] }
 0x336   : > { %v7393_v20 = vpop.f32.mrb[35].mxu1  ;;  %v4852_v27 = vadd.f32 %v4656_v22, %v4413_v46 }
 0x337   : > { %5624 = vst [vmem:[%s8185_s17] sm:$0xff] %v5583_v39  ;;  %v5543_v26 = vadd.f32 %v9343_v10, %v5413_v1 }
 0x338   : > { %v5218_v48 = vpop.f32.mrb[36].mxu0 }
 0x339   : > { %v4661_v28 = vpop.f32.mrb[36].mxu1  ;;  %v5584_v34 = vmax.f32 %v5543_v26, 0.0  ;;  %v5414_v38 = vadd.f32 %v5218_v48, %v4852_v27  ;;  %v7518_v5 = vpop.f32.mrb[37].mxu0  ;;  %v4418_v26 = vld [vmem:[%s8185_s17 + $0x38] sm:$0xff] }
 0x33a   : > { %v7396_v30 = vpop.f32.mrb[37].mxu1  ;;  %v4853_v41 = vadd.f32 %v4661_v28, %v4414_v31 }
 0x33b   : > { %5625 = vst [vmem:[%s8185_s17 + $0x8] sm:$0xff] %v5584_v34  ;;  %v5544_v47 = vadd.f32 %v9343_v10, %v5414_v38 }
 0x33c   : > { %v5223_v49 = vpop.f32.mrb[38].mxu0 }
 0x33d   : > { %v4666_v45 = vpop.f32.mrb[38].mxu1  ;;  %v5585_v11 = vmax.f32 %v5544_v47, 0.0  ;;  %v5415_v53 = vadd.f32 %v5223_v49, %v4853_v41  ;;  %v7521_v58 = vpop.f32.mrb[39].mxu0  ;;  %v4419_v47 = vld [vmem:[%s8185_s17 + $0x40] sm:$0xff] }
 0x33e   : > { %v7399_v33 = vpop.f32.mrb[39].mxu1  ;;  %v4854_v35 = vadd.f32 %v4666_v45, %v4415_v54 }
 0x33f   : > { %5626 = vst [vmem:[%s8185_s17 + $0x10] sm:$0xff] %v5585_v11  ;;  %v5545_v61 = vadd.f32 %v9343_v10, %v5415_v53 }
 0x340   : > { %v5228_v32 = vpop.f32.mrb[40].mxu0 }
 0x341   : > { %v4671_v63 = vpop.f32.mrb[40].mxu1  ;;  %v5586_v56 = vmax.f32 %v5545_v61, 0.0  ;;  %v5416_v3 = vadd.f32 %v5228_v32, %v4854_v35  ;;  %v7524_v4 = vpop.f32.mrb[41].mxu0  ;;  %v4420_v61 = vld [vmem:[%s8185_s17 + $0x48] sm:$0xff] }
 0x342   : > { %v7402_v2 = vpop.f32.mrb[41].mxu1  ;;  %v4855_v23 = vadd.f32 %v4671_v63, %v4416_v7 }
 0x343   : > { %5627 = vst [vmem:[%s8185_s17 + $0x18] sm:$0xff] %v5586_v56  ;;  %v5546_v43 = vadd.f32 %v9343_v10, %v5416_v3 }
 0x344   : > { %v5233_v13 = vpop.f32.mrb[42].mxu0 }
 0x345   : > { %v4676_v40 = vpop.f32.mrb[42].mxu1  ;;  %v5587_v14 = vmax.f32 %v5546_v43, 0.0  ;;  %v5417_v29 = vadd.f32 %v5233_v13, %v4855_v23  ;;  %v7527_v15 = vpop.f32.mrb[43].mxu0  ;;  %v4421_v43 = vld [vmem:[%s8185_s17 + $0x50] sm:$0xff] }
 0x346   : > { %v7405_v18 = vpop.f32.mrb[43].mxu1  ;;  %v4856_v22 = vadd.f32 %v4676_v40, %v4417_v55 }
 0x347   : > { %5628 = vst [vmem:[%s8185_s17 + $0x20] sm:$0xff] %v5587_v14  ;;  %v5547_v44 = vadd.f32 %v9343_v10, %v5417_v29 }
 0x348   : > { %v5238_v39 = vpop.f32.mrb[44].mxu0 }
 0x349   : > { %v4681_v20 = vpop.f32.mrb[44].mxu1  ;;  %v5588_v24 = vmax.f32 %v5547_v44, 0.0  ;;  %v5418_v46 = vadd.f32 %v5238_v39, %v4856_v22  ;;  %v7530_v27 = vpop.f32.mrb[45].mxu0  ;;  %v4422_v44 = vld [vmem:[%s8185_s17 + $0x58] sm:$0xff] }
 0x34a   : > { %v7408_v1 = vpop.f32.mrb[45].mxu1  ;;  %v4857_v28 = vadd.f32 %v4681_v20, %v4418_v26 }
 0x34b   : > { %5629 = vst [vmem:[%s8185_s17 + $0x28] sm:$0xff] %v5588_v24  ;;  %v5548_v48 = vadd.f32 %v9343_v10, %v5418_v46 }
 0x34c   : > { %v5243_v34 = vpop.f32.mrb[46].mxu0 }
 0x34d   : > { %v4686_v30 = vpop.f32.mrb[46].mxu1  ;;  %v5589_v5 = vmax.f32 %v5548_v48, 0.0  ;;  %v5419_v31 = vadd.f32 %v5243_v34, %v4857_v28  ;;  %v7533_v41 = vpop.f32.mrb[47].mxu0  ;;  %v4423_v48 = vld [vmem:[%s8185_s17 + $0x60] sm:$0xff] }
 0x34e   : > { %v7411_v38 = vpop.f32.mrb[47].mxu1  ;;  %v4858_v45 = vadd.f32 %v4686_v30, %v4419_v47 }
 0x34f   : > { %5630 = vst [vmem:[%s8185_s17 + $0x30] sm:$0xff] %v5589_v5  ;;  %v5549_v49 = vadd.f32 %v9343_v10, %v5419_v31 }
 0x350   : > { %v5248_v11 = vpop.f32.mrb[48].mxu0 }
 0x351   : > { %v4691_v33 = vpop.f32.mrb[48].mxu1  ;;  %v5590_v58 = vmax.f32 %v5549_v49, 0.0  ;;  %v5420_v54 = vadd.f32 %v5248_v11, %v4858_v45  ;;  %v7536_v35 = vpop.f32.mrb[49].mxu0  ;;  %v4424_v49 = vld [vmem:[%s8185_s17 + $0x68] sm:$0xff] }
 0x352   : > { %v7414_v53 = vpop.f32.mrb[49].mxu1  ;;  %v4859_v63 = vadd.f32 %v4691_v33, %v4420_v61 }
 0x353   : > { %5631 = vst [vmem:[%s8185_s17 + $0x38] sm:$0xff] %v5590_v58  ;;  %v5550_v32 = vadd.f32 %v9343_v10, %v5420_v54 }
 0x354   : > { %v5253_v56 = vpop.f32.mrb[50].mxu0 }
 0x355   : > { %v4696_v2 = vpop.f32.mrb[50].mxu1  ;;  %v5591_v4 = vmax.f32 %v5550_v32, 0.0  ;;  %v5421_v7 = vadd.f32 %v5253_v56, %v4859_v63  ;;  %v7539_v23 = vpop.f32.mrb[51].mxu0  ;;  %v4425_v32 = vld [vmem:[%s8185_s17 + $0x70] sm:$0xff] }
 0x356   : > { %v7417_v3 = vpop.f32.mrb[51].mxu1  ;;  %v4860_v40 = vadd.f32 %v4696_v2, %v4421_v43 }
 0x357   : > { %5632 = vst [vmem:[%s8185_s17 + $0x40] sm:$0xff] %v5591_v4  ;;  %v5551_v13 = vadd.f32 %v9343_v10, %v5421_v7 }
 0x358   : > { %v5258_v14 = vpop.f32.mrb[52].mxu0 }
 0x359   : > { %v4701_v18 = vpop.f32.mrb[52].mxu1  ;;  %v5592_v15 = vmax.f32 %v5551_v13, 0.0  ;;  %v5422_v55 = vadd.f32 %v5258_v14, %v4860_v40  ;;  %v7542_v22 = vpop.f32.mrb[53].mxu0 }
 0x35a   : > { %v7420_v29 = vpop.f32.mrb[53].mxu1  ;;  %v4861_v20 = vadd.f32 %v4701_v18, %v4422_v44 }
 0x35b   : > { %5633 = vst [vmem:[%s8185_s17 + $0x48] sm:$0xff] %v5592_v15  ;;  %v5552_v39 = vadd.f32 %v9343_v10, %v5422_v55 }
 0x35c   : > { %v5263_v24 = vpop.f32.mrb[54].mxu0 }
 0x35d   : > { %v4706_v1 = vpop.f32.mrb[54].mxu1  ;;  %v5593_v27 = vmax.f32 %v5552_v39, 0.0  ;;  %v5423_v26 = vadd.f32 %v5263_v24, %v4861_v20  ;;  %v7545_v28 = vpop.f32.mrb[55].mxu0 }
 0x35e   : > { %v7423_v46 = vpop.f32.mrb[55].mxu1  ;;  %v4862_v30 = vadd.f32 %v4706_v1, %v4423_v48 }
 0x35f   : > { %5634 = vst [vmem:[%s8185_s17 + $0x50] sm:$0xff] %v5593_v27  ;;  %v5553_v34 = vadd.f32 %v9343_v10, %v5423_v26 }
 0x360   : > { %v5268_v5 = vpop.f32.mrb[56].mxu0 }
 0x361   : > { %v4711_v38 = vpop.f32.mrb[56].mxu1  ;;  %v5594_v41 = vmax.f32 %v5553_v34, 0.0  ;;  %v5424_v47 = vadd.f32 %v5268_v5, %v4862_v30  ;;  %v7548_v45 = vpop.f32.mrb[57].mxu0 }
 0x362   : > { %v7426_v31 = vpop.f32.mrb[57].mxu1  ;;  %v4863_v33 = vadd.f32 %v4711_v38, %v4424_v49 }
 0x363   : > { %5635 = vst [vmem:[%s8185_s17 + $0x58] sm:$0xff] %v5594_v41  ;;  %v5554_v11 = vadd.f32 %v9343_v10, %v5424_v47 }
 0x364   : > { %v5273_v58 = vpop.f32.mrb[58].mxu0 }
 0x365   : > { %v4716_v53 = vpop.f32.mrb[58].mxu1  ;;  %v5595_v35 = vmax.f32 %v5554_v11, 0.0  ;;  %v5425_v61 = vadd.f32 %v5273_v58, %v4863_v33  ;;  %v7551_v63 = vpop.f32.mrb[59].mxu0 }
 0x366   : > { %v7429_v54 = vpop.f32.mrb[59].mxu1  ;;  %v4864_v2 = vadd.f32 %v4716_v53, %v4425_v32 }
 0x367   : > { %5636 = vst [vmem:[%s8185_s17 + $0x60] sm:$0xff] %v5595_v35  ;;  %v5555_v56 = vadd.f32 %v9343_v10, %v5425_v61 }
 0x368   : > { %v5278_v4 = vpop.f32.mrb[60].mxu0 }
 0x369   : > { %v4721_v3 = vpop.f32.mrb[60].mxu1  ;;  %v5596_v43 = vmax.f32 %v5555_v56, 0.0  ;;  %v5426_v40 = vadd.f32 %v5278_v4, %v4864_v2  ;;  %v7554_v13 = vpop.f32.mrb[61].mxu0 }
 0x36a   : > { %v4865_v7 = vadd.f32 %v4721_v3, %v9192_v16  ;;  %v7432_v23 = vpop.f32.mrb[61].mxu1 }
 0x36b   : > { %5637 = vst [vmem:[%s8185_s17 + $0x68] sm:$0xff] %v5596_v43  ;;  %v5556_v18 = vadd.f32 %v9343_v10, %v5426_v40 }
 0x36c   : > { %v5283_v29 = vpop.f32.mrb[62].mxu0 }
 0x36d   : > { %v4726_v14 = vpop.f32.mrb[62].mxu1  ;;  %v5597_v22 = vmax.f32 %v5556_v18, 0.0  ;;  %v5427_v44 = vadd.f32 %v5283_v29, %v4865_v7  ;;  %v7557_v20 = vpop.f32.mrb[63].mxu0 }
 0x36e   : > { %v4866_v15 = vadd.f32 %v4726_v14, %v9201_v62  ;;  %v7435_v55 = vpop.f32.mrb[63].mxu1 }
 0x36f   : > { %5638 = vst [vmem:[%s8185_s17 + $0x70] sm:$0xff] %v5597_v22  ;;  %v5557_v39 = vadd.f32 %v9343_v10, %v5427_v44 }
 0x370   : > { %v5288_v1 = vpop.f32.mrb[64].mxu0 }
 0x371   : > { %v4731_v16 = vpop.f32.mrb[64].mxu1  ;;  %v5598_v27 = vmax.f32 %v5557_v39, 0.0  ;;  %v5428_v26 = vadd.f32 %v5288_v1, %v4866_v15  ;;  %v7560_v28 = vpop.f32.mrb[65].mxu0 }
 0x372   : > { %v4867_v24 = vadd.f32 %v4731_v16, %v9210_v36  ;;  %v7438_v46 = vpop.f32.mrb[65].mxu1 }
 0x373   : > { %5639 = vst [vmem:[%s8185_s17 + $0x78] sm:$0xff] %v5598_v27  ;;  %v5558_v48 = vadd.f32 %v9343_v10, %v5428_v26 }
 0x374   : > { %v5293_v30 = vpop.f32.mrb[66].mxu0 }
 0x375   : > { %v4736_v62 = vpop.f32.mrb[66].mxu1  ;;  %v5599_v5 = vmax.f32 %v5558_v48, 0.0  ;;  %v5429_v31 = vadd.f32 %v5293_v30, %v4867_v24  ;;  %v7563_v41 = vpop.f32.mrb[67].mxu0 }
 0x376   : > { %v4868_v34 = vadd.f32 %v4736_v62, %v9219_v52  ;;  %v7441_v38 = vpop.f32.mrb[67].mxu1 }
 0x377   : > { %5640 = vst [vmem:[%s8185_s17 + $0x80] sm:$0xff] %v5599_v5  ;;  %v5559_v47 = vadd.f32 %v9343_v10, %v5429_v31 }
 0x378   : > { %v5298_v45 = vpop.f32.mrb[68].mxu0 }
 0x379   : > { %v4741_v36 = vpop.f32.mrb[68].mxu1  ;;  %v5600_v11 = vmax.f32 %v5559_v47, 0.0  ;;  %v5430_v53 = vadd.f32 %v5298_v45, %v4868_v34  ;;  %v7566_v58 = vpop.f32.mrb[69].mxu0 }
 0x37a   : > { %v4869_v49 = vadd.f32 %v4741_v36, %v9228_v60  ;;  %v7444_v33 = vpop.f32.mrb[69].mxu1 }
 0x37b   : > { %5641 = vst [vmem:[%s8185_s17 + $0x88] sm:$0xff] %v5600_v11  ;;  %v5560_v54 = vadd.f32 %v9343_v10, %v5430_v53 }
 0x37c   : > { %v5303_v35 = vpop.f32.mrb[70].mxu0 }
 0x37d   : > { %v4746_v52 = vpop.f32.mrb[70].mxu1  ;;  %v5601_v32 = vmax.f32 %v5560_v54, 0.0  ;;  %v5431_v2 = vadd.f32 %v5303_v35, %v4869_v49  ;;  %v7569_v56 = vpop.f32.mrb[71].mxu0 }
 0x37e   : > { %v4870_v61 = vadd.f32 %v4746_v52, %v9237_v37  ;;  %v7447_v63 = vpop.f32.mrb[71].mxu1 }
 0x37f   : > { %5642 = vst [vmem:[%s8185_s17 + $0x90] sm:$0xff] %v5601_v32  ;;  %v5561_v3 = vadd.f32 %v9343_v10, %v5431_v2 }
 0x380   : > { %v5308_v4 = vpop.f32.mrb[72].mxu0 }
 0x381   : > { %v4751_v60 = vpop.f32.mrb[72].mxu1  ;;  %v5602_v43 = vmax.f32 %v5561_v3, 0.0  ;;  %v5432_v40 = vadd.f32 %v5308_v4, %v4870_v61  ;;  %v7572_v13 = vpop.f32.mrb[73].mxu0 }
 0x382   : > { %v4871_v7 = vadd.f32 %v4751_v60, %v9246_v9  ;;  %v7450_v23 = vpop.f32.mrb[73].mxu1 }
 0x383   : > { %5643 = vst [vmem:[%s8185_s17 + $0x98] sm:$0xff] %v5602_v43  ;;  %v5562_v18 = vadd.f32 %v9343_v10, %v5432_v40 }
 0x384   : > { %v5313_v14 = vpop.f32.mrb[74].mxu0 }
 0x385   : > { %v4756_v37 = vpop.f32.mrb[74].mxu1  ;;  %v5603_v55 = vmax.f32 %v5562_v18, 0.0  ;;  %v5433_v22 = vadd.f32 %v5313_v14, %v4871_v7  ;;  %v7575_v44 = vpop.f32.mrb[75].mxu0 }
 0x386   : > { %v4872_v29 = vadd.f32 %v4756_v37, %v9255_v19  ;;  %v7453_v15 = vpop.f32.mrb[75].mxu1 }
 0x387   : > { %5644 = vst [vmem:[%s8185_s17 + $0xa0] sm:$0xff] %v5603_v55  ;;  %v5563_v20 = vadd.f32 %v9343_v10, %v5433_v22 }
 0x388   : > { %v5318_v39 = vpop.f32.mrb[76].mxu0 }
 0x389   : > { %v4761_v9 = vpop.f32.mrb[76].mxu1  ;;  %v5604_v24 = vmax.f32 %v5563_v20, 0.0  ;;  %v5434_v46 = vadd.f32 %v5318_v39, %v4872_v29  ;;  %v7578_v27 = vpop.f32.mrb[77].mxu0 }
 0x38a   : > { %v4873_v16 = vadd.f32 %v4761_v9, %v9264_v25  ;;  %v7456_v1 = vpop.f32.mrb[77].mxu1 }
 0x38b   : > { %5645 = vst [vmem:[%s8185_s17 + $0xa8] sm:$0xff] %v5604_v24  ;;  %v5564_v26 = vadd.f32 %v9343_v10, %v5434_v46 }
 0x38c   : > { %v5323_v28 = vpop.f32.mrb[78].mxu0 }
 0x38d   : > { %v4766_v19 = vpop.f32.mrb[78].mxu1  ;;  %v5605_v30 = vmax.f32 %v5564_v26, 0.0  ;;  %v5435_v34 = vadd.f32 %v5323_v28, %v4873_v16  ;;  %v7581_v38 = vpop.f32.mrb[79].mxu0 }
 0x38e   : > { %v4874_v48 = vadd.f32 %v4766_v19, %v9273_v50  ;;  %v7459_v62 = vpop.f32.mrb[79].mxu1 }
 0x38f   : > { %5646 = vst [vmem:[%s8185_s17 + $0xb0] sm:$0xff] %v5605_v30  ;;  %v5565_v5 = vadd.f32 %v9343_v10, %v5435_v34 }
 0x390   : > { %v5328_v31 = vpop.f32.mrb[80].mxu0 }
 0x391   : > { %v4771_v25 = vpop.f32.mrb[80].mxu1  ;;  %v5606_v36 = vmax.f32 %v5565_v5, 0.0  ;;  %v5436_v45 = vadd.f32 %v5328_v31, %v4874_v48  ;;  %v7584_v49 = vpop.f32.mrb[81].mxu0 }
 0x392   : > { %v4875_v41 = vadd.f32 %v4771_v25, %v9282_v57  ;;  %v7462_v47 = vpop.f32.mrb[81].mxu1 }
 0x393   : > { %5647 = vst [vmem:[%s8185_s17 + $0xb8] sm:$0xff] %v5606_v36  ;;  %v5566_v33 = vadd.f32 %v9343_v10, %v5436_v45 }
 0x394   : > { %v5333_v11 = vpop.f32.mrb[82].mxu0 }
 0x395   : > { %v4776_v50 = vpop.f32.mrb[82].mxu1  ;;  %v5607_v54 = vmax.f32 %v5566_v33, 0.0  ;;  %v5437_v52 = vadd.f32 %v5333_v11, %v4875_v41  ;;  %v7587_v35 = vpop.f32.mrb[83].mxu0 }
 0x396   : > { %v4876_v53 = vadd.f32 %v4776_v50, %v9291_v6  ;;  %v7465_v58 = vpop.f32.mrb[83].mxu1 }
 0x397   : > { %5648 = vst [vmem:[%s8185_s17 + $0xc0] sm:$0xff] %v5607_v54  ;;  %v5567_v61 = vadd.f32 %v9343_v10, %v5437_v52 }
 0x398   : > { %v5338_v63 = vpop.f32.mrb[84].mxu0 }
 0x399   : > { %v4781_v57 = vpop.f32.mrb[84].mxu1  ;;  %v5608_v56 = vmax.f32 %v5567_v61, 0.0  ;;  %v5438_v3 = vadd.f32 %v5338_v63, %v4876_v53  ;;  %v7590_v60 = vpop.f32.mrb[85].mxu0 }
 0x39a   : > { %v4877_v32 = vadd.f32 %v4781_v57, %v9300_v8  ;;  %v7468_v2 = vpop.f32.mrb[85].mxu1 }
 0x39b   : > { %5649 = vst [vmem:[%s8185_s17 + $0xc8] sm:$0xff] %v5608_v56  ;;  %v5568_v4 = vadd.f32 %v9343_v10, %v5438_v3 }
 0x39c   : > { %v5343_v7 = vpop.f32.mrb[86].mxu0 }
 0x39d   : > { %v4786_v6 = vpop.f32.mrb[86].mxu1  ;;  %v5609_v40 = vmax.f32 %v5568_v4, 0.0  ;;  %v5439_v13 = vadd.f32 %v5343_v7, %v4877_v32  ;;  %v7593_v18 = vpop.f32.mrb[87].mxu0 }
 0x39e   : > { %v4878_v23 = vadd.f32 %v4786_v6, %v9306_v42  ;;  %v7471_v43 = vpop.f32.mrb[87].mxu1  ;;  %v4446_v6 = vld [vmem:[%s8185_s17 + $0x118] sm:$0xff] }
 0x39f   : > { %5650 = vst [vmem:[%s8185_s17 + $0xd0] sm:$0xff] %v5609_v40  ;;  %v5569_v37 = vadd.f32 %v9343_v10, %v5439_v13 }
 0x3a0   : > { %v5348_v14 = vpop.f32.mrb[88].mxu0 }
 0x3a1   : > { %v4791_v8 = vpop.f32.mrb[88].mxu1  ;;  %v5610_v55 = vmax.f32 %v5569_v37, 0.0  ;;  %v5440_v22 = vadd.f32 %v5348_v14, %v4878_v23  ;;  %v7596_v44 = vpop.f32.mrb[89].mxu0 }
 0x3a2   : > { %v4879_v29 = vadd.f32 %v4791_v8, %v9310_v21  ;;  %v7474_v15 = vpop.f32.mrb[89].mxu1  ;;  %v4447_v8 = vld [vmem:[%s8185_s17 + $0x120] sm:$0xff] }
 0x3a3   : > { %5651 = vst [vmem:[%s8185_s17 + $0xd8] sm:$0xff] %v5610_v55  ;;  %v5570_v20 = vadd.f32 %v9343_v10, %v5440_v22 }
 0x3a4   : > { %v5353_v9 = vpop.f32.mrb[90].mxu0 }
 0x3a5   : > { %v4796_v42 = vpop.f32.mrb[90].mxu1  ;;  %v5611_v1 = vmax.f32 %v5570_v20, 0.0  ;;  %v5441_v24 = vadd.f32 %v5353_v9, %v4879_v29  ;;  %v7599_v46 = vpop.f32.mrb[91].mxu0  ;;  %v4448_v9 = vld [vmem:[%s8185_s17 + $0x128] sm:$0xff] }
 0x3a6   : > { %v4880_v39 = vadd.f32 %v4796_v42, %v9313_v51  ;;  %v7477_v16 = vpop.f32.mrb[91].mxu1 }
 0x3a7   : > { %5652 = vst [vmem:[%s8185_s17 + $0xe0] sm:$0xff] %v5611_v1  ;;  %v5571_v27 = vadd.f32 %v9343_v10, %v5441_v24 }
 0x3a8   : > { %v5358_v26 = vpop.f32.mrb[92].mxu0 }
 0x3a9   : > { %v4801_v21 = vpop.f32.mrb[92].mxu1  ;;  %v5612_v48 = vmax.f32 %v5571_v27, 0.0  ;;  %v5442_v62 = vadd.f32 %v5358_v26, %v4880_v39  ;;  %v7602_v30 = vpop.f32.mrb[93].mxu0 }
 0x3aa   : > { %v4881_v19 = vadd.f32 %v4801_v21, %v9316_v59  ;;  %v7480_v28 = vpop.f32.mrb[93].mxu1 }
 0x3ab   : > { %5653 = vst [vmem:[%s8185_s17 + $0xe8] sm:$0xff] %v5612_v48  ;;  %v5572_v34 = vadd.f32 %v9343_v10, %v5442_v62 }
 0x3ac   : > { %v5363_v38 = vpop.f32.mrb[94].mxu0 }
 0x3ad   : > { %v4806_v51 = vpop.f32.mrb[94].mxu1  ;;  %v5613_v31 = vmax.f32 %v5572_v34, 0.0  ;;  %v5443_v41 = vadd.f32 %v5363_v38, %v4881_v19  ;;  %v7605_v47 = vpop.f32.mrb[95].mxu0  ;;  %v4449_v19 = vld [vmem:[%s8185_s17 + $0x130] sm:$0xff] }
 0x3ae   : > { %v4882_v5 = vadd.f32 %v4806_v51, %v9319_v0  ;;  %v7483_v25 = vpop.f32.mrb[95].mxu1 }
 0x3af   : > { %5654 = vst [vmem:[%s8185_s17 + $0xf0] sm:$0xff] %v5613_v31  ;;  %v5573_v36 = vadd.f32 %v9343_v10, %v5443_v41  ;;  %v4450_v25 = vld [vmem:[%s8185_s17 + $0x138] sm:$0xff] }
 0x3b0   : > { %v5368_v45 = vpop.f32.mrb[96].mxu0 }
 0x3b1   : > { %v4811_v59 = vpop.f32.mrb[96].mxu1  ;;  %v5614_v50 = vmax.f32 %v5573_v36, 0.0  ;;  %v5444_v11 = vadd.f32 %v5368_v45, %v4882_v5  ;;  %v7608_v53 = vpop.f32.mrb[97].mxu0 }
 0x3b2   : > { %v4883_v49 = vadd.f32 %v4811_v59, %v9322_v17  ;;  %v7486_v33 = vpop.f32.mrb[97].mxu1 }
 0x3b3   : > { %5655 = vst [vmem:[%s8185_s17 + $0xf8] sm:$0xff] %v5614_v50  ;;  %v5574_v58 = vadd.f32 %v9343_v10, %v5444_v11  ;;  %v4451_v50 = vld [vmem:[%s8185_s17 + $0x140] sm:$0xff] }
 0x3b4   : > { %v5373_v54 = vpop.f32.mrb[98].mxu0 }
 0x3b5   : > { %v4816_v0 = vpop.f32.mrb[98].mxu1  ;;  %v5615_v61 = vmax.f32 %v5574_v58, 0.0  ;;  %v5445_v57 = vadd.f32 %v5373_v54, %v4883_v49  ;;  %v7611_v63 = vpop.f32.mrb[99].mxu0 }
 0x3b6   : > { %v4884_v52 = vadd.f32 %v4816_v0, %v9325_v12  ;;  %v7489_v35 = vpop.f32.mrb[99].mxu1 }
 0x3b7   : > { %5656 = vst [vmem:[%s8185_s17 + $0x100] sm:$0xff] %v5615_v61  ;;  %v5575_v17 = vadd.f32 %v9343_v10, %v5445_v57 }
 0x3b8   : > { %v5378_v2 = vpop.f32.mrb[100].mxu0 }
 0x3b9   : > { %v4821_v32 = vpop.f32.mrb[100].mxu1  ;;  %v5616_v3 = vmax.f32 %v5575_v17, 0.0  ;;  %v5446_v60 = vadd.f32 %v5378_v2, %v4884_v52  ;;  %v7614_v4 = vpop.f32.mrb[101].mxu0 }
 0x3ba   : > { %v7492_v56 = vpop.f32.mrb[101].mxu1  ;;  %v4885_v7 = vadd.f32 %v4821_v32, %v4446_v6 }
 0x3bb   : > { %5657 = vst [vmem:[%s8185_s17 + $0x108] sm:$0xff] %v5616_v3  ;;  %v5576_v12 = vadd.f32 %v9343_v10, %v5446_v60 }
 0x3bc   : > { %v5383_v43 = vpop.f32.mrb[102].mxu0 }
 0x3bd   : > { %v4826_v23 = vpop.f32.mrb[102].mxu1  ;;  %v5617_v13 = vmax.f32 %v5576_v12, 0.0  ;;  %v5447_v18 = vadd.f32 %v5383_v43, %v4885_v7  ;;  %v7617_v37 = vpop.f32.mrb[103].mxu0 }
 0x3be   : > { %v7495_v40 = vpop.f32.mrb[103].mxu1  ;;  %v4886_v14 = vadd.f32 %v4826_v23, %v4447_v8 }
 0x3bf   : > { %5658 = vst [vmem:[%s8185_s17 + $0x110] sm:$0xff] %v5617_v13  ;;  %v5577_v29 = vadd.f32 %v9343_v10, %v5447_v18 }
 0x3c0   : > { %v5388_v55 = vpop.f32.mrb[104].mxu0 }
 0x3c1   : > { %v4831_v15 = vpop.f32.mrb[104].mxu1  ;;  %v5618_v44 = vmax.f32 %v5577_v29, 0.0  ;;  %v5448_v20 = vadd.f32 %v5388_v55, %v4886_v14  ;;  %v7620_v42 = vpop.f32.mrb[105].mxu0 }
 0x3c2   : > { %v7498_v22 = vpop.f32.mrb[105].mxu1  ;;  %v4887_v39 = vadd.f32 %v4831_v15, %v4448_v9 }
 0x3c3   : > { %5659 = vst [vmem:[%s8185_s17 + $0x118] sm:$0xff] %v5618_v44  ;;  %v5578_v16 = vadd.f32 %v9343_v10, %v5448_v20 }
 0x3c4   : > { %v5393_v24 = vpop.f32.mrb[106].mxu0 }
 0x3c5   : > { %v4836_v1 = vpop.f32.mrb[106].mxu1  ;;  %v5619_v27 = vmax.f32 %v5578_v16, 0.0  ;;  %v5449_v21 = vadd.f32 %v5393_v24, %v4887_v39  ;;  %v7623_v26 = vpop.f32.mrb[107].mxu0 }
 0x3c6   : > { %v7501_v46 = vpop.f32.mrb[107].mxu1  ;;  %v4888_v28 = vadd.f32 %v4836_v1, %v4449_v19 }
 0x3c7   : > { %5660 = vst [vmem:[%s8185_s17 + $0x120] sm:$0xff] %v5619_v27  ;;  %v5579_v48 = vadd.f32 %v9343_v10, %v5449_v21 }
 0x3c8   : > { %v5398_v30 = vpop.f32.mrb[108].mxu0 }
 0x3c9   : > { %v4841_v62 = vpop.f32.mrb[108].mxu1  ;;  %v5620_v51 = vmax.f32 %v5579_v48, 0.0  ;;  %v5450_v38 = vadd.f32 %v5398_v30, %v4888_v28  ;;  %v7626_v5 = vpop.f32.mrb[109].mxu0 }
 0x3ca   : > { %v7504_v34 = vpop.f32.mrb[109].mxu1  ;;  %v4889_v31 = vadd.f32 %v4841_v62, %v4450_v25 }
 0x3cb   : > { %5661 = vst [vmem:[%s8185_s17 + $0x128] sm:$0xff] %v5620_v51  ;;  %v5580_v41 = vadd.f32 %v9343_v10, %v5450_v38 }
 0x3cc   : > { %v5403_v36 = vpop.f32.mrb[110].mxu0 }
 0x3cd   : > { %v4846_v47 = vpop.f32.mrb[110].mxu1  ;;  %v5621_v45 = vmax.f32 %v5580_v41, 0.0  ;;  %v5451_v49 = vadd.f32 %v5403_v36, %v4889_v31  ;;  %v7629_v33 = vpop.f32.mrb[111].mxu0 }
 0x3ce   : > { %v7507_v59 = vpop.f32.mrb[111].mxu1  ;;  %v4890_v11 = vadd.f32 %v4846_v47, %v4451_v50 }
 0x3cf   : > { %5662 = vst [vmem:[%s8185_s17 + $0x130] sm:$0xff] %v5621_v45  ;;  %v5581_v53 = vadd.f32 %v9343_v10, %v5451_v49 }
 0x3d0   : > { %v5408_v58 = vpop.f32.mrb[112].mxu0 }
 0x3d1   : > { %v5622_v0 = vmax.f32 %v5581_v53, 0.0  ;;  %v5452_v54 = vadd.f32 %v5408_v58, %v4890_v11  ;;  %v7632_v52 = vpop.f32.mrb[113].mxu0 }
 0x3d3   : > { %5663 = vst [vmem:[%s8185_s17 + $0x138] sm:$0xff] %v5622_v0  ;;  %v5582_v35 = vadd.f32 %v9343_v10, %v5452_v54 }
 0x3d5   : > { %v5623_v61 = vmax.f32 %v5582_v35, 0.0 }
 0x3d7   : > { %5664 = vst [vmem:[%s8185_s17 + $0x140] sm:$0xff] %v5623_v61 }
 0x3d8 PF: > { %s14_s15 = sadd.s32 1, %s7651_s15  }
 0x3d9   : > { %p11_p6 = scmp.ge.s32.totalorder %s14_s15, 4  }
 0x3db   :  { %13 = sbr.rel (!%p11_p6) target bundleno = 1 (0x1), region = 77 }

</bundles_post_ra>
